<compile_context>
chip_gen: v6e
topology: v6e:2x2x1
jax: 0.10.0
libtpu: 0.0.40
codegen_flags: <defaults>
</compile_context>

<pallas_src>
import math
from functools import partial

import jax
import jax.numpy as jnp
from jax.experimental import pallas as pl
from jax.experimental.pallas import tpu as pltpu  # noqa: F401  (TPU backend)

# ----------------------- model configuration (small) -----------------------
VOCAB = 50
D_MODEL = 32
NHEAD = 4
NUM_LAYERS = 2
D_FF = 64
SEQ = 8          # tokens per sentence (first + last -> total seq = 16)
BATCH = 2
LN_EPS = 1e-5


# ----------------------------- kernel helpers -------------------------------
def _layer_norm(x, gamma, beta, eps):
    mu = jnp.mean(x, axis=-1, keepdims=True)
    var = jnp.mean((x - mu) * (x - mu), axis=-1, keepdims=True)
    return (x - mu) * jax.lax.rsqrt(var + eps) * gamma + beta


def _bert_kernel(nhead, num_layers, eps,
                 x_ref, segpos_ref, wattn_ref, wff_ref, vecs_ref,
                 o_ref):
    """Fused BERT forward: embedding add + `num_layers` post-norm encoder layers."""
    B, S, D = x_ref.shape
    BS = B * S
    dh = D // nhead
    DF = wff_ref.shape[1] - D          # rows: [w1 (D) ; w2 (DF)]

    # word-emb + (segment + positional) constant, broadcast over batch.
    h = (x_ref[...] + segpos_ref[...]).reshape(BS, D)   # fold batch into sublanes

    for l in range(num_layers):                          # static unroll (L = 2)
        wa = wattn_ref[l]                                # (D, 4D)
        wf = wff_ref[l]                                  # (D+DF, DF)
        vec = vecs_ref[l]                                # (8, 3D)

        wqkv = wa[:, :3 * D]                             # (D, 3D)  q-part pre-scaled
        wo = wa[:, 3 * D:]                               # (D, D)
        w1 = wf[:D, :DF]                                 # (D, DF)
        w2 = wf[D:, :D]                                  # (DF, D)
        bqkv = vec[0:1, :3 * D]                          # (1, 3D)
        b1 = vec[1:2, :DF]                               # (1, DF)
        bo = vec[2:3, :D]
        b2 = vec[3:4, :D]
        g1, bln1 = vec[4:5, :D], vec[5:6, :D]
        g2, bln2 = vec[6:7, :D], vec[7:8, :D]

        # fused QKV projection: a single (BS, D) x (D, 3D) matmul.
        qkv = jnp.dot(h, wqkv, preferred_element_type=jnp.float32) + bqkv
        q = qkv[:, 0 * D:1 * D].reshape(B, S, D)
        v = qkv[:, 2 * D:3 * D].reshape(B, S, D)
        # one XLU transpose per layer (heads slice the transposed copy below)
        kt = jnp.swapaxes(qkv[:, 1 * D:2 * D].reshape(B, S, D), 1, 2)   # (B, D, S)

        # Self-attention. Heads are a static loop over dh slices (dh = 8); the
        # batch dimension rides as a dot_general batch dim. Head contexts are
        # lane-concatenated and sent through ONE (BS,D)x(D,D) output projection.
        # TODO(synk): src_key_padding_mask (optional additive key mask) not wired in.
        ctx_heads = []
        for hh in range(nhead):
            sl = slice(hh * dh, (hh + 1) * dh)
            s = jnp.einsum('bqd,bdk->bqk', q[:, :, sl], kt[:, sl, :],
                           preferred_element_type=jnp.float32)
            s = s - jnp.max(s, axis=-1, keepdims=True)
            p = jnp.exp(s)
            p = p / jnp.sum(p, axis=-1, keepdims=True)   # exact softmax denom
            ctx_heads.append(jnp.einsum('bqk,bkd->bqd', p, v[:, :, sl],
                                        preferred_element_type=jnp.float32))
        ctx = jnp.concatenate(ctx_heads, axis=-1).reshape(BS, D)
        attn = jnp.dot(ctx, wo, preferred_element_type=jnp.float32) + bo

        # residual + LayerNorm 1 (norm_first=False -> post-norm)
        h1 = _layer_norm(h + attn, g1, bln1, eps)

        # feed-forward with ReLU
        f = jnp.dot(h1, w1, preferred_element_type=jnp.float32) + b1
        f = jnp.maximum(f, 0.0)
        f = jnp.dot(f, w2, preferred_element_type=jnp.float32) + b2

        # residual + LayerNorm 2
        h = _layer_norm(h1 + f, g2, bln2, eps)

    o_ref[...] = h.reshape(B, S, D)


# ------------------------- one-time weight packing ---------------------------
def pack_params(params):
    """Pack per-layer weights into 3 stacked slabs (built ONCE at init time)."""
    dh = D_MODEL // NHEAD
    scale = 1.0 / math.sqrt(dh)         # fold attention scale into q weights/bias
    vec_w = max(3 * D_MODEL, D_FF)
    wattn, wff, vecs = [], [], []
    for lyr in params["layers"]:
        wattn.append(jnp.concatenate(
            [lyr["wq"] * scale, lyr["wk"], lyr["wv"], lyr["wo"]], axis=1))   # (D, 4D)
        wf = jnp.zeros((D_MODEL + D_FF, max(D_FF, D_MODEL)), jnp.float32)
        wf = wf.at[:D_MODEL, :D_FF].set(lyr["w1"])
        wf = wf.at[D_MODEL:, :D_MODEL].set(lyr["w2"])
        wff.append(wf)
        v = jnp.zeros((8, vec_w), jnp.float32)
        bqkv = jnp.concatenate([lyr["bq"] * scale, lyr["bk"], lyr["bv"]], axis=1)[0]
        v = v.at[0, :3 * D_MODEL].set(bqkv)
        v = v.at[1, :D_FF].set(lyr["b1"][0])
        v = v.at[2, :D_MODEL].set(lyr["bo"][0])
        v = v.at[3, :D_MODEL].set(lyr["b2"][0])
        v = v.at[4, :D_MODEL].set(lyr["g1"][0])
        v = v.at[5, :D_MODEL].set(lyr["bln1"][0])
        v = v.at[6, :D_MODEL].set(lyr["g2"][0])
        v = v.at[7, :D_MODEL].set(lyr["bln2"][0])
        vecs.append(v)
    stk = lambda xs: jnp.stack(xs, axis=0)
    return dict(wattn=stk(wattn), wff=stk(wff), vecs=stk(vecs))


def sinusoidal_pos_encoding(seq_len, d_model):
    pos = jnp.arange(seq_len, dtype=jnp.float32)[:, None]
    i = jnp.arange(0, d_model, 2, dtype=jnp.float32)[None, :]
    angle = pos / jnp.power(10000.0, i / d_model)
    pe = jnp.zeros((seq_len, d_model), jnp.float32)
    pe = pe.at[:, 0::2].set(jnp.sin(angle))
    pe = pe.at[:, 1::2].set(jnp.cos(angle))
    return pe


def build_segpos(params, seq_a, seq_b):
    """(segment + positional) constant, shape (1, seq_a+seq_b, D). Built once."""
    D = D_MODEL
    seg = jnp.concatenate(
        [jnp.broadcast_to(params["seg_emb"][0], (seq_a, D)),
         jnp.broadcast_to(params["seg_emb"][1], (seq_b, D))], axis=0)
    pos = sinusoidal_pos_encoding(seq_a + seq_b, D)
    return (seg + pos)[None]


# ------------------------ parameter initialization --------------------------
def init_params(key):
    keys = jax.random.split(key, 2 + NUM_LAYERS)
    params = {
        "word_emb": 0.02 * jax.random.normal(keys[0], (VOCAB, D_MODEL), jnp.float32),
        "seg_emb": 0.02 * jax.random.normal(keys[1], (2, 1, D_MODEL), jnp.float32),
        "layers": [],
    }
    for l in range(NUM_LAYERS):
        k = jax.random.split(keys[2 + l], 6)
        s = 1.0 / math.sqrt(D_MODEL)
        layer = {
            "wq": s * jax.random.normal(k[0], (D_MODEL, D_MODEL), jnp.float32),
            "wk": s * jax.random.normal(k[1], (D_MODEL, D_MODEL), jnp.float32),
            "wv": s * jax.random.normal(k[2], (D_MODEL, D_MODEL), jnp.float32),
            "bq": jnp.zeros((1, D_MODEL), jnp.float32),
            "bk": jnp.zeros((1, D_MODEL), jnp.float32),
            "bv": jnp.zeros((1, D_MODEL), jnp.float32),
            "wo": s * jax.random.normal(k[3], (D_MODEL, D_MODEL), jnp.float32),
            "bo": jnp.zeros((1, D_MODEL), jnp.float32),
            "w1": s * jax.random.normal(k[4], (D_MODEL, D_FF), jnp.float32),
            "b1": jnp.zeros((1, D_FF), jnp.float32),
            "w2": (1.0 / math.sqrt(D_FF)) *
                  jax.random.normal(k[5], (D_FF, D_MODEL), jnp.float32),
            "b2": jnp.zeros((1, D_MODEL), jnp.float32),
            "g1": jnp.ones((1, D_MODEL), jnp.float32),
            "bln1": jnp.zeros((1, D_MODEL), jnp.float32),
            "g2": jnp.ones((1, D_MODEL), jnp.float32),
            "bln2": jnp.zeros((1, D_MODEL), jnp.float32),
        }
        params["layers"].append(layer)
    return params


# ------------------------------ forward (jitted) ------------------------------
@jax.jit
def bert_apply(word_emb, segpos, wattn, wff, vecs, first_sentence_ids, last_sentence_ids):
    """first/last_sentence_ids: (B, SEQ) int32 token ids. Returns (B, 2*SEQ, D)."""
    # word embedding (gather) — plain-JAX glue
    xa = word_emb[first_sentence_ids]                   # (B, SEQ, D)
    xb = word_emb[last_sentence_ids]                    # (B, SEQ, D)
    x = jnp.concatenate([xa, xb], axis=1)               # (B, S, D)
    B, S, D = x.shape
    L = wattn.shape[0]

    kernel = partial(_bert_kernel, NHEAD, L, LN_EPS)
    # Single invocation, no grid: every operand is one whole-array VMEM block
    # (total resident footprint < 0.1 MiB on any TPU generation).
    return pl.pallas_call(
        kernel,
        out_shape=jax.ShapeDtypeStruct((B, S, D), jnp.float32),
    )(x, segpos, wattn, wff, vecs)


# -------------------------------- main ---------------------------------------
if __name__ == "__main__":
    key = jax.random.PRNGKey(0)
    pkey, ikey1, ikey2 = jax.random.split(key, 3)

    params = init_params(pkey)
    # One-time packing (hoisted out of the per-call forward, per perf review).
    packed = pack_params(params)
    segpos = build_segpos(params, SEQ, SEQ)

    first_ids = jax.random.randint(ikey1, (BATCH, SEQ), 0, VOCAB, dtype=jnp.int32)
    last_ids = jax.random.randint(ikey2, (BATCH, SEQ), 0, VOCAB, dtype=jnp.int32)

    out = bert_apply(params["word_emb"], segpos, packed["wattn"], packed["wff"],
                     packed["vecs"], first_ids, last_ids)
    out = jax.block_until_ready(out)
    # second (warm) call exercises the cached jit path
    out = jax.block_until_ready(
        bert_apply(params["word_emb"], segpos, packed["wattn"], packed["wff"],
                   packed["vecs"], first_ids, last_ids))

    assert out.shape == (BATCH, 2 * SEQ, D_MODEL)
    assert bool(jnp.all(jnp.isfinite(out)))
    print("KERNEL_OK")
</pallas_src>

<mosaic_0001>
module attributes {stable_mosaic.version = 11 : i64} {
  func.func @_bert_kernel(%arg0: memref<2x16x32xf32, #tpu.memory_space<vmem>>, %arg1: memref<1x16x32xf32, #tpu.memory_space<vmem>>, %arg2: memref<2x32x128xf32, #tpu.memory_space<vmem>>, %arg3: memref<2x96x64xf32, #tpu.memory_space<vmem>>, %arg4: memref<2x8x96xf32, #tpu.memory_space<vmem>>, %arg5: memref<2x16x32xf32, #tpu.memory_space<vmem>>) attributes {dimension_semantics = [], scalar_prefetch = 0 : i64, scratch_operands = 0 : i64, tpu.core_type = #tpu.core_type<tc>} {
    %c0 = arith.constant 0 : index
    %c0_0 = arith.constant 0 : index
    %c0_1 = arith.constant 0 : index
    %0 = vector.load %arg0[%c0, %c0_0, %c0_1] : memref<2x16x32xf32, #tpu.memory_space<vmem>>, vector<2x16x32xf32>
    %c0_2 = arith.constant 0 : index
    %c0_3 = arith.constant 0 : index
    %c0_4 = arith.constant 0 : index
    %1 = vector.load %arg1[%c0_2, %c0_3, %c0_4] : memref<1x16x32xf32, #tpu.memory_space<vmem>>, vector<1x16x32xf32>
    %2 = vector.broadcast %1 : vector<1x16x32xf32> to vector<2x16x32xf32>
    %3 = arith.addf %0, %2 : vector<2x16x32xf32>
    %4 = vector.shape_cast %3 : vector<2x16x32xf32> to vector<32x32xf32>
    %c0_5 = arith.constant 0 : index
    %c0_6 = arith.constant 0 : index
    %c0_7 = arith.constant 0 : index
    %5 = vector.load %arg2[%c0_5, %c0_6, %c0_7] : memref<2x32x128xf32, #tpu.memory_space<vmem>>, vector<1x32x128xf32>
    %6 = vector.shape_cast %5 : vector<1x32x128xf32> to vector<32x128xf32>
    %c0_8 = arith.constant 0 : index
    %c0_9 = arith.constant 0 : index
    %c0_10 = arith.constant 0 : index
    %7 = vector.load %arg3[%c0_8, %c0_9, %c0_10] : memref<2x96x64xf32, #tpu.memory_space<vmem>>, vector<1x96x64xf32>
    %8 = vector.shape_cast %7 : vector<1x96x64xf32> to vector<96x64xf32>
    %c0_11 = arith.constant 0 : index
    %c0_12 = arith.constant 0 : index
    %c0_13 = arith.constant 0 : index
    %9 = vector.load %arg4[%c0_11, %c0_12, %c0_13] : memref<2x8x96xf32, #tpu.memory_space<vmem>>, vector<1x8x96xf32>
    %10 = vector.shape_cast %9 : vector<1x8x96xf32> to vector<8x96xf32>
    %11 = vector.extract_strided_slice %6 {offsets = [0, 0], sizes = [32, 96], strides = [1, 1]} : vector<32x128xf32> to vector<32x96xf32>
    %12 = vector.extract_strided_slice %6 {offsets = [0, 96], sizes = [32, 32], strides = [1, 1]} : vector<32x128xf32> to vector<32x32xf32>
    %13 = vector.extract_strided_slice %8 {offsets = [0, 0], sizes = [32, 64], strides = [1, 1]} : vector<96x64xf32> to vector<32x64xf32>
    %14 = vector.extract_strided_slice %8 {offsets = [32, 0], sizes = [64, 32], strides = [1, 1]} : vector<96x64xf32> to vector<64x32xf32>
    %15 = vector.extract_strided_slice %10 {offsets = [0, 0], sizes = [1, 96], strides = [1, 1]} : vector<8x96xf32> to vector<1x96xf32>
    %16 = vector.extract_strided_slice %10 {offsets = [1, 0], sizes = [1, 64], strides = [1, 1]} : vector<8x96xf32> to vector<1x64xf32>
    %17 = vector.extract_strided_slice %10 {offsets = [2, 0], sizes = [1, 32], strides = [1, 1]} : vector<8x96xf32> to vector<1x32xf32>
    %18 = vector.extract_strided_slice %10 {offsets = [3, 0], sizes = [1, 32], strides = [1, 1]} : vector<8x96xf32> to vector<1x32xf32>
    %19 = vector.extract_strided_slice %10 {offsets = [4, 0], sizes = [1, 32], strides = [1, 1]} : vector<8x96xf32> to vector<1x32xf32>
    %20 = vector.extract_strided_slice %10 {offsets = [5, 0], sizes = [1, 32], strides = [1, 1]} : vector<8x96xf32> to vector<1x32xf32>
    %21 = vector.extract_strided_slice %10 {offsets = [6, 0], sizes = [1, 32], strides = [1, 1]} : vector<8x96xf32> to vector<1x32xf32>
    %22 = vector.extract_strided_slice %10 {offsets = [7, 0], sizes = [1, 32], strides = [1, 1]} : vector<8x96xf32> to vector<1x32xf32>
    %cst = arith.constant dense<0.000000e+00> : vector<32x96xf32>
    %23 = tpu.matmul %4, %11, %cst {dimension_numbers = #tpu.dot_dimension_numbers<[1], [0], [0], [1], [0, 0, 1, 1], [], []>} : vector<32x32xf32>, vector<32x96xf32>, vector<32x96xf32> -> vector<32x96xf32>
    %24 = vector.broadcast %15 : vector<1x96xf32> to vector<32x96xf32>
    %25 = arith.addf %23, %24 : vector<32x96xf32>
    %26 = vector.extract_strided_slice %25 {offsets = [0, 0], sizes = [32, 32], strides = [1, 1]} : vector<32x96xf32> to vector<32x32xf32>
    %27 = vector.shape_cast %26 : vector<32x32xf32> to vector<2x16x32xf32>
    %28 = vector.extract_strided_slice %25 {offsets = [0, 64], sizes = [32, 32], strides = [1, 1]} : vector<32x96xf32> to vector<32x32xf32>
    %29 = vector.shape_cast %28 : vector<32x32xf32> to vector<2x16x32xf32>
    %30 = vector.extract_strided_slice %25 {offsets = [0, 32], sizes = [32, 32], strides = [1, 1]} : vector<32x96xf32> to vector<32x32xf32>
    %31 = vector.shape_cast %30 : vector<32x32xf32> to vector<2x16x32xf32>
    %32 = tpu.transpose %31, [0, 2, 1] : vector<2x16x32xf32> -> vector<2x32x16xf32>
    %33 = vector.extract_strided_slice %27 {offsets = [0, 0, 0], sizes = [2, 16, 8], strides = [1, 1, 1]} : vector<2x16x32xf32> to vector<2x16x8xf32>
    %34 = vector.extract_strided_slice %32 {offsets = [0, 0, 0], sizes = [2, 8, 16], strides = [1, 1, 1]} : vector<2x32x16xf32> to vector<2x8x16xf32>
    "tpu.trace_start"() <{level = 10 : i32, message = "bqd,bdk->bqk"}> : () -> ()
    %cst_14 = arith.constant dense<0.000000e+00> : vector<2x16x16xf32>
    %35 = tpu.matmul %33, %34, %cst_14 {dimension_numbers = #tpu.dot_dimension_numbers<[2], [1], [1], [2], [0, 0, 0, 1, 1, 2], [0], [0]>} : vector<2x16x8xf32>, vector<2x8x16xf32>, vector<2x16x16xf32> -> vector<2x16x16xf32>
    "tpu.trace_stop"() : () -> ()
    %cst_15 = arith.constant dense<0xFF800000> : vector<2x16xf32>
    %36 = vector.multi_reduction <maximumf>, %35, %cst_15 [2] : vector<2x16x16xf32> to vector<2x16xf32>
    %37 = vector.shape_cast %36 : vector<2x16xf32> to vector<2x16x1xf32>
    %38 = vector.broadcast %37 : vector<2x16x1xf32> to vector<2x16x16xf32>
    %39 = arith.subf %35, %38 : vector<2x16x16xf32>
    %40 = math.exp %39 : vector<2x16x16xf32>
    %cst_16 = arith.constant dense<0.000000e+00> : vector<2x16xf32>
    %41 = vector.multi_reduction <add>, %40, %cst_16 [2] : vector<2x16x16xf32> to vector<2x16xf32>
    %42 = vector.shape_cast %41 : vector<2x16xf32> to vector<2x16x1xf32>
    %43 = vector.broadcast %42 : vector<2x16x1xf32> to vector<2x16x16xf32>
    %44 = arith.divf %40, %43 : vector<2x16x16xf32>
    %45 = vector.extract_strided_slice %29 {offsets = [0, 0, 0], sizes = [2, 16, 8], strides = [1, 1, 1]} : vector<2x16x32xf32> to vector<2x16x8xf32>
    "tpu.trace_start"() <{level = 10 : i32, message = "bqk,bkd->bqd"}> : () -> ()
    %cst_17 = arith.constant dense<0.000000e+00> : vector<2x16x8xf32>
    %46 = tpu.matmul %44, %45, %cst_17 {dimension_numbers = #tpu.dot_dimension_numbers<[2], [1], [1], [2], [0, 0, 0, 1, 1, 2], [0], [0]>} : vector<2x16x16xf32>, vector<2x16x8xf32>, vector<2x16x8xf32> -> vector<2x16x8xf32>
    "tpu.trace_stop"() : () -> ()
    %47 = vector.extract_strided_slice %27 {offsets = [0, 0, 8], sizes = [2, 16, 8], strides = [1, 1, 1]} : vector<2x16x32xf32> to vector<2x16x8xf32>
    %48 = vector.extract_strided_slice %32 {offsets = [0, 8, 0], sizes = [2, 8, 16], strides = [1, 1, 1]} : vector<2x32x16xf32> to vector<2x8x16xf32>
    "tpu.trace_start"() <{level = 10 : i32, message = "bqd,bdk->bqk"}> : () -> ()
    %cst_18 = arith.constant dense<0.000000e+00> : vector<2x16x16xf32>
    %49 = tpu.matmul %47, %48, %cst_18 {dimension_numbers = #tpu.dot_dimension_numbers<[2], [1], [1], [2], [0, 0, 0, 1, 1, 2], [0], [0]>} : vector<2x16x8xf32>, vector<2x8x16xf32>, vector<2x16x16xf32> -> vector<2x16x16xf32>
    "tpu.trace_stop"() : () -> ()
    %cst_19 = arith.constant dense<0xFF800000> : vector<2x16xf32>
    %50 = vector.multi_reduction <maximumf>, %49, %cst_19 [2] : vector<2x16x16xf32> to vector<2x16xf32>
    %51 = vector.shape_cast %50 : vector<2x16xf32> to vector<2x16x1xf32>
    %52 = vector.broadcast %51 : vector<2x16x1xf32> to vector<2x16x16xf32>
    %53 = arith.subf %49, %52 : vector<2x16x16xf32>
    %54 = math.exp %53 : vector<2x16x16xf32>
    %cst_20 = arith.constant dense<0.000000e+00> : vector<2x16xf32>
    %55 = vector.multi_reduction <add>, %54, %cst_20 [2] : vector<2x16x16xf32> to vector<2x16xf32>
    %56 = vector.shape_cast %55 : vector<2x16xf32> to vector<2x16x1xf32>
    %57 = vector.broadcast %56 : vector<2x16x1xf32> to vector<2x16x16xf32>
    %58 = arith.divf %54, %57 : vector<2x16x16xf32>
    %59 = vector.extract_strided_slice %29 {offsets = [0, 0, 8], sizes = [2, 16, 8], strides = [1, 1, 1]} : vector<2x16x32xf32> to vector<2x16x8xf32>
    "tpu.trace_start"() <{level = 10 : i32, message = "bqk,bkd->bqd"}> : () -> ()
    %cst_21 = arith.constant dense<0.000000e+00> : vector<2x16x8xf32>
    %60 = tpu.matmul %58, %59, %cst_21 {dimension_numbers = #tpu.dot_dimension_numbers<[2], [1], [1], [2], [0, 0, 0, 1, 1, 2], [0], [0]>} : vector<2x16x16xf32>, vector<2x16x8xf32>, vector<2x16x8xf32> -> vector<2x16x8xf32>
    "tpu.trace_stop"() : () -> ()
    %61 = vector.extract_strided_slice %27 {offsets = [0, 0, 16], sizes = [2, 16, 8], strides = [1, 1, 1]} : vector<2x16x32xf32> to vector<2x16x8xf32>
    %62 = vector.extract_strided_slice %32 {offsets = [0, 16, 0], sizes = [2, 8, 16], strides = [1, 1, 1]} : vector<2x32x16xf32> to vector<2x8x16xf32>
    "tpu.trace_start"() <{level = 10 : i32, message = "bqd,bdk->bqk"}> : () -> ()
    %cst_22 = arith.constant dense<0.000000e+00> : vector<2x16x16xf32>
    %63 = tpu.matmul %61, %62, %cst_22 {dimension_numbers = #tpu.dot_dimension_numbers<[2], [1], [1], [2], [0, 0, 0, 1, 1, 2], [0], [0]>} : vector<2x16x8xf32>, vector<2x8x16xf32>, vector<2x16x16xf32> -> vector<2x16x16xf32>
    "tpu.trace_stop"() : () -> ()
    %cst_23 = arith.constant dense<0xFF800000> : vector<2x16xf32>
    %64 = vector.multi_reduction <maximumf>, %63, %cst_23 [2] : vector<2x16x16xf32> to vector<2x16xf32>
    %65 = vector.shape_cast %64 : vector<2x16xf32> to vector<2x16x1xf32>
    %66 = vector.broadcast %65 : vector<2x16x1xf32> to vector<2x16x16xf32>
    %67 = arith.subf %63, %66 : vector<2x16x16xf32>
    %68 = math.exp %67 : vector<2x16x16xf32>
    %cst_24 = arith.constant dense<0.000000e+00> : vector<2x16xf32>
    %69 = vector.multi_reduction <add>, %68, %cst_24 [2] : vector<2x16x16xf32> to vector<2x16xf32>
    %70 = vector.shape_cast %69 : vector<2x16xf32> to vector<2x16x1xf32>
    %71 = vector.broadcast %70 : vector<2x16x1xf32> to vector<2x16x16xf32>
    %72 = arith.divf %68, %71 : vector<2x16x16xf32>
    %73 = vector.extract_strided_slice %29 {offsets = [0, 0, 16], sizes = [2, 16, 8], strides = [1, 1, 1]} : vector<2x16x32xf32> to vector<2x16x8xf32>
    "tpu.trace_start"() <{level = 10 : i32, message = "bqk,bkd->bqd"}> : () -> ()
    %cst_25 = arith.constant dense<0.000000e+00> : vector<2x16x8xf32>
    %74 = tpu.matmul %72, %73, %cst_25 {dimension_numbers = #tpu.dot_dimension_numbers<[2], [1], [1], [2], [0, 0, 0, 1, 1, 2], [0], [0]>} : vector<2x16x16xf32>, vector<2x16x8xf32>, vector<2x16x8xf32> -> vector<2x16x8xf32>
    "tpu.trace_stop"() : () -> ()
    %75 = vector.extract_strided_slice %27 {offsets = [0, 0, 24], sizes = [2, 16, 8], strides = [1, 1, 1]} : vector<2x16x32xf32> to vector<2x16x8xf32>
    %76 = vector.extract_strided_slice %32 {offsets = [0, 24, 0], sizes = [2, 8, 16], strides = [1, 1, 1]} : vector<2x32x16xf32> to vector<2x8x16xf32>
    "tpu.trace_start"() <{level = 10 : i32, message = "bqd,bdk->bqk"}> : () -> ()
    %cst_26 = arith.constant dense<0.000000e+00> : vector<2x16x16xf32>
    %77 = tpu.matmul %75, %76, %cst_26 {dimension_numbers = #tpu.dot_dimension_numbers<[2], [1], [1], [2], [0, 0, 0, 1, 1, 2], [0], [0]>} : vector<2x16x8xf32>, vector<2x8x16xf32>, vector<2x16x16xf32> -> vector<2x16x16xf32>
    "tpu.trace_stop"() : () -> ()
    %cst_27 = arith.constant dense<0xFF800000> : vector<2x16xf32>
    %78 = vector.multi_reduction <maximumf>, %77, %cst_27 [2] : vector<2x16x16xf32> to vector<2x16xf32>
    %79 = vector.shape_cast %78 : vector<2x16xf32> to vector<2x16x1xf32>
    %80 = vector.broadcast %79 : vector<2x16x1xf32> to vector<2x16x16xf32>
    %81 = arith.subf %77, %80 : vector<2x16x16xf32>
    %82 = math.exp %81 : vector<2x16x16xf32>
    %cst_28 = arith.constant dense<0.000000e+00> : vector<2x16xf32>
    %83 = vector.multi_reduction <add>, %82, %cst_28 [2] : vector<2x16x16xf32> to vector<2x16xf32>
    %84 = vector.shape_cast %83 : vector<2x16xf32> to vector<2x16x1xf32>
    %85 = vector.broadcast %84 : vector<2x16x1xf32> to vector<2x16x16xf32>
    %86 = arith.divf %82, %85 : vector<2x16x16xf32>
    %87 = vector.extract_strided_slice %29 {offsets = [0, 0, 24], sizes = [2, 16, 8], strides = [1, 1, 1]} : vector<2x16x32xf32> to vector<2x16x8xf32>
    "tpu.trace_start"() <{level = 10 : i32, message = "bqk,bkd->bqd"}> : () -> ()
    %cst_29 = arith.constant dense<0.000000e+00> : vector<2x16x8xf32>
    %88 = tpu.matmul %86, %87, %cst_29 {dimension_numbers = #tpu.dot_dimension_numbers<[2], [1], [1], [2], [0, 0, 0, 1, 1, 2], [0], [0]>} : vector<2x16x16xf32>, vector<2x16x8xf32>, vector<2x16x8xf32> -> vector<2x16x8xf32>
    "tpu.trace_stop"() : () -> ()
    %89 = tpu.concatenate %46, %60, %74, %88 in 2 : vector<2x16x8xf32>, vector<2x16x8xf32>, vector<2x16x8xf32>, vector<2x16x8xf32> -> vector<2x16x32xf32>
    %90 = vector.shape_cast %89 : vector<2x16x32xf32> to vector<32x32xf32>
    %cst_30 = arith.constant dense<0.000000e+00> : vector<32x32xf32>
    %91 = tpu.matmul %90, %12, %cst_30 {dimension_numbers = #tpu.dot_dimension_numbers<[1], [0], [0], [1], [0, 0, 1, 1], [], []>} : vector<32x32xf32>, vector<32x32xf32>, vector<32x32xf32> -> vector<32x32xf32>
    %92 = vector.broadcast %17 : vector<1x32xf32> to vector<32x32xf32>
    %93 = arith.addf %91, %92 : vector<32x32xf32>
    %94 = arith.addf %4, %93 : vector<32x32xf32>
    %cst_31 = arith.constant dense<0.000000e+00> : vector<32xf32>
    %95 = vector.multi_reduction <add>, %94, %cst_31 [1] : vector<32x32xf32> to vector<32xf32>
    %96 = vector.shape_cast %95 : vector<32xf32> to vector<32x1xf32>
    %cst_32 = arith.constant 3.200000e+01 : f32
    %97 = vector.broadcast %cst_32 : f32 to vector<32x1xf32>
    %98 = arith.divf %96, %97 : vector<32x1xf32>
    %99 = vector.broadcast %98 : vector<32x1xf32> to vector<32x32xf32>
    %100 = arith.subf %94, %99 : vector<32x32xf32>
    %101 = vector.broadcast %98 : vector<32x1xf32> to vector<32x32xf32>
    %102 = arith.subf %94, %101 : vector<32x32xf32>
    %103 = arith.mulf %100, %102 : vector<32x32xf32>
    %cst_33 = arith.constant dense<0.000000e+00> : vector<32xf32>
    %104 = vector.multi_reduction <add>, %103, %cst_33 [1] : vector<32x32xf32> to vector<32xf32>
    %105 = vector.shape_cast %104 : vector<32xf32> to vector<32x1xf32>
    %cst_34 = arith.constant 3.200000e+01 : f32
    %106 = vector.broadcast %cst_34 : f32 to vector<32x1xf32>
    %107 = arith.divf %105, %106 : vector<32x1xf32>
    %108 = vector.broadcast %98 : vector<32x1xf32> to vector<32x32xf32>
    %109 = arith.subf %94, %108 : vector<32x32xf32>
    %cst_35 = arith.constant 9.99999974E-6 : f32
    %110 = vector.broadcast %cst_35 : f32 to vector<32x1xf32>
    %111 = arith.addf %107, %110 : vector<32x1xf32>
    %112 = math.rsqrt %111 : vector<32x1xf32>
    %113 = vector.broadcast %112 : vector<32x1xf32> to vector<32x32xf32>
    %114 = arith.mulf %109, %113 : vector<32x32xf32>
    %115 = vector.broadcast %19 : vector<1x32xf32> to vector<32x32xf32>
    %116 = arith.mulf %114, %115 : vector<32x32xf32>
    %117 = vector.broadcast %20 : vector<1x32xf32> to vector<32x32xf32>
    %118 = arith.addf %116, %117 : vector<32x32xf32>
    %cst_36 = arith.constant dense<0.000000e+00> : vector<32x64xf32>
    %119 = tpu.matmul %118, %13, %cst_36 {dimension_numbers = #tpu.dot_dimension_numbers<[1], [0], [0], [1], [0, 0, 1, 1], [], []>} : vector<32x32xf32>, vector<32x64xf32>, vector<32x64xf32> -> vector<32x64xf32>
    %120 = vector.broadcast %16 : vector<1x64xf32> to vector<32x64xf32>
    %121 = arith.addf %119, %120 : vector<32x64xf32>
    %cst_37 = arith.constant 0.000000e+00 : f32
    %122 = vector.broadcast %cst_37 : f32 to vector<32x64xf32>
    %123 = arith.maximumf %121, %122 : vector<32x64xf32>
    %cst_38 = arith.constant dense<0.000000e+00> : vector<32x32xf32>
    %124 = tpu.matmul %123, %14, %cst_38 {dimension_numbers = #tpu.dot_dimension_numbers<[1], [0], [0], [1], [0, 0, 1, 1], [], []>} : vector<32x64xf32>, vector<64x32xf32>, vector<32x32xf32> -> vector<32x32xf32>
    %125 = vector.broadcast %18 : vector<1x32xf32> to vector<32x32xf32>
    %126 = arith.addf %124, %125 : vector<32x32xf32>
    %127 = arith.addf %118, %126 : vector<32x32xf32>
    %cst_39 = arith.constant dense<0.000000e+00> : vector<32xf32>
    %128 = vector.multi_reduction <add>, %127, %cst_39 [1] : vector<32x32xf32> to vector<32xf32>
    %129 = vector.shape_cast %128 : vector<32xf32> to vector<32x1xf32>
    %cst_40 = arith.constant 3.200000e+01 : f32
    %130 = vector.broadcast %cst_40 : f32 to vector<32x1xf32>
    %131 = arith.divf %129, %130 : vector<32x1xf32>
    %132 = vector.broadcast %131 : vector<32x1xf32> to vector<32x32xf32>
    %133 = arith.subf %127, %132 : vector<32x32xf32>
    %134 = vector.broadcast %131 : vector<32x1xf32> to vector<32x32xf32>
    %135 = arith.subf %127, %134 : vector<32x32xf32>
    %136 = arith.mulf %133, %135 : vector<32x32xf32>
    %cst_41 = arith.constant dense<0.000000e+00> : vector<32xf32>
    %137 = vector.multi_reduction <add>, %136, %cst_41 [1] : vector<32x32xf32> to vector<32xf32>
    %138 = vector.shape_cast %137 : vector<32xf32> to vector<32x1xf32>
    %cst_42 = arith.constant 3.200000e+01 : f32
    %139 = vector.broadcast %cst_42 : f32 to vector<32x1xf32>
    %140 = arith.divf %138, %139 : vector<32x1xf32>
    %141 = vector.broadcast %131 : vector<32x1xf32> to vector<32x32xf32>
    %142 = arith.subf %127, %141 : vector<32x32xf32>
    %cst_43 = arith.constant 9.99999974E-6 : f32
    %143 = vector.broadcast %cst_43 : f32 to vector<32x1xf32>
    %144 = arith.addf %140, %143 : vector<32x1xf32>
    %145 = math.rsqrt %144 : vector<32x1xf32>
    %146 = vector.broadcast %145 : vector<32x1xf32> to vector<32x32xf32>
    %147 = arith.mulf %142, %146 : vector<32x32xf32>
    %148 = vector.broadcast %21 : vector<1x32xf32> to vector<32x32xf32>
    %149 = arith.mulf %147, %148 : vector<32x32xf32>
    %150 = vector.broadcast %22 : vector<1x32xf32> to vector<32x32xf32>
    %151 = arith.addf %149, %150 : vector<32x32xf32>
    %c1 = arith.constant 1 : index
    %c0_44 = arith.constant 0 : index
    %c0_45 = arith.constant 0 : index
    %152 = vector.load %arg2[%c1, %c0_44, %c0_45] : memref<2x32x128xf32, #tpu.memory_space<vmem>>, vector<1x32x128xf32>
    %153 = vector.shape_cast %152 : vector<1x32x128xf32> to vector<32x128xf32>
    %c1_46 = arith.constant 1 : index
    %c0_47 = arith.constant 0 : index
    %c0_48 = arith.constant 0 : index
    %154 = vector.load %arg3[%c1_46, %c0_47, %c0_48] : memref<2x96x64xf32, #tpu.memory_space<vmem>>, vector<1x96x64xf32>
    %155 = vector.shape_cast %154 : vector<1x96x64xf32> to vector<96x64xf32>
    %c1_49 = arith.constant 1 : index
    %c0_50 = arith.constant 0 : index
    %c0_51 = arith.constant 0 : index
    %156 = vector.load %arg4[%c1_49, %c0_50, %c0_51] : memref<2x8x96xf32, #tpu.memory_space<vmem>>, vector<1x8x96xf32>
    %157 = vector.shape_cast %156 : vector<1x8x96xf32> to vector<8x96xf32>
    %158 = vector.extract_strided_slice %153 {offsets = [0, 0], sizes = [32, 96], strides = [1, 1]} : vector<32x128xf32> to vector<32x96xf32>
    %159 = vector.extract_strided_slice %153 {offsets = [0, 96], sizes = [32, 32], strides = [1, 1]} : vector<32x128xf32> to vector<32x32xf32>
    %160 = vector.extract_strided_slice %155 {offsets = [0, 0], sizes = [32, 64], strides = [1, 1]} : vector<96x64xf32> to vector<32x64xf32>
    %161 = vector.extract_strided_slice %155 {offsets = [32, 0], sizes = [64, 32], strides = [1, 1]} : vector<96x64xf32> to vector<64x32xf32>
    %162 = vector.extract_strided_slice %157 {offsets = [0, 0], sizes = [1, 96], strides = [1, 1]} : vector<8x96xf32> to vector<1x96xf32>
    %163 = vector.extract_strided_slice %157 {offsets = [1, 0], sizes = [1, 64], strides = [1, 1]} : vector<8x96xf32> to vector<1x64xf32>
    %164 = vector.extract_strided_slice %157 {offsets = [2, 0], sizes = [1, 32], strides = [1, 1]} : vector<8x96xf32> to vector<1x32xf32>
    %165 = vector.extract_strided_slice %157 {offsets = [3, 0], sizes = [1, 32], strides = [1, 1]} : vector<8x96xf32> to vector<1x32xf32>
    %166 = vector.extract_strided_slice %157 {offsets = [4, 0], sizes = [1, 32], strides = [1, 1]} : vector<8x96xf32> to vector<1x32xf32>
    %167 = vector.extract_strided_slice %157 {offsets = [5, 0], sizes = [1, 32], strides = [1, 1]} : vector<8x96xf32> to vector<1x32xf32>
    %168 = vector.extract_strided_slice %157 {offsets = [6, 0], sizes = [1, 32], strides = [1, 1]} : vector<8x96xf32> to vector<1x32xf32>
    %169 = vector.extract_strided_slice %157 {offsets = [7, 0], sizes = [1, 32], strides = [1, 1]} : vector<8x96xf32> to vector<1x32xf32>
    %cst_52 = arith.constant dense<0.000000e+00> : vector<32x96xf32>
    %170 = tpu.matmul %151, %158, %cst_52 {dimension_numbers = #tpu.dot_dimension_numbers<[1], [0], [0], [1], [0, 0, 1, 1], [], []>} : vector<32x32xf32>, vector<32x96xf32>, vector<32x96xf32> -> vector<32x96xf32>
    %171 = vector.broadcast %162 : vector<1x96xf32> to vector<32x96xf32>
    %172 = arith.addf %170, %171 : vector<32x96xf32>
    %173 = vector.extract_strided_slice %172 {offsets = [0, 0], sizes = [32, 32], strides = [1, 1]} : vector<32x96xf32> to vector<32x32xf32>
    %174 = vector.shape_cast %173 : vector<32x32xf32> to vector<2x16x32xf32>
    %175 = vector.extract_strided_slice %172 {offsets = [0, 64], sizes = [32, 32], strides = [1, 1]} : vector<32x96xf32> to vector<32x32xf32>
    %176 = vector.shape_cast %175 : vector<32x32xf32> to vector<2x16x32xf32>
    %177 = vector.extract_strided_slice %172 {offsets = [0, 32], sizes = [32, 32], strides = [1, 1]} : vector<32x96xf32> to vector<32x32xf32>
    %178 = vector.shape_cast %177 : vector<32x32xf32> to vector<2x16x32xf32>
    %179 = tpu.transpose %178, [0, 2, 1] : vector<2x16x32xf32> -> vector<2x32x16xf32>
    %180 = vector.extract_strided_slice %174 {offsets = [0, 0, 0], sizes = [2, 16, 8], strides = [1, 1, 1]} : vector<2x16x32xf32> to vector<2x16x8xf32>
    %181 = vector.extract_strided_slice %179 {offsets = [0, 0, 0], sizes = [2, 8, 16], strides = [1, 1, 1]} : vector<2x32x16xf32> to vector<2x8x16xf32>
    "tpu.trace_start"() <{level = 10 : i32, message = "bqd,bdk->bqk"}> : () -> ()
    %cst_53 = arith.constant dense<0.000000e+00> : vector<2x16x16xf32>
    %182 = tpu.matmul %180, %181, %cst_53 {dimension_numbers = #tpu.dot_dimension_numbers<[2], [1], [1], [2], [0, 0, 0, 1, 1, 2], [0], [0]>} : vector<2x16x8xf32>, vector<2x8x16xf32>, vector<2x16x16xf32> -> vector<2x16x16xf32>
    "tpu.trace_stop"() : () -> ()
    %cst_54 = arith.constant dense<0xFF800000> : vector<2x16xf32>
    %183 = vector.multi_reduction <maximumf>, %182, %cst_54 [2] : vector<2x16x16xf32> to vector<2x16xf32>
    %184 = vector.shape_cast %183 : vector<2x16xf32> to vector<2x16x1xf32>
    %185 = vector.broadcast %184 : vector<2x16x1xf32> to vector<2x16x16xf32>
    %186 = arith.subf %182, %185 : vector<2x16x16xf32>
    %187 = math.exp %186 : vector<2x16x16xf32>
    %cst_55 = arith.constant dense<0.000000e+00> : vector<2x16xf32>
    %188 = vector.multi_reduction <add>, %187, %cst_55 [2] : vector<2x16x16xf32> to vector<2x16xf32>
    %189 = vector.shape_cast %188 : vector<2x16xf32> to vector<2x16x1xf32>
    %190 = vector.broadcast %189 : vector<2x16x1xf32> to vector<2x16x16xf32>
    %191 = arith.divf %187, %190 : vector<2x16x16xf32>
    %192 = vector.extract_strided_slice %176 {offsets = [0, 0, 0], sizes = [2, 16, 8], strides = [1, 1, 1]} : vector<2x16x32xf32> to vector<2x16x8xf32>
    "tpu.trace_start"() <{level = 10 : i32, message = "bqk,bkd->bqd"}> : () -> ()
    %cst_56 = arith.constant dense<0.000000e+00> : vector<2x16x8xf32>
    %193 = tpu.matmul %191, %192, %cst_56 {dimension_numbers = #tpu.dot_dimension_numbers<[2], [1], [1], [2], [0, 0, 0, 1, 1, 2], [0], [0]>} : vector<2x16x16xf32>, vector<2x16x8xf32>, vector<2x16x8xf32> -> vector<2x16x8xf32>
    "tpu.trace_stop"() : () -> ()
    %194 = vector.extract_strided_slice %174 {offsets = [0, 0, 8], sizes = [2, 16, 8], strides = [1, 1, 1]} : vector<2x16x32xf32> to vector<2x16x8xf32>
    %195 = vector.extract_strided_slice %179 {offsets = [0, 8, 0], sizes = [2, 8, 16], strides = [1, 1, 1]} : vector<2x32x16xf32> to vector<2x8x16xf32>
    "tpu.trace_start"() <{level = 10 : i32, message = "bqd,bdk->bqk"}> : () -> ()
    %cst_57 = arith.constant dense<0.000000e+00> : vector<2x16x16xf32>
    %196 = tpu.matmul %194, %195, %cst_57 {dimension_numbers = #tpu.dot_dimension_numbers<[2], [1], [1], [2], [0, 0, 0, 1, 1, 2], [0], [0]>} : vector<2x16x8xf32>, vector<2x8x16xf32>, vector<2x16x16xf32> -> vector<2x16x16xf32>
    "tpu.trace_stop"() : () -> ()
    %cst_58 = arith.constant dense<0xFF800000> : vector<2x16xf32>
    %197 = vector.multi_reduction <maximumf>, %196, %cst_58 [2] : vector<2x16x16xf32> to vector<2x16xf32>
    %198 = vector.shape_cast %197 : vector<2x16xf32> to vector<2x16x1xf32>
    %199 = vector.broadcast %198 : vector<2x16x1xf32> to vector<2x16x16xf32>
    %200 = arith.subf %196, %199 : vector<2x16x16xf32>
    %201 = math.exp %200 : vector<2x16x16xf32>
    %cst_59 = arith.constant dense<0.000000e+00> : vector<2x16xf32>
    %202 = vector.multi_reduction <add>, %201, %cst_59 [2] : vector<2x16x16xf32> to vector<2x16xf32>
    %203 = vector.shape_cast %202 : vector<2x16xf32> to vector<2x16x1xf32>
    %204 = vector.broadcast %203 : vector<2x16x1xf32> to vector<2x16x16xf32>
    %205 = arith.divf %201, %204 : vector<2x16x16xf32>
    %206 = vector.extract_strided_slice %176 {offsets = [0, 0, 8], sizes = [2, 16, 8], strides = [1, 1, 1]} : vector<2x16x32xf32> to vector<2x16x8xf32>
    "tpu.trace_start"() <{level = 10 : i32, message = "bqk,bkd->bqd"}> : () -> ()
    %cst_60 = arith.constant dense<0.000000e+00> : vector<2x16x8xf32>
    %207 = tpu.matmul %205, %206, %cst_60 {dimension_numbers = #tpu.dot_dimension_numbers<[2], [1], [1], [2], [0, 0, 0, 1, 1, 2], [0], [0]>} : vector<2x16x16xf32>, vector<2x16x8xf32>, vector<2x16x8xf32> -> vector<2x16x8xf32>
    "tpu.trace_stop"() : () -> ()
    %208 = vector.extract_strided_slice %174 {offsets = [0, 0, 16], sizes = [2, 16, 8], strides = [1, 1, 1]} : vector<2x16x32xf32> to vector<2x16x8xf32>
    %209 = vector.extract_strided_slice %179 {offsets = [0, 16, 0], sizes = [2, 8, 16], strides = [1, 1, 1]} : vector<2x32x16xf32> to vector<2x8x16xf32>
    "tpu.trace_start"() <{level = 10 : i32, message = "bqd,bdk->bqk"}> : () -> ()
    %cst_61 = arith.constant dense<0.000000e+00> : vector<2x16x16xf32>
    %210 = tpu.matmul %208, %209, %cst_61 {dimension_numbers = #tpu.dot_dimension_numbers<[2], [1], [1], [2], [0, 0, 0, 1, 1, 2], [0], [0]>} : vector<2x16x8xf32>, vector<2x8x16xf32>, vector<2x16x16xf32> -> vector<2x16x16xf32>
    "tpu.trace_stop"() : () -> ()
    %cst_62 = arith.constant dense<0xFF800000> : vector<2x16xf32>
    %211 = vector.multi_reduction <maximumf>, %210, %cst_62 [2] : vector<2x16x16xf32> to vector<2x16xf32>
    %212 = vector.shape_cast %211 : vector<2x16xf32> to vector<2x16x1xf32>
    %213 = vector.broadcast %212 : vector<2x16x1xf32> to vector<2x16x16xf32>
    %214 = arith.subf %210, %213 : vector<2x16x16xf32>
    %215 = math.exp %214 : vector<2x16x16xf32>
    %cst_63 = arith.constant dense<0.000000e+00> : vector<2x16xf32>
    %216 = vector.multi_reduction <add>, %215, %cst_63 [2] : vector<2x16x16xf32> to vector<2x16xf32>
    %217 = vector.shape_cast %216 : vector<2x16xf32> to vector<2x16x1xf32>
    %218 = vector.broadcast %217 : vector<2x16x1xf32> to vector<2x16x16xf32>
    %219 = arith.divf %215, %218 : vector<2x16x16xf32>
    %220 = vector.extract_strided_slice %176 {offsets = [0, 0, 16], sizes = [2, 16, 8], strides = [1, 1, 1]} : vector<2x16x32xf32> to vector<2x16x8xf32>
    "tpu.trace_start"() <{level = 10 : i32, message = "bqk,bkd->bqd"}> : () -> ()
    %cst_64 = arith.constant dense<0.000000e+00> : vector<2x16x8xf32>
    %221 = tpu.matmul %219, %220, %cst_64 {dimension_numbers = #tpu.dot_dimension_numbers<[2], [1], [1], [2], [0, 0, 0, 1, 1, 2], [0], [0]>} : vector<2x16x16xf32>, vector<2x16x8xf32>, vector<2x16x8xf32> -> vector<2x16x8xf32>
    "tpu.trace_stop"() : () -> ()
    %222 = vector.extract_strided_slice %174 {offsets = [0, 0, 24], sizes = [2, 16, 8], strides = [1, 1, 1]} : vector<2x16x32xf32> to vector<2x16x8xf32>
    %223 = vector.extract_strided_slice %179 {offsets = [0, 24, 0], sizes = [2, 8, 16], strides = [1, 1, 1]} : vector<2x32x16xf32> to vector<2x8x16xf32>
    "tpu.trace_start"() <{level = 10 : i32, message = "bqd,bdk->bqk"}> : () -> ()
    %cst_65 = arith.constant dense<0.000000e+00> : vector<2x16x16xf32>
    %224 = tpu.matmul %222, %223, %cst_65 {dimension_numbers = #tpu.dot_dimension_numbers<[2], [1], [1], [2], [0, 0, 0, 1, 1, 2], [0], [0]>} : vector<2x16x8xf32>, vector<2x8x16xf32>, vector<2x16x16xf32> -> vector<2x16x16xf32>
    "tpu.trace_stop"() : () -> ()
    %cst_66 = arith.constant dense<0xFF800000> : vector<2x16xf32>
    %225 = vector.multi_reduction <maximumf>, %224, %cst_66 [2] : vector<2x16x16xf32> to vector<2x16xf32>
    %226 = vector.shape_cast %225 : vector<2x16xf32> to vector<2x16x1xf32>
    %227 = vector.broadcast %226 : vector<2x16x1xf32> to vector<2x16x16xf32>
    %228 = arith.subf %224, %227 : vector<2x16x16xf32>
    %229 = math.exp %228 : vector<2x16x16xf32>
    %cst_67 = arith.constant dense<0.000000e+00> : vector<2x16xf32>
    %230 = vector.multi_reduction <add>, %229, %cst_67 [2] : vector<2x16x16xf32> to vector<2x16xf32>
    %231 = vector.shape_cast %230 : vector<2x16xf32> to vector<2x16x1xf32>
    %232 = vector.broadcast %231 : vector<2x16x1xf32> to vector<2x16x16xf32>
    %233 = arith.divf %229, %232 : vector<2x16x16xf32>
    %234 = vector.extract_strided_slice %176 {offsets = [0, 0, 24], sizes = [2, 16, 8], strides = [1, 1, 1]} : vector<2x16x32xf32> to vector<2x16x8xf32>
    "tpu.trace_start"() <{level = 10 : i32, message = "bqk,bkd->bqd"}> : () -> ()
    %cst_68 = arith.constant dense<0.000000e+00> : vector<2x16x8xf32>
    %235 = tpu.matmul %233, %234, %cst_68 {dimension_numbers = #tpu.dot_dimension_numbers<[2], [1], [1], [2], [0, 0, 0, 1, 1, 2], [0], [0]>} : vector<2x16x16xf32>, vector<2x16x8xf32>, vector<2x16x8xf32> -> vector<2x16x8xf32>
    "tpu.trace_stop"() : () -> ()
    %236 = tpu.concatenate %193, %207, %221, %235 in 2 : vector<2x16x8xf32>, vector<2x16x8xf32>, vector<2x16x8xf32>, vector<2x16x8xf32> -> vector<2x16x32xf32>
    %237 = vector.shape_cast %236 : vector<2x16x32xf32> to vector<32x32xf32>
    %cst_69 = arith.constant dense<0.000000e+00> : vector<32x32xf32>
    %238 = tpu.matmul %237, %159, %cst_69 {dimension_numbers = #tpu.dot_dimension_numbers<[1], [0], [0], [1], [0, 0, 1, 1], [], []>} : vector<32x32xf32>, vector<32x32xf32>, vector<32x32xf32> -> vector<32x32xf32>
    %239 = vector.broadcast %164 : vector<1x32xf32> to vector<32x32xf32>
    %240 = arith.addf %238, %239 : vector<32x32xf32>
    %241 = arith.addf %151, %240 : vector<32x32xf32>
    %cst_70 = arith.constant dense<0.000000e+00> : vector<32xf32>
    %242 = vector.multi_reduction <add>, %241, %cst_70 [1] : vector<32x32xf32> to vector<32xf32>
    %243 = vector.shape_cast %242 : vector<32xf32> to vector<32x1xf32>
    %cst_71 = arith.constant 3.200000e+01 : f32
    %244 = vector.broadcast %cst_71 : f32 to vector<32x1xf32>
    %245 = arith.divf %243, %244 : vector<32x1xf32>
    %246 = vector.broadcast %245 : vector<32x1xf32> to vector<32x32xf32>
    %247 = arith.subf %241, %246 : vector<32x32xf32>
    %248 = vector.broadcast %245 : vector<32x1xf32> to vector<32x32xf32>
    %249 = arith.subf %241, %248 : vector<32x32xf32>
    %250 = arith.mulf %247, %249 : vector<32x32xf32>
    %cst_72 = arith.constant dense<0.000000e+00> : vector<32xf32>
    %251 = vector.multi_reduction <add>, %250, %cst_72 [1] : vector<32x32xf32> to vector<32xf32>
    %252 = vector.shape_cast %251 : vector<32xf32> to vector<32x1xf32>
    %cst_73 = arith.constant 3.200000e+01 : f32
    %253 = vector.broadcast %cst_73 : f32 to vector<32x1xf32>
    %254 = arith.divf %252, %253 : vector<32x1xf32>
    %255 = vector.broadcast %245 : vector<32x1xf32> to vector<32x32xf32>
    %256 = arith.subf %241, %255 : vector<32x32xf32>
    %cst_74 = arith.constant 9.99999974E-6 : f32
    %257 = vector.broadcast %cst_74 : f32 to vector<32x1xf32>
    %258 = arith.addf %254, %257 : vector<32x1xf32>
    %259 = math.rsqrt %258 : vector<32x1xf32>
    %260 = vector.broadcast %259 : vector<32x1xf32> to vector<32x32xf32>
    %261 = arith.mulf %256, %260 : vector<32x32xf32>
    %262 = vector.broadcast %166 : vector<1x32xf32> to vector<32x32xf32>
    %263 = arith.mulf %261, %262 : vector<32x32xf32>
    %264 = vector.broadcast %167 : vector<1x32xf32> to vector<32x32xf32>
    %265 = arith.addf %263, %264 : vector<32x32xf32>
    %cst_75 = arith.constant dense<0.000000e+00> : vector<32x64xf32>
    %266 = tpu.matmul %265, %160, %cst_75 {dimension_numbers = #tpu.dot_dimension_numbers<[1], [0], [0], [1], [0, 0, 1, 1], [], []>} : vector<32x32xf32>, vector<32x64xf32>, vector<32x64xf32> -> vector<32x64xf32>
    %267 = vector.broadcast %163 : vector<1x64xf32> to vector<32x64xf32>
    %268 = arith.addf %266, %267 : vector<32x64xf32>
    %cst_76 = arith.constant 0.000000e+00 : f32
    %269 = vector.broadcast %cst_76 : f32 to vector<32x64xf32>
    %270 = arith.maximumf %268, %269 : vector<32x64xf32>
    %cst_77 = arith.constant dense<0.000000e+00> : vector<32x32xf32>
    %271 = tpu.matmul %270, %161, %cst_77 {dimension_numbers = #tpu.dot_dimension_numbers<[1], [0], [0], [1], [0, 0, 1, 1], [], []>} : vector<32x64xf32>, vector<64x32xf32>, vector<32x32xf32> -> vector<32x32xf32>
    %272 = vector.broadcast %165 : vector<1x32xf32> to vector<32x32xf32>
    %273 = arith.addf %271, %272 : vector<32x32xf32>
    %274 = arith.addf %265, %273 : vector<32x32xf32>
    %cst_78 = arith.constant dense<0.000000e+00> : vector<32xf32>
    %275 = vector.multi_reduction <add>, %274, %cst_78 [1] : vector<32x32xf32> to vector<32xf32>
    %276 = vector.shape_cast %275 : vector<32xf32> to vector<32x1xf32>
    %cst_79 = arith.constant 3.200000e+01 : f32
    %277 = vector.broadcast %cst_79 : f32 to vector<32x1xf32>
    %278 = arith.divf %276, %277 : vector<32x1xf32>
    %279 = vector.broadcast %278 : vector<32x1xf32> to vector<32x32xf32>
    %280 = arith.subf %274, %279 : vector<32x32xf32>
    %281 = vector.broadcast %278 : vector<32x1xf32> to vector<32x32xf32>
    %282 = arith.subf %274, %281 : vector<32x32xf32>
    %283 = arith.mulf %280, %282 : vector<32x32xf32>
    %cst_80 = arith.constant dense<0.000000e+00> : vector<32xf32>
    %284 = vector.multi_reduction <add>, %283, %cst_80 [1] : vector<32x32xf32> to vector<32xf32>
    %285 = vector.shape_cast %284 : vector<32xf32> to vector<32x1xf32>
    %cst_81 = arith.constant 3.200000e+01 : f32
    %286 = vector.broadcast %cst_81 : f32 to vector<32x1xf32>
    %287 = arith.divf %285, %286 : vector<32x1xf32>
    %288 = vector.broadcast %278 : vector<32x1xf32> to vector<32x32xf32>
    %289 = arith.subf %274, %288 : vector<32x32xf32>
    %cst_82 = arith.constant 9.99999974E-6 : f32
    %290 = vector.broadcast %cst_82 : f32 to vector<32x1xf32>
    %291 = arith.addf %287, %290 : vector<32x1xf32>
    %292 = math.rsqrt %291 : vector<32x1xf32>
    %293 = vector.broadcast %292 : vector<32x1xf32> to vector<32x32xf32>
    %294 = arith.mulf %289, %293 : vector<32x32xf32>
    %295 = vector.broadcast %168 : vector<1x32xf32> to vector<32x32xf32>
    %296 = arith.mulf %294, %295 : vector<32x32xf32>
    %297 = vector.broadcast %169 : vector<1x32xf32> to vector<32x32xf32>
    %298 = arith.addf %296, %297 : vector<32x32xf32>
    %299 = vector.shape_cast %298 : vector<32x32xf32> to vector<2x16x32xf32>
    %c0_83 = arith.constant 0 : index
    %c0_84 = arith.constant 0 : index
    %c0_85 = arith.constant 0 : index
    %300 = vector.load %arg5[%c0_83, %c0_84, %c0_85] : memref<2x16x32xf32, #tpu.memory_space<vmem>>, vector<2x16x32xf32>
    tpu.vector_store %arg5[%c0_83, %c0_84, %c0_85], %299 {strides = array<i32>} : memref<2x16x32xf32, #tpu.memory_space<vmem>>, vector<2x16x32xf32>,
    return
  }
}

</mosaic_0001>

<bundles_post_ra>
// kernel: bert_apply.1
= control target key start
LH: loop header
LB: loop body
LE: loop exit
PB: predicated region body
PF: predicated region fallthrough
CT: control target
= control target key end

     0   :  { %vm52_vm0 = vcmask 261120   ;;  %s6343_s0 = inlined_call_operand.vmem [shape: f32[2,16,32], index: 0, kind: input, shape index: {}]   ;;  %s6344_s1 = inlined_call_operand.vmem [shape: f32[1,16,32], index: 1, kind: input, shape index: {}]   ;;  %s6345_s2 = inlined_call_operand.vmem [shape: f32[2,32,128], index: 2, kind: input, shape index: {}]   ;;  %s6346_s3 = inlined_call_operand.vmem [shape: f32[2,96,64], index: 3, kind: input, shape index: {}]   ;;  %s6347_s4 = inlined_call_operand.vmem [shape: f32[2,8,96], index: 4, kind: input, shape index: {}]   ;;  %s6348_s5 = inlined_call_operand.hbm [shape: f32[2,16,32], index: 5, kind: output, shape index: {}]  }
   0x1   :  { %v5490_v0 = vld [vmem:[%s6345_s2 + $0x18] sm:$0xff]  ;;  %v5495_v1 = vld [vmem:[%s6345_s2 + $0x10] sm:$0xff]  ;;  %v5501_v2 = vld [vmem:[%s6345_s2 + $0x8] sm:$0xff] }
   0x2   :  { %4887 = vmatprep.subr.mxu1 %v5490_v0  ;;  %v21_v3 = vld [vmem:[%s6343_s0] sm:$0xff]  ;;  %v22_v5 = vld [vmem:[%s6343_s0 + $0x8] sm:$0xff]  ;;  %v23_v7 = vld [vmem:[%s6343_s0 + $0x10] sm:$0xff] }
   0x3   :  { %4888 = vmatpush3.msra.mxu1 %v5490_v0  ;;  %v25_v4 = vld [vmem:[%s6344_s1] sm:$0xff]  ;;  %v26_v6 = vld [vmem:[%s6344_s1 + $0x8] sm:$0xff] }
   0x4   :  { %4889 = vmatprep.subr.mxu1 %v5495_v1  ;;  %v5520_v8 = vadd.f32 %v25_v4, %v21_v3 }
   0x5   :  { %10 = vsyncpa [#allocation3], 0  ;;  %4890 = vmatpush3.msra.mxu1 %v5495_v1  ;;  %v5526_v9 = vld [vmem:[%s6345_s2] sm:$0xff]  ;;  %v5531_v10 = vadd.f32 %v26_v6, %v22_v5  ;;  %v5534_v11 = vadd.f32 %v25_v4, %v23_v7  ;;  %v24_v12 = vld [vmem:[%s6343_s0 + $0x18] sm:$0xff]  ;;  %v48_v14 = vlaneseq  ;;  %vm156_vm1 = vcmask 64512   ;;  %s5440_s13 = smov 96  }
   0x6   :  { %4891 = vmatprep.subr.mxu1 %v5501_v2  ;;  %4895 = vmatprep.mubr.msk.f32.mxu1 %vm52_vm0, %v5520_v8  ;;  %v5543_v13 = vadd.f32 %v26_v6, %v24_v12  ;;  %v5555_v17 = vld [vmem:[%s6347_s4] sm:$0xff]  ;;  %vm329_vm2 = vcmask 130048   ;;  %s5441_s14 = smov 64   ;;  %s5442_s15 = smov 88   ;;  %vm1804_vm3 = vcmask 195584   ;;  %vm2108_vm4 = vcmask 523264  }
   0x7   :  { %4892 = vmatpush3.msra.mxu1 %v5501_v2  ;;  %v5549_v15 = vshrl.u32 %v48_v14, 7  ;;  %s5443_s16 = smov 120   ;;  %s5444_s17 = smov 56  }
   0x8   :  { %4893 = vmatprep.subr.mxu1 %v5526_v9  ;;  %s5445_s18 = smov 80   ;;  %s5446_s19 = smov 112  }
   0x9   :  { %4894 = vmatpush3.msra.mxu1 %v5526_v9  ;;  %v50_v16 = vsub.s32 0, %v5549_v15  ;;  %s5447_s20 = smov 48   ;;  %s5448_s21 = smov 72  }
   0xa   :  { %4896 = vmatmul.mubr.msk.f32.vlgmr.msra.gmra.mxu1 %vm52_vm0, %v5531_v10  ;;  %s5449_s22 = smov 104   ;;  %s5450_s23 = smov 40  }
   0xb   :  { %4898 = vmatprep.mubr.msk.f32.mxu1 %vm52_vm0, %v5534_v11  ;;  %v51_v18 = vrot.slane %v5555_v17, %v50_v16  ;;  %s5451_s24 = smov 32   ;;  %s5452_s25 = smov 8  }
   0xc   :  { %s5453_s26 = smov 16   ;;  %s5454_s27 = smov 24  }
   0xe   :  { %4899 = vmatmul.mubr.msk.f32.gmra.mxu1 %vm52_vm0, %v5543_v13 }
  0xca   :  { %v4897_v19 = vpop.f32.mrf.mxu1 }
  0xcb   :  { %v5560_v20 = vadd.f32 %v4897_v19, %v51_v18 }
  0xcc   :  { %v131_v21 = vpop.f32.mrf.mxu1 }
  0xcd   :  { %v5562_v22 = vadd.f32 %v131_v21, %v51_v18  ;;  %154 = vrot.lane.b32.xlu0 %v5560_v20, %s5440_s13 }
  0xce   :  { %v4900_v23 = vpop.f32.mrf.mxu1 }
  0xcf   :  { %v5566_v24 = vadd.f32 %v4900_v23, %v51_v18  ;;  %4905 = vmatprep.mubr.msk.f32.mxu1 %vm156_vm1, %v5562_v22 }
  0xd0   :  { %v141_v25 = vpop.f32.mrf.mxu1 }
  0xd1   :  { %244 = vrot.lane.b32.xlu1 %v5566_v24, %s5440_s13  ;;  %152 = vrot.lane.b32.xlu0 %v5562_v22, %s5440_s13  ;;  %v5574_v26 = vadd.f32 %v141_v25, %v51_v18 }
  0xd3   :  { %4912 = vmatprep.mubr.msk.f32.mxu0 %vm156_vm1, %v5574_v26 }
  0xd5   :  { %242 = vrot.lane.b32.xlu1 %v5574_v26, %s5440_s13 }
 0x13f   :  { %v155_v27 = vpop.permute.xlu0 %154 }
 0x140   :  { %4901 = vmatprep.subr.msk.mxu1 %vm156_vm1, %v155_v27 }
 0x141   :  { %4902 = vmatpush3.xpose.msk.msra.mxu1 %vm156_vm1, %v155_v27 }
 0x143   :  { %v245_v28 = vpop.permute.xlu1 %244  ;;  %v153_v29 = vpop.permute.xlu0 %152 }
 0x144   :  { %4903 = vmatprep.subr.msk.mxu1 %vm156_vm1, %v153_v29  ;;  %4908 = vmatprep.subr.msk.mxu0 %vm156_vm1, %v245_v28 }
 0x145   :  { %4904 = vmatpush3.xpose.msk.msra.mxu1 %vm156_vm1, %v153_v29  ;;  %4909 = vmatpush3.xpose.msk.msra.mxu0 %vm156_vm1, %v245_v28 }
 0x147   :  { %v243_v30 = vpop.permute.xlu1 %242 }
 0x148   :  { %4906 = vmatmul.mubr.msk.f32.vlgmr.msra.gmra.mxu1 %vm156_vm1, %v5560_v20  ;;  %4910 = vmatprep.subr.msk.mxu0 %vm156_vm1, %v243_v30 }
 0x149   :  { %4911 = vmatpush3.xpose.msk.msra.mxu0 %vm156_vm1, %v243_v30 }
 0x14c   :  { %4913 = vmatmul.mubr.msk.f32.vlgmr.msra.gmra.mxu0 %vm156_vm1, %v5566_v24 }
 0x208   :  { %v4907_v31 = vpop.f32.mrf.mxu1 }
 0x209   :  { %v333_v32 = vsel %vm329_vm2, %v4907_v31, -inf }
 0x20a   :  { %334 = vmax.xlane.f32.xlu1 %v333_v32  ;;  %v231_v33 = vpop.f32.mrf.mxu1 }
 0x20b   :  { %v330_v34 = vsel %vm329_vm2, %v231_v33, -inf }
 0x20c   :  { %v4914_v35 = vpop.f32.mrf.mxu0  ;;  %331 = vmax.xlane.f32.xlu0 %v330_v34 }
 0x20d   :  { %v339_v38 = vsel %vm329_vm2, %v4914_v35, -inf }
 0x20e   :  { %v320_v36 = vpop.f32.mrf.mxu0 }
 0x20f   :  { %v336_v37 = vsel %vm329_vm2, %v320_v36, -inf }
 0x210   :  { %337 = vmax.xlane.f32.xlu0 %v336_v37 }
 0x214   :  { %340 = vmax.xlane.f32.xlu0 %v339_v38 }
 0x21b   :  { %376 = vrot.lane.b32.xlu1 %v5560_v20, %s5441_s14 }
 0x21f   :  { %463 = vrot.lane.b32.xlu1 %v5566_v24, %s5441_s14 }
 0x223   :  { %554 = vrot.lane.b32.xlu1 %v5560_v20, %s5442_s15 }
 0x227   :  { %552 = vrot.lane.b32.xlu1 %v5562_v22, %s5442_s15 }
 0x22a   :  { %374 = vrot.lane.b32.xlu0 %v5562_v22, %s5441_s14 }
 0x22b   :  { %548 = vrot.lane.b32.xlu1 %v5562_v22, %s5443_s16 }
 0x22e   :  { %461 = vrot.lane.b32.xlu0 %v5574_v26, %s5441_s14 }
 0x232   :  { %645 = vrot.lane.b32.xlu0 %v5566_v24, %s5442_s15 }
 0x293   :  { %v335_v39 = vpop.xlane.xlu1 %334 }
 0x294   :  { %v343_v40 = vsub.f32 %v4907_v31, %v335_v39 }
 0x295   :  { %v332_v41 = vpop.xlane.xlu0 %331 }
 0x296   :  { %v348_v42 = vmul.f32 1.442695, %v343_v40  ;;  %v342_v43 = vsub.f32 %v231_v33, %v332_v41 }
 0x297   :  { %v377_v44 = vpop.permute.xlu1 %376 }
 0x298   :  { %5256 = vpow2.f32 %v348_v42  ;;  %v346_v45 = vmul.f32 1.442695, %v342_v43  ;;  %4915 = vmatprep.subr.mxu1 %v377_v44 }
 0x299   :  { %4916 = vmatpush3.msra.mxu1 %v377_v44  ;;  %v338_v46 = vpop.xlane.xlu0 %337 }
 0x29a   :  { %5258 = vpow2.f32 %v346_v45  ;;  %v344_v61 = vsub.f32 %v320_v36, %v338_v46 }
 0x29b   :  { %v464_v47 = vpop.permute.xlu1 %463 }
 0x29c   :  { %v350_v62 = vmul.f32 1.442695, %v344_v61 }
 0x29d   :  { %v341_v48 = vpop.xlane.xlu0 %340 }
 0x29e   :  { %v345_v49 = vsub.f32 %v4914_v35, %v341_v48 }
 0x29f   :  { %v555_v50 = vpop.permute.xlu1 %554 }
 0x2a0   :  { %v352_v51 = vmul.f32 1.442695, %v345_v49  ;;  %4929 = vmatprep.subr.msk.mxu0 %vm156_vm1, %v555_v50 }
 0x2a1   :  { %4930 = vmatpush3.xpose.msk.msra.mxu0 %vm156_vm1, %v555_v50  ;;  %v375_v52 = vpop.permute.xlu0 %374 }
 0x2a2   :  { %5260 = vpow2.f32 %v352_v51  ;;  %4917 = vmatprep.subr.mxu1 %v375_v52 }
 0x2a3   :  { %v553_v53 = vpop.permute.xlu1 %552  ;;  %4918 = vmatpush3.msra.mxu1 %v375_v52  ;;  %5262 = vpow2.f32 %v350_v62 }
 0x2a4   :  { %4922 = vmatprep.subr.mxu1 %v464_v47  ;;  %4931 = vmatprep.subr.msk.mxu0 %vm156_vm1, %v553_v53 }
 0x2a5   :  { %v5257_v54 = vpop.eup %5256  ;;  %4932 = vmatpush3.xpose.msk.msra.mxu0 %vm156_vm1, %v553_v53  ;;  %v462_v4 = vpop.permute.xlu0 %461 }
 0x2a6   :  { %v357_v55 = vsel %vm329_vm2, %v5257_v54, 0.0 }
 0x2a7   :  { %v5259_v56 = vpop.eup %5258  ;;  %v549_v57 = vpop.permute.xlu1 %548  ;;  %358 = vadd.xlane.f32.xlu0 %v357_v55 }
 0x2a8   :  { %4933 = vmatprep.mubr.msk.f32.mxu0 %vm156_vm1, %v549_v57  ;;  %v354_v58 = vsel %vm329_vm2, %v5259_v56, 0.0 }
 0x2a9   :  { %355 = vadd.xlane.f32.xlu1 %v354_v58  ;;  %v646_v5 = vpop.permute.xlu0 %645 }
 0x2af   :  { %v5261_v59 = vpop.eup %5260 }
 0x2b0   :  { %v363_v60 = vsel %vm329_vm2, %v5261_v59, 0.0  ;;  %v5263_v63 = vpop.eup %5262 }
 0x2b1   :  { %364 = vadd.xlane.f32.xlu0 %v363_v60  ;;  %v360_v3 = vsel %vm329_vm2, %v5263_v63, 0.0 }
 0x2ba   :  { %643 = vrot.lane.b32.xlu1 %v5574_v26, %s5442_s15 }
 0x2c7   :  { %550 = vrot.lane.b32.xlu0 %v5560_v20, %s5443_s16 }
 0x2cb   :  { %639 = vrot.lane.b32.xlu0 %v5574_v26, %s5443_s16 }
 0x2de   :  { %361 = vadd.xlane.f32.xlu1 %v360_v3 }
 0x2ef   :  { %641 = vrot.lane.b32.xlu1 %v5566_v24, %s5443_s16 }
 0x330   :  { %v359_v6 = vpop.xlane.xlu0 %358 }
 0x331   :  { %5264 = vrcp.f32 %v359_v6 }
 0x332   :  { %v356_v7 = vpop.xlane.xlu1 %355 }
 0x333   :  { %5266 = vrcp.f32 %v356_v7 }
 0x336   :  { %v644_v25 = vpop.permute.xlu1 %643 }
 0x33a   :  { %v365_v12 = vpop.xlane.xlu0 %364 }
 0x33b   :  { %5268 = vrcp.f32 %v365_v12 }
 0x33e   :  { %v551_v14 = vpop.permute.xlu0 %550  ;;  %v5265_v18 = vpop.eup %5264 }
 0x33f   :  { %4934 = vmatmul.mubr.msk.f32.vlgmr.msra.gmra.mxu0 %vm156_vm1, %v551_v14  ;;  %v369_v23 = vmul.f32 %v5265_v18, %v5257_v54 }
 0x340   :  { %v5267_v19 = vpop.eup %5266 }
 0x341   :  { %v367_v21 = vmul.f32 %v5267_v19, %v5259_v56 }
 0x342   :  { %v640_v32 = vpop.permute.xlu0 %639 }
 0x343   :  { %4919 = vmatprep.mubr.msk.f32.mxu1 %vm329_vm2, %v367_v21 }
 0x344   :  { %4920 = vmatmul.mubr.msk.f32.vlgmr.msra.gmra.mxu1 %vm329_vm2, %v369_v23 }
 0x345   :  { %4923 = vmatpush3.msra.mxu1 %v464_v47 }
 0x346   :  { %4924 = vmatprep.subr.mxu1 %v462_v4 }
 0x347   :  { %4925 = vmatpush3.msra.mxu1 %v462_v4 }
 0x348   :  { %4936 = vmatprep.subr.msk.mxu1 %vm156_vm1, %v646_v5  ;;  %v5269_v28 = vpop.eup %5268 }
 0x349   :  { %v373_v31 = vmul.f32 %v5269_v28, %v5261_v59 }
 0x367   :  { %v362_v27 = vpop.xlane.xlu1 %361 }
 0x368   :  { %5270 = vrcp.f32 %v362_v27 }
 0x36b   :  { %v642_v33 = vpop.permute.xlu1 %641 }
 0x375   :  { %v5271_v29 = vpop.eup %5270 }
 0x376   :  { %v371_v30 = vmul.f32 %v5271_v29, %v5263_v63 }
 0x378   :  { %4926 = vmatprep.mubr.msk.f32.mxu1 %vm329_vm2, %v371_v30 }
 0x379   :  { %4927 = vmatmul.mubr.msk.f32.vlgmr.msra.gmra.mxu1 %vm329_vm2, %v373_v31 }
 0x37a   :  { %4937 = vmatpush3.xpose.msk.msra.mxu1 %vm156_vm1, %v646_v5  ;;  %4940 = vmatprep.mubr.msk.f32.mxu1 %vm156_vm1, %v640_v32 }
 0x37b   :  { %4938 = vmatprep.subr.msk.mxu1 %vm156_vm1, %v644_v25 }
 0x37e   :  { %4939 = vmatpush3.xpose.msk.msra.mxu1 %vm156_vm1, %v644_v25 }
 0x381   :  { %4941 = vmatmul.mubr.msk.f32.vlgmr.msra.gmra.mxu1 %vm156_vm1, %v642_v33 }
 0x3ff   :  { %v4935_v34 = vpop.f32.mrf.mxu0 }
 0x400   :  { %v733_v35 = vsel %vm329_vm2, %v4935_v34, -inf }
 0x401   :  { %734 = vmax.xlane.f32.xlu1 %v733_v35  ;;  %v630_v36 = vpop.f32.mrf.mxu0 }
 0x402   :  { %v730_v37 = vsel %vm329_vm2, %v630_v36, -inf }
 0x403   :  { %731 = vmax.xlane.f32.xlu0 %v730_v37 }
 0x404   :  { %v5642_v38 = vpop.f32.mrf.mxu1 }
 0x406   :  { %v5644_v39 = vpop.f32.mrf.mxu1 }
 0x439   :  { %v5646_v40 = vpop.f32.mrf.mxu1 }
 0x43b   :  { %v5648_v41 = vpop.f32.mrf.mxu1 }
 0x441   :  { %v4942_v42 = vpop.f32.mrf.mxu1 }
 0x442   :  { %v739_v45 = vsel %vm329_vm2, %v4942_v42, -inf }
 0x443   :  { %v721_v43 = vpop.f32.mrf.mxu1 }
 0x444   :  { %v736_v44 = vsel %vm329_vm2, %v721_v43, -inf }
 0x445   :  { %737 = vmax.xlane.f32.xlu0 %v736_v44 }
 0x449   :  { %740 = vmax.xlane.f32.xlu0 %v739_v45 }
 0x48a   :  { %v735_v46 = vpop.xlane.xlu1 %734 }
 0x48b   :  { %v743_v47 = vsub.f32 %v4935_v34, %v735_v46 }
 0x48c   :  { %v732_v48 = vpop.xlane.xlu0 %731 }
 0x48d   :  { %v748_v49 = vmul.f32 1.442695, %v743_v47  ;;  %v742_v50 = vsub.f32 %v630_v36, %v732_v48 }
 0x48f   :  { %5272 = vpow2.f32 %v748_v49  ;;  %v746_v51 = vmul.f32 1.442695, %v742_v50 }
 0x491   :  { %5274 = vpow2.f32 %v746_v51 }
 0x49c   :  { %v5273_v52 = vpop.eup %5272 }
 0x49d   :  { %v757_v53 = vsel %vm329_vm2, %v5273_v52, 0.0 }
 0x49e   :  { %v5275_v54 = vpop.eup %5274  ;;  %758 = vadd.xlane.f32.xlu0 %v757_v53 }
 0x49f   :  { %v754_v55 = vsel %vm329_vm2, %v5275_v54, 0.0 }
 0x4a0   :  { %755 = vadd.xlane.f32.xlu1 %v754_v55 }
 0x4b1   :  { %776 = vrot.lane.b32.xlu1 %v5560_v20, %s5444_s17 }
 0x4b4   :  { %774 = vrot.lane.b32.xlu0 %v5562_v22, %s5444_s17 }
 0x4b5   :  { %863 = vrot.lane.b32.xlu1 %v5566_v24, %s5444_s17 }
 0x4b8   :  { %861 = vrot.lane.b32.xlu0 %v5574_v26, %s5444_s17 }
 0x4b9   :  { %954 = vrot.lane.b32.xlu1 %v5560_v20, %s5445_s18 }
 0x4bc   :  { %1045 = vrot.lane.b32.xlu0 %v5566_v24, %s5445_s18 }
 0x4bd   :  { %952 = vrot.lane.b32.xlu1 %v5562_v22, %s5445_s18 }
 0x4c1   :  { %948 = vrot.lane.b32.xlu1 %v5562_v22, %s5446_s19 }
 0x4c5   :  { %1043 = vrot.lane.b32.xlu1 %v5574_v26, %s5445_s18 }
 0x4ce   :  { %v738_v56 = vpop.xlane.xlu0 %737 }
 0x4cf   :  { %v744_v57 = vsub.f32 %v721_v43, %v738_v56 }
 0x4d1   :  { %v750_v60 = vmul.f32 1.442695, %v744_v57 }
 0x4d2   :  { %v741_v58 = vpop.xlane.xlu0 %740 }
 0x4d3   :  { %v745_v59 = vsub.f32 %v4942_v42, %v741_v58 }
 0x4d5   :  { %v752_v61 = vmul.f32 1.442695, %v745_v59 }
 0x4d7   :  { %5276 = vpow2.f32 %v752_v61 }
 0x4d8   :  { %5278 = vpow2.f32 %v750_v60 }
 0x4e4   :  { %v5277_v62 = vpop.eup %5276 }
 0x4e5   :  { %v5279_v63 = vpop.eup %5278  ;;  %v763_v3 = vsel %vm329_vm2, %v5277_v62, 0.0 }
 0x4e6   :  { %764 = vadd.xlane.f32.xlu0 %v763_v3  ;;  %v760_v4 = vsel %vm329_vm2, %v5279_v63, 0.0 }
 0x4e9   :  { %761 = vadd.xlane.f32.xlu1 %v760_v4 }
 0x4fa   :  { %1041 = vrot.lane.b32.xlu1 %v5566_v24, %s5446_s19 }
 0x4fc   :  { %950 = vrot.lane.b32.xlu0 %v5560_v20, %s5446_s19 }
 0x500   :  { %1039 = vrot.lane.b32.xlu0 %v5574_v26, %s5446_s19 }
 0x527   :  { %v759_v5 = vpop.xlane.xlu0 %758 }
 0x528   :  { %5280 = vrcp.f32 %v759_v5 }
 0x529   :  { %v756_v6 = vpop.xlane.xlu1 %755 }
 0x52a   :  { %5282 = vrcp.f32 %v756_v6 }
 0x52b   :  { %v775_v7 = vpop.permute.xlu0 %774 }
 0x52d   :  { %v777_v12 = vpop.permute.xlu1 %776 }
 0x52e   :  { %4943 = vmatprep.subr.mxu0 %v777_v12 }
 0x52f   :  { %4944 = vmatpush3.msra.mxu0 %v777_v12  ;;  %v862_v14 = vpop.permute.xlu0 %861 }
 0x530   :  { %4945 = vmatprep.subr.mxu0 %v775_v7 }
 0x531   :  { %v864_v18 = vpop.permute.xlu1 %863  ;;  %4946 = vmatpush3.msra.mxu0 %v775_v7 }
 0x532   :  { %4950 = vmatprep.subr.mxu1 %v864_v18 }
 0x533   :  { %4951 = vmatpush3.msra.mxu1 %v864_v18  ;;  %v1046_v19 = vpop.permute.xlu0 %1045 }
 0x534   :  { %4952 = vmatprep.subr.mxu1 %v862_v14 }
 0x535   :  { %v955_v21 = vpop.permute.xlu1 %954  ;;  %4953 = vmatpush3.msra.mxu1 %v862_v14  ;;  %v5281_v23 = vpop.eup %5280 }
 0x536   :  { %4957 = vmatprep.subr.msk.mxu0 %vm156_vm1, %v955_v21  ;;  %4964 = vmatprep.subr.msk.mxu1 %vm156_vm1, %v1046_v19  ;;  %v769_v29 = vmul.f32 %v5281_v23, %v5273_v52 }
 0x537   :  { %v5283_v25 = vpop.eup %5282 }
 0x538   :  { %v767_v27 = vmul.f32 %v5283_v25, %v5275_v54 }
 0x539   :  { %v953_v28 = vpop.permute.xlu1 %952 }
 0x53a   :  { %4947 = vmatprep.mubr.msk.f32.mxu0 %vm329_vm2, %v767_v27 }
 0x53b   :  { %4948 = vmatmul.mubr.msk.f32.vlgmr.msra.gmra.mxu0 %vm329_vm2, %v769_v29 }
 0x53c   :  { %4958 = vmatpush3.xpose.msk.msra.mxu0 %vm156_vm1, %v955_v21 }
 0x53d   :  { %4959 = vmatprep.subr.msk.mxu0 %vm156_vm1, %v953_v28  ;;  %v949_v30 = vpop.permute.xlu1 %948 }
 0x53e   :  { %4961 = vmatprep.mubr.msk.f32.mxu0 %vm156_vm1, %v949_v30 }
 0x540   :  { %4960 = vmatpush3.xpose.msk.msra.mxu0 %vm156_vm1, %v953_v28 }
 0x541   :  { %v1044_v31 = vpop.permute.xlu1 %1043 }
 0x56f   :  { %v765_v32 = vpop.xlane.xlu0 %764 }
 0x570   :  { %5284 = vrcp.f32 %v765_v32 }
 0x572   :  { %v762_v33 = vpop.xlane.xlu1 %761 }
 0x573   :  { %5286 = vrcp.f32 %v762_v33  ;;  %v951_v34 = vpop.permute.xlu0 %950 }
 0x574   :  { %4962 = vmatmul.mubr.msk.f32.vlgmr.msra.gmra.mxu0 %vm156_vm1, %v951_v34 }
 0x576   :  { %v1042_v44 = vpop.permute.xlu1 %1041 }
 0x577   :  { %v1040_v43 = vpop.permute.xlu0 %1039 }
 0x57d   :  { %v5285_v35 = vpop.eup %5284 }
 0x57e   :  { %v773_v42 = vmul.f32 %v5285_v35, %v5277_v62 }
 0x580   :  { %v5287_v36 = vpop.eup %5286 }
 0x581   :  { %v771_v37 = vmul.f32 %v5287_v36, %v5279_v63 }
 0x583   :  { %4954 = vmatprep.mubr.msk.f32.mxu1 %vm329_vm2, %v771_v37 }
 0x584   :  { %4955 = vmatmul.mubr.msk.f32.vlgmr.msra.gmra.mxu1 %vm329_vm2, %v773_v42 }
 0x585   :  { %4965 = vmatpush3.xpose.msk.msra.mxu1 %vm156_vm1, %v1046_v19  ;;  %4968 = vmatprep.mubr.msk.f32.mxu1 %vm156_vm1, %v1040_v43 }
 0x586   :  { %4966 = vmatprep.subr.msk.mxu1 %vm156_vm1, %v1044_v31 }
 0x589   :  { %4967 = vmatpush3.xpose.msk.msra.mxu1 %vm156_vm1, %v1044_v31 }
 0x58c   :  { %4969 = vmatmul.mubr.msk.f32.vlgmr.msra.gmra.mxu1 %vm156_vm1, %v1042_v44 }
 0x5fb   :  { %v5696_v45 = vpop.f32.mrf.mxu0 }
 0x5fd   :  { %v5698_v46 = vpop.f32.mrf.mxu0 }
 0x634   :  { %v4963_v47 = vpop.f32.mrf.mxu0 }
 0x635   :  { %v1133_v48 = vsel %vm329_vm2, %v4963_v47, -inf }
 0x636   :  { %1134 = vmax.xlane.f32.xlu1 %v1133_v48  ;;  %v1030_v49 = vpop.f32.mrf.mxu0 }
 0x637   :  { %v1130_v50 = vsel %vm329_vm2, %v1030_v49, -inf }
 0x638   :  { %1131 = vmax.xlane.f32.xlu0 %v1130_v50 }
 0x644   :  { %v5702_v51 = vpop.f32.mrf.mxu1 }
 0x646   :  { %v5704_v52 = vpop.f32.mrf.mxu1 }
 0x64c   :  { %v4970_v53 = vpop.f32.mrf.mxu1 }
 0x64d   :  { %v1139_v56 = vsel %vm329_vm2, %v4970_v53, -inf }
 0x64e   :  { %v1121_v54 = vpop.f32.mrf.mxu1 }
 0x64f   :  { %v1136_v55 = vsel %vm329_vm2, %v1121_v54, -inf }
 0x650   :  { %1137 = vmax.xlane.f32.xlu0 %v1136_v55 }
 0x654   :  { %1140 = vmax.xlane.f32.xlu0 %v1139_v56 }
 0x6bf   :  { %v1135_v57 = vpop.xlane.xlu1 %1134 }
 0x6c0   :  { %v1143_v58 = vsub.f32 %v4963_v47, %v1135_v57 }
 0x6c1   :  { %v1132_v59 = vpop.xlane.xlu0 %1131 }
 0x6c2   :  { %v1148_v60 = vmul.f32 1.442695, %v1143_v58  ;;  %v1142_v61 = vsub.f32 %v1030_v49, %v1132_v59 }
 0x6c4   :  { %5288 = vpow2.f32 %v1148_v60  ;;  %v1146_v62 = vmul.f32 1.442695, %v1142_v61 }
 0x6c6   :  { %5290 = vpow2.f32 %v1146_v62 }
 0x6d1   :  { %v5289_v63 = vpop.eup %5288 }
 0x6d2   :  { %v1157_v3 = vsel %vm329_vm2, %v5289_v63, 0.0 }
 0x6d3   :  { %v5291_v4 = vpop.eup %5290  ;;  %1158 = vadd.xlane.f32.xlu0 %v1157_v3 }
 0x6d4   :  { %v1154_v5 = vsel %vm329_vm2, %v5291_v4, 0.0 }
 0x6d5   :  { %1155 = vadd.xlane.f32.xlu1 %v1154_v5 }
 0x6d9   :  { %v1138_v6 = vpop.xlane.xlu0 %1137 }
 0x6da   :  { %v1144_v18 = vsub.f32 %v1121_v54, %v1138_v6 }
 0x6dc   :  { %v1150_v19 = vmul.f32 1.442695, %v1144_v18 }
 0x6dd   :  { %v1141_v7 = vpop.xlane.xlu0 %1140 }
 0x6de   :  { %v1145_v12 = vsub.f32 %v4970_v53, %v1141_v7 }
 0x6e0   :  { %v1152_v14 = vmul.f32 1.442695, %v1145_v12 }
 0x6e2   :  { %5292 = vpow2.f32 %v1152_v14 }
 0x6e3   :  { %5294 = vpow2.f32 %v1150_v19 }
 0x6e6   :  { %1176 = vrot.lane.b32.xlu1 %v5560_v20, %s5447_s20 }
 0x6e9   :  { %1174 = vrot.lane.b32.xlu0 %v5562_v22, %s5447_s20 }
 0x6ea   :  { %1263 = vrot.lane.b32.xlu1 %v5566_v24, %s5447_s20 }
 0x6ed   :  { %1261 = vrot.lane.b32.xlu0 %v5574_v26, %s5447_s20 }
 0x6ee   :  { %1354 = vrot.lane.b32.xlu1 %v5560_v20, %s5448_s21 }
 0x6ef   :  { %v5293_v21 = vpop.eup %5292 }
 0x6f0   :  { %v1163_v23 = vsel %vm329_vm2, %v5293_v21, 0.0  ;;  %v5295_v25 = vpop.eup %5294 }
 0x6f1   :  { %1445 = vrot.lane.b32.xlu0 %v5566_v24, %s5448_s21  ;;  %v1160_v27 = vsel %vm329_vm2, %v5295_v25, 0.0 }
 0x6f2   :  { %1352 = vrot.lane.b32.xlu1 %v5562_v22, %s5448_s21 }
 0x6f6   :  { %1348 = vrot.lane.b32.xlu1 %v5562_v22, %s5449_s22 }
 0x6fa   :  { %1443 = vrot.lane.b32.xlu1 %v5574_v26, %s5448_s21 }
 0x710   :  { %1164 = vadd.xlane.f32.xlu0 %v1163_v23 }
 0x71e   :  { %1161 = vadd.xlane.f32.xlu1 %v1160_v27 }
 0x726   :  { %1350 = vrot.lane.b32.xlu0 %v5560_v20, %s5449_s22 }
 0x72a   :  { %1439 = vrot.lane.b32.xlu0 %v5574_v26, %s5449_s22 }
 0x72f   :  { %1441 = vrot.lane.b32.xlu1 %v5566_v24, %s5449_s22 }
 0x75c   :  { %v1159_v28 = vpop.xlane.xlu0 %1158 }
 0x75d   :  { %5296 = vrcp.f32 %v1159_v28 }
 0x75e   :  { %v1156_v29 = vpop.xlane.xlu1 %1155 }
 0x75f   :  { %5298 = vrcp.f32 %v1156_v29 }
 0x760   :  { %v1175_v30 = vpop.permute.xlu0 %1174 }
 0x762   :  { %v1177_v31 = vpop.permute.xlu1 %1176 }
 0x763   :  { %4971 = vmatprep.subr.mxu0 %v1177_v31 }
 0x764   :  { %4972 = vmatpush3.msra.mxu0 %v1177_v31  ;;  %v1262_v32 = vpop.permute.xlu0 %1261 }
 0x765   :  { %4973 = vmatprep.subr.mxu0 %v1175_v30 }
 0x766   :  { %v1264_v33 = vpop.permute.xlu1 %1263  ;;  %4974 = vmatpush3.msra.mxu0 %v1175_v30 }
 0x767   :  { %4978 = vmatprep.subr.mxu1 %v1264_v33 }
 0x768   :  { %4979 = vmatpush3.msra.mxu1 %v1264_v33  ;;  %v1446_v34 = vpop.permute.xlu0 %1445 }
 0x769   :  { %4980 = vmatprep.subr.mxu1 %v1262_v32 }
 0x76a   :  { %v1355_v35 = vpop.permute.xlu1 %1354  ;;  %4981 = vmatpush3.msra.mxu1 %v1262_v32  ;;  %v5297_v36 = vpop.eup %5296 }
 0x76b   :  { %4985 = vmatprep.subr.msk.mxu0 %vm156_vm1, %v1355_v35  ;;  %4992 = vmatprep.subr.msk.mxu1 %vm156_vm1, %v1446_v34  ;;  %v1169_v44 = vmul.f32 %v5297_v36, %v5289_v63 }
 0x76c   :  { %v5299_v37 = vpop.eup %5298 }
 0x76d   :  { %v1167_v42 = vmul.f32 %v5299_v37, %v5291_v4 }
 0x76e   :  { %v1353_v43 = vpop.permute.xlu1 %1352 }
 0x76f   :  { %4975 = vmatprep.mubr.msk.f32.mxu0 %vm329_vm2, %v1167_v42 }
 0x770   :  { %4976 = vmatmul.mubr.msk.f32.vlgmr.msra.gmra.mxu0 %vm329_vm2, %v1169_v44 }
 0x771   :  { %4986 = vmatpush3.xpose.msk.msra.mxu0 %vm156_vm1, %v1355_v35 }
 0x772   :  { %4987 = vmatprep.subr.msk.mxu0 %vm156_vm1, %v1353_v43  ;;  %v1349_v47 = vpop.permute.xlu1 %1348 }
 0x773   :  { %4989 = vmatprep.mubr.msk.f32.mxu0 %vm156_vm1, %v1349_v47 }
 0x775   :  { %4988 = vmatpush3.xpose.msk.msra.mxu0 %vm156_vm1, %v1353_v43 }
 0x776   :  { %v1444_v50 = vpop.permute.xlu1 %1443 }
 0x799   :  { %v1165_v48 = vpop.xlane.xlu0 %1164 }
 0x79a   :  { %5300 = vrcp.f32 %v1165_v48 }
 0x79d   :  { %v1351_v49 = vpop.permute.xlu0 %1350 }
 0x79e   :  { %4990 = vmatmul.mubr.msk.f32.vlgmr.msra.gmra.mxu0 %vm156_vm1, %v1351_v49 }
 0x7a1   :  { %v1440_v58 = vpop.permute.xlu0 %1439 }
 0x7a7   :  { %v1162_v53 = vpop.xlane.xlu1 %1161  ;;  %v5301_v54 = vpop.eup %5300 }
 0x7a8   :  { %5302 = vrcp.f32 %v1162_v53  ;;  %v1173_v57 = vmul.f32 %v5301_v54, %v5293_v21 }
 0x7ab   :  { %v1442_v59 = vpop.permute.xlu1 %1441 }
 0x7b5   :  { %v5303_v55 = vpop.eup %5302 }
 0x7b6   :  { %v1171_v56 = vmul.f32 %v5303_v55, %v5295_v25 }
 0x7b8   :  { %4982 = vmatprep.mubr.msk.f32.mxu1 %vm329_vm2, %v1171_v56 }
 0x7b9   :  { %4983 = vmatmul.mubr.msk.f32.vlgmr.msra.gmra.mxu1 %vm329_vm2, %v1173_v57 }
 0x7ba   :  { %4993 = vmatpush3.xpose.msk.msra.mxu1 %vm156_vm1, %v1446_v34  ;;  %4996 = vmatprep.mubr.msk.f32.mxu1 %vm156_vm1, %v1440_v58 }
 0x7bb   :  { %4994 = vmatprep.subr.msk.mxu1 %vm156_vm1, %v1444_v50 }
 0x7be   :  { %4995 = vmatpush3.xpose.msk.msra.mxu1 %vm156_vm1, %v1444_v50 }
 0x7c1   :  { %4997 = vmatmul.mubr.msk.f32.vlgmr.msra.gmra.mxu1 %vm156_vm1, %v1442_v59 }
 0x830   :  { %v4977_v60 = vpop.f32.mrf.mxu0 }
 0x832   :  { %v1252_v61 = vpop.f32.mrf.mxu0 }
 0x85e   :  { %v4991_v62 = vpop.f32.mrf.mxu0 }
 0x85f   :  { %v1533_v63 = vsel %vm329_vm2, %v4991_v62, -inf }
 0x860   :  { %1534 = vmax.xlane.f32.xlu1 %v1533_v63  ;;  %v1430_v3 = vpop.f32.mrf.mxu0 }
 0x861   :  { %v1530_v4 = vsel %vm329_vm2, %v1430_v3, -inf }
 0x862   :  { %1531 = vmax.xlane.f32.xlu0 %v1530_v4 }
 0x879   :  { %v5754_v5 = vpop.f32.mrf.mxu1 }
 0x87b   :  { %v1339_v6 = vpop.f32.mrf.mxu1 }
 0x881   :  { %v4998_v7 = vpop.f32.mrf.mxu1 }
 0x882   :  { %v1539_v18 = vsel %vm329_vm2, %v4998_v7, -inf }
 0x883   :  { %v1521_v12 = vpop.f32.mrf.mxu1 }
 0x884   :  { %v1536_v14 = vsel %vm329_vm2, %v1521_v12, -inf }
 0x885   :  { %1537 = vmax.xlane.f32.xlu0 %v1536_v14 }
 0x889   :  { %1540 = vmax.xlane.f32.xlu0 %v1539_v18 }
 0x8e9   :  { %v1535_v19 = vpop.xlane.xlu1 %1534 }
 0x8ea   :  { %v1543_v21 = vsub.f32 %v4991_v62, %v1535_v19 }
 0x8eb   :  { %v1532_v23 = vpop.xlane.xlu0 %1531 }
 0x8ec   :  { %v1548_v25 = vmul.f32 1.442695, %v1543_v21  ;;  %v1542_v27 = vsub.f32 %v1430_v3, %v1532_v23 }
 0x8ee   :  { %5304 = vpow2.f32 %v1548_v25  ;;  %v1546_v28 = vmul.f32 1.442695, %v1542_v27 }
 0x8f0   :  { %5306 = vpow2.f32 %v1546_v28 }
 0x8fb   :  { %v5305_v29 = vpop.eup %5304 }
 0x8fc   :  { %v1557_v30 = vsel %vm329_vm2, %v5305_v29, 0.0 }
 0x8fd   :  { %v5307_v31 = vpop.eup %5306  ;;  %1558 = vadd.xlane.f32.xlu0 %v1557_v30 }
 0x8fe   :  { %v1554_v32 = vsel %vm329_vm2, %v5307_v31, 0.0 }
 0x8ff   :  { %1555 = vadd.xlane.f32.xlu1 %v1554_v32 }
 0x90e   :  { %v1538_v33 = vpop.xlane.xlu0 %1537 }
 0x90f   :  { %v1544_v37 = vsub.f32 %v1521_v12, %v1538_v33 }
 0x910   :  { %1576 = vrot.lane.b32.xlu1 %v5560_v20, %s5450_s23 }
 0x911   :  { %v1550_v42 = vmul.f32 1.442695, %v1544_v37 }
 0x912   :  { %v1541_v34 = vpop.xlane.xlu0 %1540 }
 0x913   :  { %v1545_v35 = vsub.f32 %v4998_v7, %v1541_v34 }
 0x914   :  { %1663 = vrot.lane.b32.xlu1 %v5566_v24, %s5450_s23 }
 0x915   :  { %v1552_v36 = vmul.f32 1.442695, %v1545_v35 }
 0x917   :  { %5308 = vpow2.f32 %v1552_v36  ;;  %v1811_v36 = vsub.s32 2, %v5549_v15 }
 0x918   :  { %5310 = vpow2.f32 %v1550_v42 }
 0x924   :  { %v5764_v43 = vpop.eup %5308 }
 0x925   :  { %v1563_v44 = vsel %vm329_vm2, %v5764_v43, 0.0  ;;  %v5311_v47 = vpop.eup %5310 }
 0x926   :  { %1564 = vadd.xlane.f32.xlu0 %v1563_v44  ;;  %v1560_v48 = vsel %vm329_vm2, %v5311_v47, 0.0 }
 0x938   :  { %1561 = vadd.xlane.f32.xlu1 %v1560_v48 }
 0x93c   :  { %1574 = vrot.lane.b32.xlu0 %v5562_v22, %s5450_s23 }
 0x940   :  { %1823 = vrot.lane.b32.xlu0 %v5490_v0, %s5451_s24 }
 0x944   :  { %1752 = vrot.lane.b32.xlu0 %v5698_v46, %s5452_s25 }
 0x948   :  { %1754 = vrot.lane.b32.xlu0 %v5696_v45, %s5452_s25 }
 0x949   :  { %1661 = vrot.lane.b32.xlu1 %v5574_v26, %s5450_s23 }
 0x94c   :  { %1770 = vrot.lane.b32.xlu0 %v4977_v60, %s5453_s26 }
 0x94d   :  { %1821 = vrot.lane.b32.xlu1 %v5495_v1, %s5451_s24 }
 0x950   :  { %1817 = vrot.lane.b32.xlu0 %v5526_v9, %s5451_s24 }
 0x951   :  { %1819 = vrot.lane.b32.xlu1 %v5501_v2, %s5451_s24 }
 0x954   :  { %1756 = vrot.lane.b32.xlu0 %v5704_v52, %s5452_s25 }
 0x955   :  { %1768 = vrot.lane.b32.xlu1 %v1252_v61, %s5453_s26 }
 0x958   :  { %1772 = vrot.lane.b32.xlu0 %v1339_v6, %s5453_s26 }
 0x986   :  { %v1559_v2 = vpop.xlane.xlu0 %1558 }
 0x988   :  { %v1556_v0 = vpop.xlane.xlu1 %1555 }
 0x989   :  { %5312 = vrcp.f32 %v1556_v0 }
 0x98a   :  { %5314 = vrcp.f32 %v1559_v2 }
 0x98c   :  { %v1577_v20 = vpop.permute.xlu1 %1576 }
 0x98d   :  { %4999 = vmatprep.subr.mxu0 %v1577_v20 }
 0x98e   :  { %5000 = vmatpush3.msra.mxu0 %v1577_v20 }
 0x990   :  { %v1664_v22 = vpop.permute.xlu1 %1663 }
 0x991   :  { %5006 = vmatprep.subr.mxu1 %v1664_v22 }
 0x992   :  { %5007 = vmatpush3.msra.mxu1 %v1664_v22 }
 0x996   :  { %v5313_v1 = vpop.eup %5312 }
 0x997   :  { %v1567_v9 = vmul.f32 %v5313_v1, %v5307_v31  ;;  %v5315_v26 = vpop.eup %5314 }
 0x998   :  { %v1569_v46 = vmul.f32 %v5315_v26, %v5305_v29 }
 0x999   :  { %5003 = vmatprep.mubr.msk.f32.mxu0 %vm329_vm2, %v1567_v9 }
 0x9af   :  { %v1565_v24 = vpop.xlane.xlu0 %1564 }
 0x9b0   :  { %5316 = vrcp.f32 %v1565_v24 }
 0x9b3   :  { %v1575_v45 = vpop.permute.xlu0 %1574 }
 0x9b4   :  { %5001 = vmatprep.subr.mxu0 %v1575_v45 }
 0x9b5   :  { %5002 = vmatpush3.msra.mxu0 %v1575_v45 }
 0x9b6   :  { %5004 = vmatmul.mubr.msk.f32.vlgmr.msra.gmra.mxu0 %vm329_vm2, %v1569_v46 }
 0x9b7   :  { %v1824_v52 = vpop.permute.xlu0 %1823 }
 0x9b8   :  { %5013 = vmatprep.subr.mxu0 %v1824_v52 }
 0x9b9   :  { %5014 = vmatpush3.msra.mxu0 %v1824_v52 }
 0x9bb   :  { %v1753_v49 = vpop.permute.xlu0 %1752 }
 0x9bc   :  { %v1796_v12 = vsel %vm156_vm1, %v5644_v39, %v1753_v49 }
 0x9bd   :  { %v5317_v58 = vpop.eup %5316 }
 0x9be   :  { %v1573_v62 = vmul.f32 %v5317_v58, %v5764_v43  ;;  %v35_v58 = vld [vmem:[%s6346_s3] sm:$0xff] }
 0x9bf   :  { %v1755_v53 = vpop.permute.xlu0 %1754 }
 0x9c1   :  { %v1562_v50 = vpop.xlane.xlu1 %1561 }
 0x9c2   :  { %5318 = vrcp.f32 %v1562_v50 }
 0x9c3   :  { %v1771_v55 = vpop.permute.xlu0 %1770 }
 0x9c5   :  { %v1662_v54 = vpop.permute.xlu1 %1661 }
 0x9c6   :  { %5008 = vmatprep.subr.mxu1 %v1662_v54 }
 0x9c7   :  { %5009 = vmatpush3.msra.mxu1 %v1662_v54  ;;  %v1818_v60 = vpop.permute.xlu0 %1817 }
 0x9c9   :  { %v1822_v56 = vpop.permute.xlu1 %1821 }
 0x9ca   :  { %5015 = vmatprep.subr.mxu0 %v1822_v56 }
 0x9cb   :  { %5016 = vmatpush3.msra.mxu0 %v1822_v56  ;;  %v1757_v27 = vpop.permute.xlu0 %1756  ;;  %v36_v56 = vld [vmem:[%s6346_s3 + $0x8] sm:$0xff] }
 0x9cc   :  { %v1798_v29 = vsel %vm156_vm1, %v5648_v41, %v1757_v27  ;;  %v1812_v41 = vrot.slane %v5555_v17, %v1811_v36 }
 0x9cd   :  { %v1820_v57 = vpop.permute.xlu1 %1819 }
 0x9ce   :  { %5017 = vmatprep.subr.mxu0 %v1820_v57 }
 0x9cf   :  { %v5319_v59 = vpop.eup %5318  ;;  %5018 = vmatpush3.msra.mxu0 %v1820_v57  ;;  %v1773_v28 = vpop.permute.xlu0 %1772 }
 0x9d0   :  { %v1571_v61 = vmul.f32 %v5319_v59, %v5311_v47  ;;  %5019 = vmatprep.subr.mxu0 %v1818_v60  ;;  %v1802_v31 = vsel %vm329_vm2, %v1798_v29, %v1773_v28  ;;  %v5867_v29 = vld [vmem:[%s6347_s4] sm:$0xff] }
 0x9d1   :  { %5020 = vmatpush3.msra.mxu0 %v1818_v60  ;;  %v1769_v7 = vpop.permute.xlu1 %1768 }
 0x9d2   :  { %5010 = vmatprep.mubr.msk.f32.mxu1 %vm329_vm2, %v1571_v61  ;;  %v1800_v14 = vsel %vm329_vm2, %v1796_v12, %v1769_v7  ;;  %v46_v12 = vld [vmem:[%s6346_s3 + $0x58] sm:$0xff] }
 0x9d3   :  { %5011 = vmatmul.mubr.msk.f32.vlgmr.msra.gmra.mxu1 %vm329_vm2, %v1573_v62  ;;  %5041 = vmatprep.subr.mxu0 %v46_v12 }
 0xa76   :  { %v5005_v63 = vpop.f32.mrf.mxu0 }
 0xa78   :  { %v1652_v3 = vpop.f32.mrf.mxu0 }
 0xa79   :  { %1784 = vrot.lane.b32.xlu1 %v1652_v3, %s5454_s27 }
 0xa7d   :  { %1786 = vrot.lane.b32.xlu1 %v5005_v63, %s5454_s27 }
 0xa81   :  { %1758 = vrot.lane.b32.xlu1 %v5702_v51, %s5452_s25  ;;  %v1797_v51 = vsel %vm156_vm1, %v5642_v38, %v1755_v53 }
 0xa85   :  { %1774 = vrot.lane.b32.xlu1 %v5754_v5, %s5453_s26  ;;  %v1801_v5 = vsel %vm329_vm2, %v1797_v51, %v1771_v55  ;;  %v37_v55 = vld [vmem:[%s6346_s3 + $0x10] sm:$0xff] }
 0xa93   :  { %v5012_v4 = vpop.f32.mrf.mxu1 }
 0xa94   :  { %1790 = vrot.lane.b32.xlu1 %v5012_v4, %s5454_s27 }
 0xa95   :  { %v1739_v6 = vpop.f32.mrf.mxu1 }
 0xa96   :  { %1788 = vrot.lane.b32.xlu0 %v1739_v6, %s5454_s27 }
 0xaeb   :  { %v1785_v18 = vpop.permute.xlu1 %1784 }
 0xaec   :  { %v1805_v19 = vsel %vm1804_vm3, %v1800_v14, %v1785_v18  ;;  %v45_v14 = vld [vmem:[%s6346_s3 + $0x50] sm:$0xff]  ;;  %v44_v18 = vld [vmem:[%s6346_s3 + $0x48] sm:$0xff] }
 0xaed   :  { %5021 = vmatprep.mubr.msk.f32.mxu0 %vm52_vm0, %v1805_v19  ;;  %v43_v19 = vld [vmem:[%s6346_s3 + $0x40] sm:$0xff] }
 0xaef   :  { %v1787_v21 = vpop.permute.xlu1 %1786 }
 0xaf0   :  { %v1806_v23 = vsel %vm1804_vm3, %v1801_v5, %v1787_v21 }
 0xaf1   :  { %5022 = vmatmul.mubr.msk.f32.vlgmr.msra.gmra.mxu0 %vm52_vm0, %v1806_v23 }
 0xaf2   :  { %5042 = vmatpush3.msra.mxu0 %v46_v12 }
 0xaf3   :  { %v1759_v25 = vpop.permute.xlu1 %1758  ;;  %5043 = vmatprep.subr.mxu0 %v45_v14 }
 0xaf4   :  { %v1799_v38 = vsel %vm156_vm1, %v5646_v40, %v1759_v25  ;;  %5044 = vmatpush3.msra.mxu0 %v45_v14 }
 0xaf5   :  { %5045 = vmatprep.subr.mxu0 %v44_v18 }
 0xaf6   :  { %5046 = vmatpush3.msra.mxu0 %v44_v18 }
 0xaf7   :  { %v1775_v39 = vpop.permute.xlu1 %1774  ;;  %5047 = vmatprep.subr.mxu0 %v43_v19 }
 0xaf8   :  { %v1803_v33 = vsel %vm329_vm2, %v1799_v38, %v1775_v39  ;;  %5048 = vmatpush3.msra.mxu0 %v43_v19  ;;  %v1985_v39 = vsub.s32 4, %v5549_v15 }
 0xb06   :  { %v1791_v30 = vpop.permute.xlu1 %1790 }
 0xb07   :  { %v1808_v35 = vsel %vm1804_vm3, %v1803_v33, %v1791_v30  ;;  %v1986_v30 = vrot.slane %v5867_v29, %v1985_v39 }
 0xb08   :  { %v1789_v32 = vpop.permute.xlu0 %1788 }
 0xb09   :  { %v1807_v34 = vsel %vm1804_vm3, %v1802_v31, %v1789_v32  ;;  %v1993_v31 = vsub.s32 5, %v5549_v15 }
 0xb0a   :  { %5024 = vmatprep.mubr.msk.f32.mxu0 %vm52_vm0, %v1807_v34 }
 0xb0b   :  { %5025 = vmatmul.mubr.msk.f32.gmra.mxu0 %vm52_vm0, %v1808_v35  ;;  %v1994_v34 = vrot.slane %v5867_v29, %v1993_v31 }
 0xbb1   :  { %v5023_v37 = vpop.f32.mrf.mxu0 }
 0xbb2   :  { %v1913_v42 = vadd.f32 %v5023_v37, %v1812_v41 }
 0xbb3   :  { %v1907_v40 = vpop.f32.mrf.mxu0 }
 0xbb4   :  { %v1908_v43 = vadd.f32 %v1907_v40, %v1812_v41  ;;  %v1927_v44 = vadd.f32 %v1913_v42, %v5531_v10 }
 0xbb6   :  { %v1933_v47 = vsel %vm52_vm0, %v1927_v44, 0.0  ;;  %v1926_v48 = vadd.f32 %v1908_v43, %v5520_v8 }
 0xbb7   :  { %1934 = vadd.xlane.f32.xlu1 %v1933_v47 }
 0xbb8   :  { %v1930_v0 = vsel %vm52_vm0, %v1926_v48, 0.0 }
 0xbb9   :  { %1931 = vadd.xlane.f32.xlu0 %v1930_v0 }
 0xbcb   :  { %v5026_v20 = vpop.f32.mrf.mxu0 }
 0xbcc   :  { %v1923_v1 = vadd.f32 %v5026_v20, %v1812_v41 }
 0xbcd   :  { %v1917_v22 = vpop.f32.mrf.mxu0 }
 0xbce   :  { %v1918_v9 = vadd.f32 %v1917_v22, %v1812_v41  ;;  %v1929_v24 = vadd.f32 %v1923_v1, %v5543_v13  ;;  %v38_v13 = vld [vmem:[%s6346_s3 + $0x18] sm:$0xff] }
 0xbcf   :  { %5027 = vmatprep.subr.mxu1 %v38_v13 }
 0xbd0   :  { %v1928_v17 = vadd.f32 %v1918_v9, %v5534_v11  ;;  %v1939_v10 = vsel %vm52_vm0, %v1929_v24, 0.0  ;;  %5028 = vmatpush3.msra.mxu1 %v38_v13 }
 0xbd1   :  { %5029 = vmatprep.subr.mxu1 %v37_v55 }
 0xbd2   :  { %v1936_v2 = vsel %vm52_vm0, %v1928_v17, 0.0  ;;  %5030 = vmatpush3.msra.mxu1 %v37_v55 }
 0xbd3   :  { %1937 = vadd.xlane.f32.xlu0 %v1936_v2  ;;  %5031 = vmatprep.subr.mxu1 %v36_v56 }
 0xbd4   :  { %5032 = vmatpush3.msra.mxu1 %v36_v56 }
 0xbd5   :  { %5033 = vmatprep.subr.mxu1 %v35_v58 }
 0xbd6   :  { %5034 = vmatpush3.msra.mxu1 %v35_v58 }
 0xbd7   :  { %1940 = vadd.xlane.f32.xlu0 %v1939_v10 }
 0xc40   :  { %v1935_v26 = vpop.xlane.xlu1 %1934 }
 0xc41   :  { %v1944_v8 = vmul.f32 0.03125, %v1935_v26  ;;  %v42_v26 = vld [vmem:[%s6346_s3 + $0x38] sm:$0xff] }
 0xc42   :  { %v1932_v45 = vpop.xlane.xlu0 %1931  ;;  %5049 = vmatprep.subr.mxu0 %v42_v26 }
 0xc43   :  { %v1948_v46 = vsub.f32 %v1927_v44, %v1944_v8  ;;  %v1943_v52 = vmul.f32 0.03125, %v1932_v45  ;;  %5050 = vmatpush3.msra.mxu0 %v42_v26  ;;  %v41_v8 = vld [vmem:[%s6346_s3 + $0x30] sm:$0xff]  ;;  %v40_v45 = vld [vmem:[%s6346_s3 + $0x28] sm:$0xff] }
 0xc44   :  { %5051 = vmatprep.subr.mxu0 %v41_v8  ;;  %v5927_v26 = vld [vmem:[%s6345_s2 + $0x28] sm:$0xff] }
 0xc45   :  { %v1947_v49 = vsub.f32 %v1926_v48, %v1943_v52  ;;  %v1952_v50 = vmul.f32 %v1948_v46, %v1948_v46  ;;  %5052 = vmatpush3.msra.mxu0 %v41_v8  ;;  %v2001_v52 = vsub.s32 1, %v5549_v15  ;;  %v5934_v8 = vld [vmem:[%s6345_s2 + $0x20] sm:$0xff] }
 0xc46   :  { %5053 = vmatprep.subr.mxu0 %v40_v45 }
 0xc47   :  { %v1958_v53 = vsel %vm52_vm0, %v1952_v50, 0.0  ;;  %v1951_v54 = vmul.f32 %v1947_v49, %v1947_v49  ;;  %5054 = vmatpush3.msra.mxu0 %v40_v45 }
 0xc48   :  { %1959 = vadd.xlane.f32.xlu0 %v1958_v53 }
 0xc49   :  { %v1955_v11 = vsel %vm52_vm0, %v1951_v54, 0.0 }
 0xc4a   :  { %1956 = vadd.xlane.f32.xlu1 %v1955_v11 }
 0xc5c   :  { %v1938_v57 = vpop.xlane.xlu0 %1937 }
 0xc5d   :  { %v1945_v59 = vmul.f32 0.03125, %v1938_v57 }
 0xc5f   :  { %v1949_v60 = vsub.f32 %v1928_v17, %v1945_v59 }
 0xc60   :  { %v1941_v61 = vpop.xlane.xlu0 %1940 }
 0xc61   :  { %v1946_v62 = vmul.f32 0.03125, %v1941_v61  ;;  %v1953_v63 = vmul.f32 %v1949_v60, %v1949_v60 }
 0xc63   :  { %v1950_v3 = vsub.f32 %v1929_v24, %v1946_v62  ;;  %v1961_v4 = vsel %vm52_vm0, %v1953_v63, 0.0  ;;  %v2106_v62 = vsub.s32 3, %v5549_v15 }
 0xc64   :  { %1962 = vadd.xlane.f32.xlu1 %v1961_v4 }
 0xc65   :  { %v1954_v6 = vmul.f32 %v1950_v3, %v1950_v3  ;;  %v2107_v63 = vrot.slane %v5867_v29, %v2106_v62 }
 0xc67   :  { %v1964_v7 = vsel %vm52_vm0, %v1954_v6, 0.0 }
 0xc68   :  { %1965 = vadd.xlane.f32.xlu0 %v1964_v7 }
 0xcd1   :  { %v1960_v51 = vpop.xlane.xlu0 %1959 }
 0xcd2   :  { %v1968_v5 = vmul.f32 0.03125, %v1960_v51 }
 0xcd3   :  { %v1957_v21 = vpop.xlane.xlu1 %1956 }
 0xcd4   :  { %v1972_v23 = vadd.f32 1e-05, %v1968_v5  ;;  %v1967_v25 = vmul.f32 0.03125, %v1957_v21 }
 0xcd6   :  { %5320 = vrsqrt.f32 %v1972_v23  ;;  %v1971_v27 = vadd.f32 1e-05, %v1967_v25 }
 0xcd8   :  { %5322 = vrsqrt.f32 %v1971_v27 }
 0xce3   :  { %v5321_v28 = vpop.eup %5320 }
 0xce4   :  { %v1980_v38 = vmul.f32 %v5321_v28, %v1948_v46  ;;  %v39_v46 = vld [vmem:[%s6346_s3 + $0x20] sm:$0xff] }
 0xce5   :  { %v5323_v32 = vpop.eup %5322  ;;  %5055 = vmatprep.subr.mxu0 %v39_v46 }
 0xce6   :  { %v1979_v33 = vmul.f32 %v5323_v32, %v1947_v49  ;;  %v1988_v35 = vmul.f32 %v1986_v30, %v1980_v38  ;;  %5056 = vmatpush3.msra.mxu0 %v39_v46  ;;  %v2002_v49 = vrot.slane %v5867_v29, %v2001_v52 }
 0xce8   :  { %v1987_v41 = vmul.f32 %v1986_v30, %v1979_v33  ;;  %v1996_v42 = vadd.f32 %v1994_v34, %v1988_v35 }
 0xcea   :  { %v1995_v37 = vadd.f32 %v1994_v34, %v1987_v41 }
 0xcec   :  { %5035 = vmatprep.mubr.msk.f32.mxu1 %vm52_vm0, %v1995_v37 }
 0xced   :  { %5036 = vmatmul.mubr.msk.f32.vlgmr.msra.gmra.mxu1 %vm52_vm0, %v1996_v42  ;;  %v1963_v40 = vpop.xlane.xlu1 %1962 }
 0xcee   :  { %v1969_v43 = vmul.f32 0.03125, %v1963_v40 }
 0xcf0   :  { %v1973_v44 = vadd.f32 1e-05, %v1969_v43 }
 0xcf1   :  { %v1966_v47 = vpop.xlane.xlu0 %1965 }
 0xcf2   :  { %5324 = vrsqrt.f32 %v1973_v44  ;;  %v1970_v48 = vmul.f32 0.03125, %v1966_v47 }
 0xcf4   :  { %v1974_v0 = vadd.f32 1e-05, %v1970_v48 }
 0xcf6   :  { %5326 = vrsqrt.f32 %v1974_v0 }
 0xcff   :  { %v5325_v20 = vpop.eup %5324 }
 0xd00   :  { %v1981_v22 = vmul.f32 %v5325_v20, %v1949_v60 }
 0xd02   :  { %v1989_v1 = vmul.f32 %v1986_v30, %v1981_v22 }
 0xd03   :  { %v5327_v9 = vpop.eup %5326 }
 0xd04   :  { %v1997_v17 = vadd.f32 %v1994_v34, %v1989_v1  ;;  %v1982_v2 = vmul.f32 %v5327_v9, %v1950_v3 }
 0xd06   :  { %5038 = vmatprep.mubr.msk.f32.mxu1 %vm52_vm0, %v1997_v17  ;;  %v1990_v24 = vmul.f32 %v1986_v30, %v1982_v2  ;;  %v5914_v2 = vld [vmem:[%s6345_s2 + $0x38] sm:$0xff] }
 0xd07   :  { %5063 = vmatprep.subr.mxu1 %v5914_v2 }
 0xd08   :  { %v1998_v10 = vadd.f32 %v1994_v34, %v1990_v24  ;;  %v5919_v24 = vld [vmem:[%s6345_s2 + $0x30] sm:$0xff]  ;;  %5064 = vmatpush3.msra.mxu1 %v5914_v2 }
 0xd09   :  { %5065 = vmatprep.subr.mxu1 %v5919_v24 }
 0xd0a   :  { %5039 = vmatmul.mubr.msk.f32.gmra.mxu1 %vm52_vm0, %v1998_v10 }
 0xd0b   :  { %5066 = vmatpush3.msra.mxu1 %v5919_v24 }
 0xd0c   :  { %5067 = vmatprep.subr.mxu1 %v5927_v26 }
 0xd0d   :  { %5068 = vmatpush3.msra.mxu1 %v5927_v26 }
 0xd0e   :  { %5069 = vmatprep.subr.mxu1 %v5934_v8 }
 0xd0f   :  { %5070 = vmatpush3.msra.mxu1 %v5934_v8 }
 0xdad   :  { %v5037_v50 = vpop.f32.mrf.mxu1 }
 0xdae   :  { %v2087_v53 = vadd.f32 %v5037_v50, %v2002_v49 }
 0xdaf   :  { %v2081_v54 = vpop.f32.mrf.mxu1 }
 0xdb0   :  { %v2082_v11 = vadd.f32 %v2081_v54, %v2002_v49  ;;  %v2101_v55 = vmax.f32 %v2087_v53, 0.0 }
 0xdb2   :  { %v2100_v13 = vmax.f32 %v2082_v11, 0.0  ;;  %v2264_v11 = vsub.s32 6, %v5549_v15 }
 0xdb4   :  { %5057 = vmatprep.mubr.msk.f32.mxu0 %vm2108_vm4, %v2100_v13 }
 0xdb5   :  { %5058 = vmatmul.mubr.msk.f32.vlgmr.msra.gmra.mxu0 %vm2108_vm4, %v2101_v55  ;;  %v2265_v55 = vrot.slane %v5867_v29, %v2264_v11 }
 0xdca   :  { %v5040_v56 = vpop.f32.mrf.mxu1 }
 0xdcb   :  { %v2097_v57 = vadd.f32 %v5040_v56, %v2002_v49  ;;  %v2272_v56 = vsub.s32 7, %v5549_v15 }
 0xdcc   :  { %v2091_v58 = vpop.f32.mrf.mxu1 }
 0xdcd   :  { %v2092_v59 = vadd.f32 %v2091_v58, %v2002_v49  ;;  %v2103_v61 = vmax.f32 %v2097_v57, 0.0 }
 0xdcf   :  { %v2102_v60 = vmax.f32 %v2092_v59, 0.0 }
 0xdd1   :  { %5060 = vmatprep.mubr.msk.f32.mxu0 %vm2108_vm4, %v2102_v60  ;;  %v2273_v60 = vrot.slane %v5867_v29, %v2272_v56 }
 0xdd2   :  { %5061 = vmatmul.mubr.msk.f32.gmra.mxu0 %vm2108_vm4, %v2103_v61 }
 0xe75   :  { %v5059_v3 = vpop.f32.mrf.mxu0 }
 0xe76   :  { %v2193_v4 = vadd.f32 %v5059_v3, %v2107_v63 }
 0xe77   :  { %v2187_v6 = vpop.f32.mrf.mxu0 }
 0xe78   :  { %v2207_v7 = vadd.f32 %v2193_v4, %v1996_v42  ;;  %v2188_v12 = vadd.f32 %v2187_v6, %v2107_v63 }
 0xe7a   :  { %v2206_v14 = vadd.f32 %v2188_v12, %v1995_v37  ;;  %v2213_v18 = vsel %vm52_vm0, %v2207_v7, 0.0 }
 0xe7b   :  { %2214 = vadd.xlane.f32.xlu0 %v2213_v18 }
 0xe7c   :  { %v2210_v19 = vsel %vm52_vm0, %v2206_v14, 0.0 }
 0xe7d   :  { %2211 = vadd.xlane.f32.xlu1 %v2210_v19 }
 0xe92   :  { %v5062_v51 = vpop.f32.mrf.mxu0 }
 0xe93   :  { %v2203_v5 = vadd.f32 %v5062_v51, %v2107_v63 }
 0xe94   :  { %v2197_v21 = vpop.f32.mrf.mxu0 }
 0xe95   :  { %v2209_v23 = vadd.f32 %v2203_v5, %v1998_v10  ;;  %v2198_v25 = vadd.f32 %v2197_v21, %v2107_v63 }
 0xe97   :  { %v2208_v27 = vadd.f32 %v2198_v25, %v1997_v17  ;;  %v2219_v28 = vsel %vm52_vm0, %v2209_v23, 0.0 }
 0xe98   :  { %2220 = vadd.xlane.f32.xlu0 %v2219_v28 }
 0xe99   :  { %v2216_v30 = vsel %vm52_vm0, %v2208_v27, 0.0 }
 0xe9a   :  { %2217 = vadd.xlane.f32.xlu1 %v2216_v30  ;;  %v5967_v30 = vld [vmem:[%s6347_s4 + $0x8] sm:$0xff] }
 0xf04   :  { %v2215_v38 = vpop.xlane.xlu0 %2214 }
 0xf05   :  { %v2223_v32 = vmul.f32 0.03125, %v2215_v38  ;;  %v2301_v38 = vrot.slane %v5967_v30, %v50_v16 }
 0xf06   :  { %v2212_v33 = vpop.xlane.xlu1 %2211 }
 0xf07   :  { %v2227_v34 = vsub.f32 %v2207_v7, %v2223_v32  ;;  %v2222_v35 = vmul.f32 0.03125, %v2212_v33 }
 0xf09   :  { %v2226_v41 = vsub.f32 %v2206_v14, %v2222_v35  ;;  %v2231_v37 = vmul.f32 %v2227_v34, %v2227_v34 }
 0xf0b   :  { %v2237_v42 = vsel %vm52_vm0, %v2231_v37, 0.0  ;;  %v2230_v40 = vmul.f32 %v2226_v41, %v2226_v41 }
 0xf0c   :  { %2238 = vadd.xlane.f32.xlu0 %v2237_v42 }
 0xf0d   :  { %v2234_v43 = vsel %vm52_vm0, %v2230_v40, 0.0 }
 0xf0e   :  { %2235 = vadd.xlane.f32.xlu1 %v2234_v43 }
 0xf21   :  { %v2221_v44 = vpop.xlane.xlu0 %2220 }
 0xf22   :  { %v2225_v47 = vmul.f32 0.03125, %v2221_v44 }
 0xf23   :  { %v2218_v48 = vpop.xlane.xlu1 %2217 }
 0xf24   :  { %v2229_v0 = vsub.f32 %v2209_v23, %v2225_v47  ;;  %v2224_v20 = vmul.f32 0.03125, %v2218_v48 }
 0xf26   :  { %v2228_v22 = vsub.f32 %v2208_v27, %v2224_v20  ;;  %v2233_v1 = vmul.f32 %v2229_v0, %v2229_v0 }
 0xf28   :  { %v2243_v9 = vsel %vm52_vm0, %v2233_v1, 0.0  ;;  %v2232_v17 = vmul.f32 %v2228_v22, %v2228_v22 }
 0xf29   :  { %2244 = vadd.xlane.f32.xlu0 %v2243_v9 }
 0xf2a   :  { %v2240_v10 = vsel %vm52_vm0, %v2232_v17, 0.0 }
 0xf2b   :  { %2241 = vadd.xlane.f32.xlu1 %v2240_v10 }
 0xf95   :  { %v2239_v45 = vpop.xlane.xlu0 %2238 }
 0xf96   :  { %v2247_v46 = vmul.f32 0.03125, %v2239_v45 }
 0xf97   :  { %v2236_v49 = vpop.xlane.xlu1 %2235 }
 0xf98   :  { %v2251_v50 = vadd.f32 1e-05, %v2247_v46  ;;  %v2246_v53 = vmul.f32 0.03125, %v2236_v49 }
 0xf9a   :  { %5328 = vrsqrt.f32 %v2251_v50  ;;  %v2250_v54 = vadd.f32 1e-05, %v2246_v53 }
 0xf9c   :  { %5330 = vrsqrt.f32 %v2250_v54 }
 0xfa7   :  { %v5329_v13 = vpop.eup %5328 }
 0xfa8   :  { %v2259_v57 = vmul.f32 %v5329_v13, %v2227_v34 }
 0xfa9   :  { %v5331_v58 = vpop.eup %5330 }
 0xfaa   :  { %v2258_v59 = vmul.f32 %v5331_v58, %v2226_v41  ;;  %v2267_v61 = vmul.f32 %v2265_v55, %v2259_v57 }
 0xfac   :  { %v2266_v63 = vmul.f32 %v2265_v55, %v2258_v59  ;;  %v5950_v4 = vadd.f32 %v2273_v60, %v2267_v61 }
 0xfae   :  { %v5948_v3 = vadd.f32 %v2273_v60, %v2266_v63 }
 0xfb0   :  { %5071 = vmatprep.mubr.msk.f32.mxu1 %vm52_vm0, %v5948_v3 }
 0xfb1   :  { %5072 = vmatmul.mubr.msk.f32.vlgmr.msra.gmra.mxu1 %vm52_vm0, %v5950_v4 }
 0xfb2   :  { %v2245_v6 = vpop.xlane.xlu0 %2244 }
 0xfb3   :  { %v2249_v7 = vmul.f32 0.03125, %v2245_v6 }
 0xfb4   :  { %v2242_v12 = vpop.xlane.xlu1 %2241 }
 0xfb5   :  { %v2253_v14 = vadd.f32 1e-05, %v2249_v7  ;;  %v2248_v18 = vmul.f32 0.03125, %v2242_v12 }
 0xfb7   :  { %5332 = vrsqrt.f32 %v2253_v14  ;;  %v2252_v19 = vadd.f32 1e-05, %v2248_v18 }
 0xfb9   :  { %5334 = vrsqrt.f32 %v2252_v19 }
 0xfc4   :  { %v5333_v29 = vpop.eup %5332 }
 0xfc5   :  { %v2261_v51 = vmul.f32 %v5333_v29, %v2229_v0 }
 0xfc6   :  { %v5335_v5 = vpop.eup %5334 }
 0xfc7   :  { %v2260_v21 = vmul.f32 %v5335_v5, %v2228_v22  ;;  %v2269_v23 = vmul.f32 %v2265_v55, %v2261_v51 }
 0xfc9   :  { %v2268_v25 = vmul.f32 %v2265_v55, %v2260_v21  ;;  %v5958_v28 = vadd.f32 %v2273_v60, %v2269_v23 }
 0xfcb   :  { %v5956_v27 = vadd.f32 %v2273_v60, %v2268_v25 }
 0xfcd   :  { %5074 = vmatprep.mubr.msk.f32.mxu1 %vm52_vm0, %v5956_v27 }
 0xfce   :  { %5075 = vmatmul.mubr.msk.f32.gmra.mxu1 %vm52_vm0, %v5958_v28 }
0x1071   :  { %v5073_v32 = vpop.f32.mrf.mxu1 }
0x1072   :  { %v5972_v33 = vadd.f32 %v5073_v32, %v2301_v38 }
0x1073   :  { %v2380_v34 = vpop.f32.mrf.mxu1 }
0x1074   :  { %v5974_v35 = vadd.f32 %v2380_v34, %v2301_v38  ;;  %2403 = vrot.lane.b32.xlu1 %v5972_v33, %s5440_s13 }
0x1076   :  { %2401 = vrot.lane.b32.xlu0 %v5974_v35, %s5440_s13  ;;  %5081 = vmatprep.mubr.msk.f32.mxu1 %vm156_vm1, %v5974_v35 }
0x108e   :  { %v5076_v41 = vpop.f32.mrf.mxu1 }
0x108f   :  { %v5982_v37 = vadd.f32 %v5076_v41, %v2301_v38 }
0x1090   :  { %v2390_v42 = vpop.f32.mrf.mxu1 }
0x1091   :  { %v5984_v16 = vadd.f32 %v2390_v42, %v2301_v38  ;;  %2492 = vrot.lane.b32.xlu1 %v5982_v37, %s5440_s13 }
0x1093   :  { %5088 = vmatprep.mubr.msk.f32.mxu0 %vm156_vm1, %v5984_v16 }
0x1095   :  { %2490 = vrot.lane.b32.xlu1 %v5984_v16, %s5440_s13 }
0x10e6   :  { %v2404_v40 = vpop.permute.xlu1 %2403 }
0x10e7   :  { %5077 = vmatprep.subr.msk.mxu1 %vm156_vm1, %v2404_v40 }
0x10e8   :  { %5078 = vmatpush3.xpose.msk.msra.mxu1 %vm156_vm1, %v2404_v40  ;;  %v2402_v43 = vpop.permute.xlu0 %2401 }
0x10e9   :  { %5079 = vmatprep.subr.msk.mxu1 %vm156_vm1, %v2402_v43 }
0x10ec   :  { %5080 = vmatpush3.xpose.msk.msra.mxu1 %vm156_vm1, %v2402_v43 }
0x10ef   :  { %5082 = vmatmul.mubr.msk.f32.vlgmr.msra.gmra.mxu1 %vm156_vm1, %v5972_v33 }
0x1103   :  { %v2493_v44 = vpop.permute.xlu1 %2492 }
0x1104   :  { %5084 = vmatprep.subr.msk.mxu0 %vm156_vm1, %v2493_v44 }
0x1105   :  { %5085 = vmatpush3.xpose.msk.msra.mxu0 %vm156_vm1, %v2493_v44 }
0x1107   :  { %v2491_v47 = vpop.permute.xlu1 %2490 }
0x1108   :  { %5086 = vmatprep.subr.msk.mxu0 %vm156_vm1, %v2491_v47 }
0x1109   :  { %5087 = vmatpush3.xpose.msk.msra.mxu0 %vm156_vm1, %v2491_v47 }
0x110c   :  { %5089 = vmatmul.mubr.msk.f32.vlgmr.msra.gmra.mxu0 %vm156_vm1, %v5982_v37 }
0x11af   :  { %v5083_v48 = vpop.f32.mrf.mxu1 }
0x11b0   :  { %v2580_v0 = vsel %vm329_vm2, %v5083_v48, -inf }
0x11b1   :  { %2581 = vmax.xlane.f32.xlu1 %v2580_v0  ;;  %v2479_v20 = vpop.f32.mrf.mxu1 }
0x11b2   :  { %v2577_v22 = vsel %vm329_vm2, %v2479_v20, -inf }
0x11b3   :  { %2578 = vmax.xlane.f32.xlu0 %v2577_v22 }
0x11cc   :  { %v5090_v1 = vpop.f32.mrf.mxu0 }
0x11cd   :  { %v2586_v10 = vsel %vm329_vm2, %v5090_v1, -inf }
0x11ce   :  { %v2568_v9 = vpop.f32.mrf.mxu0 }
0x11cf   :  { %v2583_v17 = vsel %vm329_vm2, %v2568_v9, -inf }
0x11d0   :  { %2584 = vmax.xlane.f32.xlu0 %v2583_v17 }
0x11d4   :  { %2587 = vmax.xlane.f32.xlu0 %v2586_v10 }
0x123a   :  { %v2582_v45 = vpop.xlane.xlu1 %2581 }
0x123b   :  { %v2590_v46 = vsub.f32 %v5083_v48, %v2582_v45 }
0x123c   :  { %v2579_v49 = vpop.xlane.xlu0 %2578 }
0x123d   :  { %v2595_v50 = vmul.f32 1.442695, %v2590_v46  ;;  %v2589_v53 = vsub.f32 %v2479_v20, %v2579_v49 }
0x123f   :  { %5336 = vpow2.f32 %v2595_v50  ;;  %v2593_v54 = vmul.f32 1.442695, %v2589_v53 }
0x1241   :  { %5338 = vpow2.f32 %v2593_v54 }
0x124c   :  { %v5337_v13 = vpop.eup %5336 }
0x124d   :  { %v2604_v55 = vsel %vm329_vm2, %v5337_v13, 0.0 }
0x124e   :  { %v5339_v57 = vpop.eup %5338  ;;  %2605 = vadd.xlane.f32.xlu0 %v2604_v55 }
0x124f   :  { %v2601_v58 = vsel %vm329_vm2, %v5339_v57, 0.0 }
0x1250   :  { %2602 = vadd.xlane.f32.xlu1 %v2601_v58 }
0x1259   :  { %v2585_v59 = vpop.xlane.xlu0 %2584 }
0x125a   :  { %v2591_v6 = vsub.f32 %v2568_v9, %v2585_v59 }
0x125c   :  { %v2597_v7 = vmul.f32 1.442695, %v2591_v6 }
0x125d   :  { %v2588_v60 = vpop.xlane.xlu0 %2587 }
0x125e   :  { %v2592_v61 = vsub.f32 %v5090_v1, %v2588_v60 }
0x1260   :  { %v2599_v63 = vmul.f32 1.442695, %v2592_v61 }
0x1261   :  { %2623 = vrot.lane.b32.xlu1 %v5972_v33, %s5441_s14 }
0x1262   :  { %5340 = vpow2.f32 %v2599_v63 }
0x1263   :  { %5342 = vpow2.f32 %v2597_v7 }
0x1264   :  { %2621 = vrot.lane.b32.xlu0 %v5974_v35, %s5441_s14 }
0x1265   :  { %2710 = vrot.lane.b32.xlu1 %v5982_v37, %s5441_s14 }
0x1268   :  { %2708 = vrot.lane.b32.xlu0 %v5984_v16, %s5441_s14 }
0x1269   :  { %2801 = vrot.lane.b32.xlu1 %v5972_v33, %s5442_s15 }
0x126c   :  { %2892 = vrot.lane.b32.xlu0 %v5982_v37, %s5442_s15 }
0x126d   :  { %2799 = vrot.lane.b32.xlu1 %v5974_v35, %s5442_s15 }
0x126f   :  { %v5341_v12 = vpop.eup %5340 }
0x1270   :  { %v2610_v14 = vsel %vm329_vm2, %v5341_v12, 0.0  ;;  %v5343_v18 = vpop.eup %5342 }
0x1271   :  { %2795 = vrot.lane.b32.xlu1 %v5974_v35, %s5443_s16  ;;  %v2607_v19 = vsel %vm329_vm2, %v5343_v18, 0.0 }
0x1275   :  { %2890 = vrot.lane.b32.xlu1 %v5984_v16, %s5442_s15 }
0x128b   :  { %2611 = vadd.xlane.f32.xlu0 %v2610_v14 }
0x1299   :  { %2608 = vadd.xlane.f32.xlu1 %v2607_v19 }
0x12a1   :  { %2797 = vrot.lane.b32.xlu0 %v5972_v33, %s5443_s16 }
0x12a5   :  { %2886 = vrot.lane.b32.xlu0 %v5984_v16, %s5443_s16 }
0x12aa   :  { %2888 = vrot.lane.b32.xlu1 %v5982_v37, %s5443_s16 }
0x12d7   :  { %v2606_v29 = vpop.xlane.xlu0 %2605 }
0x12d8   :  { %5344 = vrcp.f32 %v2606_v29 }
0x12d9   :  { %v2603_v51 = vpop.xlane.xlu1 %2602 }
0x12da   :  { %5346 = vrcp.f32 %v2603_v51 }
0x12db   :  { %v2622_v21 = vpop.permute.xlu0 %2621 }
0x12dd   :  { %v2624_v5 = vpop.permute.xlu1 %2623 }
0x12de   :  { %5091 = vmatprep.subr.mxu1 %v2624_v5 }
0x12df   :  { %5092 = vmatpush3.msra.mxu1 %v2624_v5  ;;  %v2709_v34 = vpop.permute.xlu0 %2708 }
0x12e0   :  { %5093 = vmatprep.subr.mxu1 %v2622_v21 }
0x12e1   :  { %v2711_v23 = vpop.permute.xlu1 %2710  ;;  %5094 = vmatpush3.msra.mxu1 %v2622_v21 }
0x12e2   :  { %5098 = vmatprep.subr.mxu1 %v2711_v23 }
0x12e3   :  { %v2893_v44 = vpop.permute.xlu0 %2892 }
0x12e5   :  { %v2802_v25 = vpop.permute.xlu1 %2801  ;;  %v5345_v38 = vpop.eup %5344 }
0x12e6   :  { %5105 = vmatprep.subr.msk.mxu0 %vm156_vm1, %v2802_v25  ;;  %v2616_v40 = vmul.f32 %v5345_v38, %v5337_v13 }
0x12e7   :  { %v5347_v32 = vpop.eup %5346  ;;  %5106 = vmatpush3.xpose.msk.msra.mxu0 %vm156_vm1, %v2802_v25 }
0x12e8   :  { %v2614_v41 = vmul.f32 %v5347_v32, %v5339_v57 }
0x12e9   :  { %v2800_v42 = vpop.permute.xlu1 %2799 }
0x12ea   :  { %5095 = vmatprep.mubr.msk.f32.mxu1 %vm329_vm2, %v2614_v41  ;;  %5107 = vmatprep.subr.msk.mxu0 %vm156_vm1, %v2800_v42 }
0x12eb   :  { %5096 = vmatmul.mubr.msk.f32.vlgmr.msra.gmra.mxu1 %vm329_vm2, %v2616_v40  ;;  %5108 = vmatpush3.xpose.msk.msra.mxu0 %vm156_vm1, %v2800_v42 }
0x12ec   :  { %5099 = vmatpush3.msra.mxu1 %v2711_v23 }
0x12ed   :  { %5100 = vmatprep.subr.mxu1 %v2709_v34  ;;  %v2796_v43 = vpop.permute.xlu1 %2795 }
0x12ee   :  { %5101 = vmatpush3.msra.mxu1 %v2709_v34  ;;  %5109 = vmatprep.mubr.msk.f32.mxu0 %vm156_vm1, %v2796_v43 }
0x12ef   :  { %5112 = vmatprep.subr.msk.mxu1 %vm156_vm1, %v2893_v44 }
0x12f1   :  { %v2891_v0 = vpop.permute.xlu1 %2890 }
0x1314   :  { %v2612_v47 = vpop.xlane.xlu0 %2611 }
0x1315   :  { %5348 = vrcp.f32 %v2612_v47 }
0x1318   :  { %v2798_v48 = vpop.permute.xlu0 %2797 }
0x1319   :  { %5110 = vmatmul.mubr.msk.f32.vlgmr.msra.gmra.mxu0 %vm156_vm1, %v2798_v48 }
0x131c   :  { %v2887_v10 = vpop.permute.xlu0 %2886 }
0x1322   :  { %v2609_v20 = vpop.xlane.xlu1 %2608  ;;  %v5349_v22 = vpop.eup %5348 }
0x1323   :  { %5350 = vrcp.f32 %v2609_v20  ;;  %v2620_v17 = vmul.f32 %v5349_v22, %v5341_v12 }
0x1326   :  { %v2889_v45 = vpop.permute.xlu1 %2888 }
0x1330   :  { %v5351_v1 = vpop.eup %5350 }
0x1331   :  { %v2618_v9 = vmul.f32 %v5351_v1, %v5343_v18 }
0x1333   :  { %5102 = vmatprep.mubr.msk.f32.mxu1 %vm329_vm2, %v2618_v9 }
0x1334   :  { %5103 = vmatmul.mubr.msk.f32.vlgmr.msra.gmra.mxu1 %vm329_vm2, %v2620_v17 }
0x1335   :  { %5113 = vmatpush3.xpose.msk.msra.mxu1 %vm156_vm1, %v2893_v44  ;;  %5116 = vmatprep.mubr.msk.f32.mxu1 %vm156_vm1, %v2887_v10 }
0x1336   :  { %5114 = vmatprep.subr.msk.mxu1 %vm156_vm1, %v2891_v0 }
0x1339   :  { %5115 = vmatpush3.xpose.msk.msra.mxu1 %vm156_vm1, %v2891_v0 }
0x133c   :  { %5117 = vmatmul.mubr.msk.f32.vlgmr.msra.gmra.mxu1 %vm156_vm1, %v2889_v45 }
0x13ab   :  { %v6054_v54 = vpop.f32.mrf.mxu1 }
0x13ad   :  { %v6056_v13 = vpop.f32.mrf.mxu1 }
0x13d9   :  { %v5111_v46 = vpop.f32.mrf.mxu0 }
0x13da   :  { %v2980_v49 = vsel %vm329_vm2, %v5111_v46, -inf }
0x13db   :  { %2981 = vmax.xlane.f32.xlu1 %v2980_v49  ;;  %v2877_v50 = vpop.f32.mrf.mxu0 }
0x13dc   :  { %v2977_v53 = vsel %vm329_vm2, %v2877_v50, -inf }
0x13dd   :  { %2978 = vmax.xlane.f32.xlu0 %v2977_v53 }
0x13f4   :  { %v6058_v55 = vpop.f32.mrf.mxu1 }
0x13f6   :  { %v6060_v57 = vpop.f32.mrf.mxu1 }
0x13fc   :  { %v5118_v58 = vpop.f32.mrf.mxu1 }
0x13fd   :  { %v2986_v61 = vsel %vm329_vm2, %v5118_v58, -inf }
0x13fe   :  { %v2968_v59 = vpop.f32.mrf.mxu1 }
0x13ff   :  { %v2983_v60 = vsel %vm329_vm2, %v2968_v59, -inf }
0x1400   :  { %2984 = vmax.xlane.f32.xlu0 %v2983_v60 }
0x1404   :  { %2987 = vmax.xlane.f32.xlu0 %v2986_v61 }
0x1464   :  { %v2982_v63 = vpop.xlane.xlu1 %2981 }
0x1465   :  { %v2990_v6 = vsub.f32 %v5111_v46, %v2982_v63 }
0x1466   :  { %v2979_v7 = vpop.xlane.xlu0 %2978 }
0x1467   :  { %v2995_v12 = vmul.f32 1.442695, %v2990_v6  ;;  %v2989_v14 = vsub.f32 %v2877_v50, %v2979_v7 }
0x1469   :  { %5352 = vpow2.f32 %v2995_v12  ;;  %v2993_v18 = vmul.f32 1.442695, %v2989_v14 }
0x146b   :  { %5354 = vpow2.f32 %v2993_v18 }
0x1476   :  { %v5353_v19 = vpop.eup %5352 }
0x1477   :  { %v3004_v29 = vsel %vm329_vm2, %v5353_v19, 0.0 }
0x1478   :  { %v5355_v51 = vpop.eup %5354  ;;  %3005 = vadd.xlane.f32.xlu0 %v3004_v29 }
0x1479   :  { %v3001_v5 = vsel %vm329_vm2, %v5355_v51, 0.0 }
0x147a   :  { %3002 = vadd.xlane.f32.xlu1 %v3001_v5 }
0x1489   :  { %v2985_v21 = vpop.xlane.xlu0 %2984 }
0x148a   :  { %v2991_v32 = vsub.f32 %v2968_v59, %v2985_v21 }
0x148b   :  { %3023 = vrot.lane.b32.xlu1 %v5972_v33, %s5444_s17 }
0x148c   :  { %v2997_v34 = vmul.f32 1.442695, %v2991_v32 }
0x148d   :  { %v2988_v23 = vpop.xlane.xlu0 %2987 }
0x148e   :  { %3021 = vrot.lane.b32.xlu0 %v5974_v35, %s5444_s17  ;;  %v2992_v25 = vsub.f32 %v5118_v58, %v2988_v23 }
0x148f   :  { %3110 = vrot.lane.b32.xlu1 %v5982_v37, %s5444_s17 }
0x1490   :  { %v2999_v38 = vmul.f32 1.442695, %v2992_v25 }
0x1492   :  { %3108 = vrot.lane.b32.xlu0 %v5984_v16, %s5444_s17  ;;  %5356 = vpow2.f32 %v2999_v38 }
0x1493   :  { %3201 = vrot.lane.b32.xlu1 %v5972_v33, %s5445_s18  ;;  %5358 = vpow2.f32 %v2997_v34 }
0x1496   :  { %3292 = vrot.lane.b32.xlu0 %v5982_v37, %s5445_s18 }
0x1497   :  { %3199 = vrot.lane.b32.xlu1 %v5974_v35, %s5445_s18 }
0x149b   :  { %3195 = vrot.lane.b32.xlu1 %v5974_v35, %s5446_s19 }
0x149f   :  { %3290 = vrot.lane.b32.xlu1 %v5984_v16, %s5445_s18  ;;  %v5357_v41 = vpop.eup %5356 }
0x14a0   :  { %v3010_v42 = vsel %vm329_vm2, %v5357_v41, 0.0  ;;  %v5359_v40 = vpop.eup %5358 }
0x14a1   :  { %v3007_v43 = vsel %vm329_vm2, %v5359_v40, 0.0 }
0x14b5   :  { %3011 = vadd.xlane.f32.xlu0 %v3010_v42 }
0x14c3   :  { %3008 = vadd.xlane.f32.xlu1 %v3007_v43 }
0x14cb   :  { %3197 = vrot.lane.b32.xlu0 %v5972_v33, %s5446_s19 }
0x14cf   :  { %3286 = vrot.lane.b32.xlu0 %v5984_v16, %s5446_s19 }
0x14d4   :  { %3288 = vrot.lane.b32.xlu1 %v5982_v37, %s5446_s19 }
0x1501   :  { %v3006_v44 = vpop.xlane.xlu0 %3005 }
0x1502   :  { %5360 = vrcp.f32 %v3006_v44 }
0x1503   :  { %v3003_v47 = vpop.xlane.xlu1 %3002 }
0x1504   :  { %5362 = vrcp.f32 %v3003_v47 }
0x1505   :  { %v3022_v48 = vpop.permute.xlu0 %3021 }
0x1507   :  { %v3024_v0 = vpop.permute.xlu1 %3023 }
0x1508   :  { %5119 = vmatprep.subr.mxu0 %v3024_v0 }
0x1509   :  { %5120 = vmatpush3.msra.mxu0 %v3024_v0  ;;  %v3109_v20 = vpop.permute.xlu0 %3108 }
0x150a   :  { %5121 = vmatprep.subr.mxu0 %v3022_v48 }
0x150b   :  { %v3111_v22 = vpop.permute.xlu1 %3110  ;;  %5122 = vmatpush3.msra.mxu0 %v3022_v48 }
0x150c   :  { %5126 = vmatprep.subr.mxu1 %v3111_v22 }
0x150d   :  { %5127 = vmatpush3.msra.mxu1 %v3111_v22  ;;  %v3293_v1 = vpop.permute.xlu0 %3292 }
0x150e   :  { %5128 = vmatprep.subr.mxu1 %v3109_v20 }
0x150f   :  { %v3202_v9 = vpop.permute.xlu1 %3201  ;;  %5129 = vmatpush3.msra.mxu1 %v3109_v20  ;;  %v5361_v17 = vpop.eup %5360 }
0x1510   :  { %5133 = vmatprep.subr.msk.mxu0 %vm156_vm1, %v3202_v9  ;;  %5140 = vmatprep.subr.msk.mxu1 %vm156_vm1, %v3293_v1  ;;  %v3016_v49 = vmul.f32 %v5361_v17, %v5353_v19 }
0x1511   :  { %v5363_v10 = vpop.eup %5362 }
0x1512   :  { %v3014_v45 = vmul.f32 %v5363_v10, %v5355_v51 }
0x1513   :  { %v3200_v46 = vpop.permute.xlu1 %3199 }
0x1514   :  { %5123 = vmatprep.mubr.msk.f32.mxu0 %vm329_vm2, %v3014_v45 }
0x1515   :  { %5124 = vmatmul.mubr.msk.f32.vlgmr.msra.gmra.mxu0 %vm329_vm2, %v3016_v49 }
0x1516   :  { %5134 = vmatpush3.xpose.msk.msra.mxu0 %vm156_vm1, %v3202_v9 }
0x1517   :  { %5135 = vmatprep.subr.msk.mxu0 %vm156_vm1, %v3200_v46  ;;  %v3196_v50 = vpop.permute.xlu1 %3195 }
0x1518   :  { %5137 = vmatprep.mubr.msk.f32.mxu0 %vm156_vm1, %v3196_v50 }
0x151a   :  { %5136 = vmatpush3.xpose.msk.msra.mxu0 %vm156_vm1, %v3200_v46 }
0x151b   :  { %v3291_v59 = vpop.permute.xlu1 %3290 }
0x153e   :  { %v3012_v53 = vpop.xlane.xlu0 %3011 }
0x153f   :  { %5364 = vrcp.f32 %v3012_v53 }
0x1542   :  { %v3198_v58 = vpop.permute.xlu0 %3197 }
0x1543   :  { %5138 = vmatmul.mubr.msk.f32.vlgmr.msra.gmra.mxu0 %vm156_vm1, %v3198_v58 }
0x1546   :  { %v3287_v12 = vpop.permute.xlu0 %3286 }
0x154c   :  { %v3009_v60 = vpop.xlane.xlu1 %3008  ;;  %v5365_v61 = vpop.eup %5364 }
0x154d   :  { %5366 = vrcp.f32 %v3009_v60  ;;  %v3020_v7 = vmul.f32 %v5365_v61, %v5357_v41 }
0x1550   :  { %v3289_v14 = vpop.permute.xlu1 %3288 }
0x155a   :  { %v5367_v63 = vpop.eup %5366 }
0x155b   :  { %v3018_v6 = vmul.f32 %v5367_v63, %v5359_v40 }
0x155d   :  { %5130 = vmatprep.mubr.msk.f32.mxu1 %vm329_vm2, %v3018_v6 }
0x155e   :  { %5131 = vmatmul.mubr.msk.f32.vlgmr.msra.gmra.mxu1 %vm329_vm2, %v3020_v7 }
0x155f   :  { %5141 = vmatpush3.xpose.msk.msra.mxu1 %vm156_vm1, %v3293_v1  ;;  %5144 = vmatprep.mubr.msk.f32.mxu1 %vm156_vm1, %v3287_v12 }
0x1560   :  { %5142 = vmatprep.subr.msk.mxu1 %vm156_vm1, %v3291_v59 }
0x1563   :  { %5143 = vmatpush3.xpose.msk.msra.mxu1 %vm156_vm1, %v3291_v59 }
0x1566   :  { %5145 = vmatmul.mubr.msk.f32.vlgmr.msra.gmra.mxu1 %vm156_vm1, %v3289_v14 }
0x15d5   :  { %v6108_v18 = vpop.f32.mrf.mxu0 }
0x15d7   :  { %v6110_v19 = vpop.f32.mrf.mxu0 }
0x1603   :  { %v5139_v29 = vpop.f32.mrf.mxu0 }
0x1604   :  { %v3380_v51 = vsel %vm329_vm2, %v5139_v29, -inf }
0x1605   :  { %3381 = vmax.xlane.f32.xlu1 %v3380_v51  ;;  %v3277_v5 = vpop.f32.mrf.mxu0 }
0x1606   :  { %v3377_v21 = vsel %vm329_vm2, %v3277_v5, -inf }
0x1607   :  { %3378 = vmax.xlane.f32.xlu0 %v3377_v21 }
0x161e   :  { %v6114_v23 = vpop.f32.mrf.mxu1 }
0x1620   :  { %v6116_v25 = vpop.f32.mrf.mxu1 }
0x1626   :  { %v5146_v38 = vpop.f32.mrf.mxu1 }
0x1627   :  { %v3386_v41 = vsel %vm329_vm2, %v5146_v38, -inf }
0x1628   :  { %v3368_v32 = vpop.f32.mrf.mxu1 }
0x1629   :  { %v3383_v34 = vsel %vm329_vm2, %v3368_v32, -inf }
0x162a   :  { %3384 = vmax.xlane.f32.xlu0 %v3383_v34 }
0x162e   :  { %3387 = vmax.xlane.f32.xlu0 %v3386_v41 }
0x168e   :  { %v3382_v42 = vpop.xlane.xlu1 %3381 }
0x168f   :  { %v3390_v40 = vsub.f32 %v5139_v29, %v3382_v42 }
0x1690   :  { %v3379_v43 = vpop.xlane.xlu0 %3378 }
0x1691   :  { %v3395_v44 = vmul.f32 1.442695, %v3390_v40  ;;  %v3389_v47 = vsub.f32 %v3277_v5, %v3379_v43 }
0x1693   :  { %5368 = vpow2.f32 %v3395_v44  ;;  %v3393_v48 = vmul.f32 1.442695, %v3389_v47 }
0x1695   :  { %5370 = vpow2.f32 %v3393_v48 }
0x16a0   :  { %v5369_v0 = vpop.eup %5368 }
0x16a1   :  { %v3404_v20 = vsel %vm329_vm2, %v5369_v0, 0.0 }
0x16a2   :  { %v5371_v22 = vpop.eup %5370  ;;  %3405 = vadd.xlane.f32.xlu0 %v3404_v20 }
0x16a3   :  { %v3401_v1 = vsel %vm329_vm2, %v5371_v22, 0.0 }
0x16a4   :  { %3402 = vadd.xlane.f32.xlu1 %v3401_v1 }
0x16b3   :  { %v3385_v9 = vpop.xlane.xlu0 %3384 }
0x16b4   :  { %v3391_v46 = vsub.f32 %v3368_v32, %v3385_v9 }
0x16b5   :  { %3423 = vrot.lane.b32.xlu1 %v5972_v33, %s5447_s20 }
0x16b6   :  { %v3397_v49 = vmul.f32 1.442695, %v3391_v46 }
0x16b7   :  { %v3388_v17 = vpop.xlane.xlu0 %3387 }
0x16b8   :  { %3421 = vrot.lane.b32.xlu0 %v5974_v35, %s5447_s20  ;;  %v3392_v10 = vsub.f32 %v5146_v38, %v3388_v17 }
0x16b9   :  { %3510 = vrot.lane.b32.xlu1 %v5982_v37, %s5447_s20 }
0x16ba   :  { %v3399_v45 = vmul.f32 1.442695, %v3392_v10 }
0x16bc   :  { %3508 = vrot.lane.b32.xlu0 %v5984_v16, %s5447_s20  ;;  %5372 = vpow2.f32 %v3399_v45 }
0x16bd   :  { %3601 = vrot.lane.b32.xlu1 %v5972_v33, %s5448_s21  ;;  %5374 = vpow2.f32 %v3397_v49 }
0x16c0   :  { %3692 = vrot.lane.b32.xlu0 %v5982_v37, %s5448_s21 }
0x16c1   :  { %3599 = vrot.lane.b32.xlu1 %v5974_v35, %s5448_s21 }
0x16c5   :  { %3595 = vrot.lane.b32.xlu1 %v5974_v35, %s5449_s22 }
0x16c9   :  { %3690 = vrot.lane.b32.xlu1 %v5984_v16, %s5448_s21  ;;  %v5373_v50 = vpop.eup %5372 }
0x16ca   :  { %v3410_v53 = vsel %vm329_vm2, %v5373_v50, 0.0  ;;  %v5375_v58 = vpop.eup %5374 }
0x16cb   :  { %v3407_v59 = vsel %vm329_vm2, %v5375_v58, 0.0 }
0x16df   :  { %3411 = vadd.xlane.f32.xlu0 %v3410_v53 }
0x16ed   :  { %3408 = vadd.xlane.f32.xlu1 %v3407_v59 }
0x16f5   :  { %3597 = vrot.lane.b32.xlu0 %v5972_v33, %s5449_s22 }
0x16f9   :  { %3686 = vrot.lane.b32.xlu0 %v5984_v16, %s5449_s22 }
0x16fe   :  { %3688 = vrot.lane.b32.xlu1 %v5982_v37, %s5449_s22 }
0x172b   :  { %v3406_v60 = vpop.xlane.xlu0 %3405 }
0x172c   :  { %5376 = vrcp.f32 %v3406_v60 }
0x172d   :  { %v3403_v61 = vpop.xlane.xlu1 %3402 }
0x172e   :  { %5378 = vrcp.f32 %v3403_v61 }
0x172f   :  { %v3422_v63 = vpop.permute.xlu0 %3421 }
0x1731   :  { %v3424_v6 = vpop.permute.xlu1 %3423 }
0x1732   :  { %5147 = vmatprep.subr.mxu0 %v3424_v6 }
0x1733   :  { %5148 = vmatpush3.msra.mxu0 %v3424_v6  ;;  %v3509_v7 = vpop.permute.xlu0 %3508 }
0x1734   :  { %5149 = vmatprep.subr.mxu0 %v3422_v63 }
0x1735   :  { %v3511_v12 = vpop.permute.xlu1 %3510  ;;  %5150 = vmatpush3.msra.mxu0 %v3422_v63 }
0x1736   :  { %5154 = vmatprep.subr.mxu1 %v3511_v12 }
0x1737   :  { %5155 = vmatpush3.msra.mxu1 %v3511_v12  ;;  %v3693_v14 = vpop.permute.xlu0 %3692 }
0x1738   :  { %5156 = vmatprep.subr.mxu1 %v3509_v7 }
0x1739   :  { %v3602_v29 = vpop.permute.xlu1 %3601  ;;  %5157 = vmatpush3.msra.mxu1 %v3509_v7  ;;  %v5377_v51 = vpop.eup %5376 }
0x173a   :  { %5161 = vmatprep.subr.msk.mxu0 %vm156_vm1, %v3602_v29  ;;  %5168 = vmatprep.subr.msk.mxu1 %vm156_vm1, %v3693_v14  ;;  %v3416_v32 = vmul.f32 %v5377_v51, %v5369_v0 }
0x173b   :  { %v5379_v5 = vpop.eup %5378 }
0x173c   :  { %v3414_v21 = vmul.f32 %v5379_v5, %v5371_v22 }
0x173d   :  { %v3600_v38 = vpop.permute.xlu1 %3599 }
0x173e   :  { %5151 = vmatprep.mubr.msk.f32.mxu0 %vm329_vm2, %v3414_v21 }
0x173f   :  { %5152 = vmatmul.mubr.msk.f32.vlgmr.msra.gmra.mxu0 %vm329_vm2, %v3416_v32 }
0x1740   :  { %5162 = vmatpush3.xpose.msk.msra.mxu0 %vm156_vm1, %v3602_v29 }
0x1741   :  { %5163 = vmatprep.subr.msk.mxu0 %vm156_vm1, %v3600_v38  ;;  %v3596_v34 = vpop.permute.xlu1 %3595 }
0x1742   :  { %5165 = vmatprep.mubr.msk.f32.mxu0 %vm156_vm1, %v3596_v34 }
0x1744   :  { %5164 = vmatpush3.xpose.msk.msra.mxu0 %vm156_vm1, %v3600_v38 }
0x1745   :  { %v3691_v40 = vpop.permute.xlu1 %3690 }
0x1768   :  { %v3412_v41 = vpop.xlane.xlu0 %3411 }
0x1769   :  { %5380 = vrcp.f32 %v3412_v41 }
0x176c   :  { %v3598_v42 = vpop.permute.xlu0 %3597 }
0x176d   :  { %5166 = vmatmul.mubr.msk.f32.vlgmr.msra.gmra.mxu0 %vm156_vm1, %v3598_v42 }
0x1770   :  { %v3687_v20 = vpop.permute.xlu0 %3686 }
0x1776   :  { %v3409_v43 = vpop.xlane.xlu1 %3408  ;;  %v5381_v44 = vpop.eup %5380 }
0x1777   :  { %5382 = vrcp.f32 %v3409_v43  ;;  %v3420_v0 = vmul.f32 %v5381_v44, %v5373_v50 }
0x177a   :  { %v3689_v22 = vpop.permute.xlu1 %3688 }
0x1784   :  { %v5383_v47 = vpop.eup %5382 }
0x1785   :  { %v3418_v48 = vmul.f32 %v5383_v47, %v5375_v58 }
0x1787   :  { %5158 = vmatprep.mubr.msk.f32.mxu1 %vm329_vm2, %v3418_v48 }
0x1788   :  { %5159 = vmatmul.mubr.msk.f32.vlgmr.msra.gmra.mxu1 %vm329_vm2, %v3420_v0 }
0x1789   :  { %5169 = vmatpush3.xpose.msk.msra.mxu1 %vm156_vm1, %v3693_v14  ;;  %5172 = vmatprep.mubr.msk.f32.mxu1 %vm156_vm1, %v3687_v20 }
0x178a   :  { %5170 = vmatprep.subr.msk.mxu1 %vm156_vm1, %v3691_v40 }
0x178d   :  { %5171 = vmatpush3.xpose.msk.msra.mxu1 %vm156_vm1, %v3691_v40 }
0x1790   :  { %5173 = vmatmul.mubr.msk.f32.vlgmr.msra.gmra.mxu1 %vm156_vm1, %v3689_v22 }
0x17ff   :  { %v5153_v1 = vpop.f32.mrf.mxu0 }
0x1801   :  { %v3499_v9 = vpop.f32.mrf.mxu0 }
0x182d   :  { %v5167_v17 = vpop.f32.mrf.mxu0 }
0x182e   :  { %v3780_v10 = vsel %vm329_vm2, %v5167_v17, -inf }
0x182f   :  { %3781 = vmax.xlane.f32.xlu1 %v3780_v10  ;;  %v3677_v45 = vpop.f32.mrf.mxu0 }
0x1830   :  { %v3777_v46 = vsel %vm329_vm2, %v3677_v45, -inf }
0x1831   :  { %3778 = vmax.xlane.f32.xlu0 %v3777_v46 }
0x1848   :  { %v6166_v49 = vpop.f32.mrf.mxu1 }
0x184a   :  { %v3586_v50 = vpop.f32.mrf.mxu1 }
0x1850   :  { %v5174_v53 = vpop.f32.mrf.mxu1 }
0x1851   :  { %v3786_v60 = vsel %vm329_vm2, %v5174_v53, -inf }
0x1852   :  { %v3768_v58 = vpop.f32.mrf.mxu1 }
0x1853   :  { %v3783_v59 = vsel %vm329_vm2, %v3768_v58, -inf }
0x1854   :  { %3784 = vmax.xlane.f32.xlu0 %v3783_v59 }
0x1858   :  { %3787 = vmax.xlane.f32.xlu0 %v3786_v60 }
0x18b8   :  { %v3782_v61 = vpop.xlane.xlu1 %3781 }
0x18b9   :  { %v3790_v63 = vsub.f32 %v5167_v17, %v3782_v61 }
0x18ba   :  { %v3779_v6 = vpop.xlane.xlu0 %3778 }
0x18bb   :  { %v3795_v7 = vmul.f32 1.442695, %v3790_v63  ;;  %v3789_v12 = vsub.f32 %v3677_v45, %v3779_v6 }
0x18bd   :  { %5384 = vpow2.f32 %v3795_v7  ;;  %v3793_v14 = vmul.f32 1.442695, %v3789_v12 }
0x18bf   :  { %5386 = vpow2.f32 %v3793_v14 }
0x18ca   :  { %v5385_v29 = vpop.eup %5384 }
0x18cb   :  { %v3804_v51 = vsel %vm329_vm2, %v5385_v29, 0.0 }
0x18cc   :  { %v5387_v5 = vpop.eup %5386  ;;  %3805 = vadd.xlane.f32.xlu0 %v3804_v51 }
0x18cd   :  { %v3801_v21 = vsel %vm329_vm2, %v5387_v5, 0.0 }
0x18ce   :  { %3802 = vadd.xlane.f32.xlu1 %v3801_v21 }
0x18dd   :  { %v3785_v38 = vpop.xlane.xlu0 %3784 }
0x18de   :  { %v3791_v42 = vsub.f32 %v3768_v58, %v3785_v38 }
0x18df   :  { %3823 = vrot.lane.b32.xlu1 %v5972_v33, %s5450_s23 }
0x18e0   :  { %v3797_v40 = vmul.f32 1.442695, %v3791_v42 }
0x18e1   :  { %v3788_v32 = vpop.xlane.xlu0 %3787 }
0x18e2   :  { %v3792_v34 = vsub.f32 %v5174_v53, %v3788_v32 }
0x18e3   :  { %3910 = vrot.lane.b32.xlu1 %v5982_v37, %s5450_s23 }
0x18e4   :  { %v3799_v41 = vmul.f32 1.442695, %v3792_v34 }
0x18e6   :  { %5388 = vpow2.f32 %v3799_v41 }
0x18e7   :  { %5390 = vpow2.f32 %v3797_v40 }
0x18f3   :  { %v6176_v43 = vpop.eup %5388 }
0x18f4   :  { %v3810_v44 = vsel %vm329_vm2, %v6176_v43, 0.0  ;;  %v5391_v47 = vpop.eup %5390 }
0x18f5   :  { %3811 = vadd.xlane.f32.xlu0 %v3810_v44  ;;  %v3807_v48 = vsel %vm329_vm2, %v5391_v47, 0.0 }
0x1907   :  { %3808 = vadd.xlane.f32.xlu1 %v3807_v48 }
0x190b   :  { %3821 = vrot.lane.b32.xlu0 %v5974_v35, %s5450_s23 }
0x190f   :  { %4069 = vrot.lane.b32.xlu0 %v5914_v2, %s5451_s24 }
0x1913   :  { %3999 = vrot.lane.b32.xlu0 %v6110_v19, %s5452_s25 }
0x1917   :  { %4001 = vrot.lane.b32.xlu0 %v6108_v18, %s5452_s25 }
0x1918   :  { %3908 = vrot.lane.b32.xlu1 %v5984_v16, %s5450_s23 }
0x191b   :  { %4017 = vrot.lane.b32.xlu0 %v5153_v1, %s5453_s26 }
0x191c   :  { %4067 = vrot.lane.b32.xlu1 %v5919_v24, %s5451_s24 }
0x191f   :  { %4063 = vrot.lane.b32.xlu0 %v5934_v8, %s5451_s24 }
0x1920   :  { %4065 = vrot.lane.b32.xlu1 %v5927_v26, %s5451_s24 }
0x1923   :  { %4003 = vrot.lane.b32.xlu0 %v6116_v25, %s5452_s25 }
0x1924   :  { %4015 = vrot.lane.b32.xlu1 %v3499_v9, %s5453_s26 }
0x1927   :  { %4019 = vrot.lane.b32.xlu0 %v3586_v50, %s5453_s26 }
0x1955   :  { %v3806_v26 = vpop.xlane.xlu0 %3805 }
0x1957   :  { %v3803_v2 = vpop.xlane.xlu1 %3802 }
0x1958   :  { %5392 = vrcp.f32 %v3803_v2 }
0x1959   :  { %5394 = vrcp.f32 %v3806_v26 }
0x195b   :  { %v3824_v33 = vpop.permute.xlu1 %3823 }
0x195c   :  { %5175 = vmatprep.subr.mxu0 %v3824_v33 }
0x195d   :  { %5176 = vmatpush3.msra.mxu0 %v3824_v33 }
0x195f   :  { %v3911_v35 = vpop.permute.xlu1 %3910 }
0x1960   :  { %5182 = vmatprep.subr.mxu1 %v3911_v35 }
0x1961   :  { %5183 = vmatpush3.msra.mxu1 %v3911_v35 }
0x1965   :  { %v5393_v24 = vpop.eup %5392 }
0x1966   :  { %v3814_v8 = vmul.f32 %v5393_v24, %v5387_v5  ;;  %v5395_v16 = vpop.eup %5394 }
0x1967   :  { %v3816_v19 = vmul.f32 %v5395_v16, %v5385_v29 }
0x1968   :  { %5179 = vmatprep.mubr.msk.f32.mxu0 %vm329_vm2, %v3814_v8 }
0x197e   :  { %v3812_v37 = vpop.xlane.xlu0 %3811 }
0x197f   :  { %5396 = vrcp.f32 %v3812_v37 }
0x1982   :  { %v3822_v18 = vpop.permute.xlu0 %3821 }
0x1983   :  { %5177 = vmatprep.subr.mxu0 %v3822_v18 }
0x1984   :  { %5178 = vmatpush3.msra.mxu0 %v3822_v18 }
0x1985   :  { %5180 = vmatmul.mubr.msk.f32.vlgmr.msra.gmra.mxu0 %vm329_vm2, %v3816_v19 }
0x1986   :  { %v4070_v25 = vpop.permute.xlu0 %4069 }
0x1987   :  { %5189 = vmatprep.subr.mxu0 %v4070_v25 }
0x1988   :  { %5190 = vmatpush3.msra.mxu0 %v4070_v25 }
0x198a   :  { %v4000_v0 = vpop.permute.xlu0 %3999 }
0x198b   :  { %v4043_v12 = vsel %vm156_vm1, %v6056_v13, %v4000_v0 }
0x198c   :  { %v5397_v50 = vpop.eup %5396 }
0x198d   :  { %v3820_v60 = vmul.f32 %v5397_v50, %v6176_v43 }
0x198e   :  { %v4002_v20 = vpop.permute.xlu0 %4001 }
0x198f   :  { %v4044_v1 = vsel %vm156_vm1, %v6054_v54, %v4002_v20 }
0x1990   :  { %v3809_v22 = vpop.xlane.xlu1 %3808 }
0x1991   :  { %5398 = vrcp.f32 %v3809_v22 }
0x1992   :  { %v4018_v9 = vpop.permute.xlu0 %4017 }
0x1993   :  { %v4048_v17 = vsel %vm329_vm2, %v4044_v1, %v4018_v9 }
0x1994   :  { %v3909_v10 = vpop.permute.xlu1 %3908 }
0x1995   :  { %5184 = vmatprep.subr.mxu1 %v3909_v10 }
0x1996   :  { %5185 = vmatpush3.msra.mxu1 %v3909_v10  ;;  %v4064_v58 = vpop.permute.xlu0 %4063 }
0x1998   :  { %v4068_v45 = vpop.permute.xlu1 %4067 }
0x1999   :  { %5191 = vmatprep.subr.mxu0 %v4068_v45 }
0x199a   :  { %5192 = vmatpush3.msra.mxu0 %v4068_v45  ;;  %v4004_v21 = vpop.permute.xlu0 %4003 }
0x199b   :  { %v4045_v34 = vsel %vm156_vm1, %v6060_v57, %v4004_v21  ;;  %v4058_v57 = vrot.slane %v5967_v30, %v1811_v36 }
0x199c   :  { %v4066_v46 = vpop.permute.xlu1 %4065 }
0x199d   :  { %5193 = vmatprep.subr.mxu0 %v4066_v46 }
0x199e   :  { %v5399_v53 = vpop.eup %5398  ;;  %5194 = vmatpush3.msra.mxu0 %v4066_v46  ;;  %v4020_v32 = vpop.permute.xlu0 %4019 }
0x199f   :  { %v3818_v59 = vmul.f32 %v5399_v53, %v5391_v47  ;;  %5195 = vmatprep.subr.mxu0 %v4064_v58  ;;  %v4049_v41 = vsel %vm329_vm2, %v4045_v34, %v4020_v32 }
0x19a0   :  { %5196 = vmatpush3.msra.mxu0 %v4064_v58  ;;  %v4016_v7 = vpop.permute.xlu1 %4015 }
0x19a1   :  { %5186 = vmatprep.mubr.msk.f32.mxu1 %vm329_vm2, %v3818_v59  ;;  %v4047_v14 = vsel %vm329_vm2, %v4043_v12, %v4016_v7  ;;  %v4611_v7 = vld [vmem:[%s6346_s3 + $0x68] sm:$0xff] }
0x19a2   :  { %5187 = vmatmul.mubr.msk.f32.vlgmr.msra.gmra.mxu1 %vm329_vm2, %v3820_v60 }
0x1a45   :  { %v5181_v54 = vpop.f32.mrf.mxu0 }
0x1a47   :  { %v3899_v61 = vpop.f32.mrf.mxu0 }
0x1a48   :  { %4031 = vrot.lane.b32.xlu1 %v3899_v61, %s5454_s27  ;;  %v4613_v61 = vld [vmem:[%s6346_s3 + $0x78] sm:$0xff] }
0x1a49   :  { %5203 = vmatprep.subr.mxu1 %v4613_v61 }
0x1a4a   :  { %5204 = vmatpush3.msra.mxu1 %v4613_v61 }
0x1a4c   :  { %4033 = vrot.lane.b32.xlu1 %v5181_v54, %s5454_s27 }
0x1a50   :  { %4005 = vrot.lane.b32.xlu1 %v6114_v23, %s5452_s25 }
0x1a54   :  { %4021 = vrot.lane.b32.xlu1 %v6166_v49, %s5453_s26 }
0x1a62   :  { %v5188_v63 = vpop.f32.mrf.mxu1 }
0x1a63   :  { %4037 = vrot.lane.b32.xlu1 %v5188_v63, %s5454_s27  ;;  %v4612_v63 = vld [vmem:[%s6346_s3 + $0x70] sm:$0xff] }
0x1a64   :  { %v3986_v6 = vpop.f32.mrf.mxu1  ;;  %5205 = vmatprep.subr.mxu1 %v4612_v63 }
0x1a65   :  { %4035 = vrot.lane.b32.xlu0 %v3986_v6, %s5454_s27  ;;  %5206 = vmatpush3.msra.mxu1 %v4612_v63 }
0x1a66   :  { %5207 = vmatprep.subr.mxu1 %v4611_v7 }
0x1a67   :  { %5208 = vmatpush3.msra.mxu1 %v4611_v7 }
0x1aba   :  { %v4032_v29 = vpop.permute.xlu1 %4031 }
0x1abb   :  { %v4051_v51 = vsel %vm1804_vm3, %v4047_v14, %v4032_v29  ;;  %v4610_v14 = vld [vmem:[%s6346_s3 + $0x60] sm:$0xff]  ;;  %v4621_v29 = vld [vmem:[%s6346_s3 + $0xb8] sm:$0xff] }
0x1abc   :  { %5197 = vmatprep.mubr.msk.f32.mxu0 %vm52_vm0, %v4051_v51  ;;  %5209 = vmatprep.subr.mxu1 %v4610_v14  ;;  %v4620_v51 = vld [vmem:[%s6346_s3 + $0xb0] sm:$0xff] }
0x1abd   :  { %5210 = vmatpush3.msra.mxu1 %v4610_v14  ;;  %5217 = vmatprep.subr.mxu0 %v4621_v29 }
0x1abe   :  { %v4034_v23 = vpop.permute.xlu1 %4033 }
0x1abf   :  { %v4052_v49 = vsel %vm1804_vm3, %v4048_v17, %v4034_v23  ;;  %v4619_v23 = vld [vmem:[%s6346_s3 + $0xa8] sm:$0xff] }
0x1ac0   :  { %5198 = vmatmul.mubr.msk.f32.vlgmr.msra.gmra.mxu0 %vm52_vm0, %v4052_v49  ;;  %v4618_v49 = vld [vmem:[%s6346_s3 + $0xa0] sm:$0xff] }
0x1ac1   :  { %5218 = vmatpush3.msra.mxu0 %v4621_v29 }
0x1ac2   :  { %v4006_v5 = vpop.permute.xlu1 %4005  ;;  %5219 = vmatprep.subr.mxu0 %v4620_v51 }
0x1ac3   :  { %v4046_v42 = vsel %vm156_vm1, %v6058_v55, %v4006_v5  ;;  %5220 = vmatpush3.msra.mxu0 %v4620_v51 }
0x1ac4   :  { %5221 = vmatprep.subr.mxu0 %v4619_v23 }
0x1ac5   :  { %5222 = vmatpush3.msra.mxu0 %v4619_v23 }
0x1ac6   :  { %v4022_v38 = vpop.permute.xlu1 %4021  ;;  %5223 = vmatprep.subr.mxu0 %v4618_v49 }
0x1ac7   :  { %v4050_v43 = vsel %vm329_vm2, %v4046_v42, %v4022_v38  ;;  %5224 = vmatpush3.msra.mxu0 %v4618_v49  ;;  %v6285_v42 = vld [vmem:[%s6347_s4 + $0x8] sm:$0xff] }
0x1ad5   :  { %v4038_v13 = vpop.permute.xlu1 %4037 }
0x1ad6   :  { %v4054_v47 = vsel %vm1804_vm3, %v4050_v43, %v4038_v13 }
0x1ad7   :  { %v4036_v40 = vpop.permute.xlu0 %4035 }
0x1ad8   :  { %v4053_v44 = vsel %vm1804_vm3, %v4049_v41, %v4036_v40  ;;  %v4231_v40 = vrot.slane %v6285_v42, %v1985_v39 }
0x1ad9   :  { %5200 = vmatprep.mubr.msk.f32.mxu0 %vm52_vm0, %v4053_v44 }
0x1ada   :  { %5201 = vmatmul.mubr.msk.f32.gmra.mxu0 %vm52_vm0, %v4054_v47 }
0x1b80   :  { %v5199_v48 = vpop.f32.mrf.mxu0 }
0x1b81   :  { %v4159_v2 = vadd.f32 %v5199_v48, %v4058_v57 }
0x1b82   :  { %v4153_v33 = vpop.f32.mrf.mxu0 }
0x1b83   :  { %v4173_v55 = vadd.f32 %v4159_v2, %v5950_v4  ;;  %v4154_v35 = vadd.f32 %v4153_v33, %v4058_v57 }
0x1b85   :  { %v4172_v24 = vadd.f32 %v4154_v35, %v5948_v3  ;;  %v4179_v8 = vsel %vm52_vm0, %v4173_v55, 0.0 }
0x1b86   :  { %4180 = vadd.xlane.f32.xlu1 %v4179_v8 }
0x1b87   :  { %v4176_v26 = vsel %vm52_vm0, %v4172_v24, 0.0 }
0x1b88   :  { %4177 = vadd.xlane.f32.xlu0 %v4176_v26 }
0x1b9a   :  { %v5202_v37 = vpop.f32.mrf.mxu0 }
0x1b9b   :  { %v4169_v18 = vadd.f32 %v5202_v37, %v4058_v57 }
0x1b9c   :  { %v4163_v16 = vpop.f32.mrf.mxu0 }
0x1b9d   :  { %v4164_v19 = vadd.f32 %v4163_v16, %v4058_v57  ;;  %v4175_v30 = vadd.f32 %v4169_v18, %v5958_v28  ;;  %v4239_v57 = vrot.slane %v6285_v42, %v1993_v31 }
0x1b9f   :  { %v4174_v36 = vadd.f32 %v4164_v19, %v5956_v27  ;;  %v4185_v4 = vsel %vm52_vm0, %v4175_v30, 0.0 }
0x1ba1   :  { %v4182_v25 = vsel %vm52_vm0, %v4174_v36, 0.0 }
0x1ba2   :  { %4183 = vadd.xlane.f32.xlu0 %v4182_v25 }
0x1ba6   :  { %4186 = vadd.xlane.f32.xlu0 %v4185_v4 }
0x1c0f   :  { %v4181_v3 = vpop.xlane.xlu1 %4180 }
0x1c10   :  { %v4189_v0 = vmul.f32 0.03125, %v4181_v3  ;;  %v4617_v3 = vld [vmem:[%s6346_s3 + $0x98] sm:$0xff] }
0x1c11   :  { %v4178_v20 = vpop.xlane.xlu0 %4177  ;;  %5225 = vmatprep.subr.mxu0 %v4617_v3 }
0x1c12   :  { %v4193_v22 = vsub.f32 %v4173_v55, %v4189_v0  ;;  %v4188_v1 = vmul.f32 0.03125, %v4178_v20  ;;  %5226 = vmatpush3.msra.mxu0 %v4617_v3  ;;  %v4616_v0 = vld [vmem:[%s6346_s3 + $0x90] sm:$0xff]  ;;  %v4615_v20 = vld [vmem:[%s6346_s3 + $0x88] sm:$0xff]  ;;  %v4509_v3 = vrot.slane %v6285_v42, %v2264_v11 }
0x1c13   :  { %5227 = vmatprep.subr.mxu0 %v4616_v0 }
0x1c14   :  { %v4192_v9 = vsub.f32 %v4172_v24, %v4188_v1  ;;  %v4197_v17 = vmul.f32 %v4193_v22, %v4193_v22  ;;  %5228 = vmatpush3.msra.mxu0 %v4616_v0  ;;  %v4247_v1 = vrot.slane %v6285_v42, %v2001_v52  ;;  %v4352_v52 = vrot.slane %v6285_v42, %v2106_v62 }
0x1c15   :  { %5229 = vmatprep.subr.mxu0 %v4615_v20 }
0x1c16   :  { %v4203_v10 = vsel %vm52_vm0, %v4197_v17, 0.0  ;;  %v4196_v45 = vmul.f32 %v4192_v9, %v4192_v9  ;;  %5230 = vmatpush3.msra.mxu0 %v4615_v20  ;;  %v4517_v20 = vrot.slane %v6285_v42, %v2272_v56 }
0x1c17   :  { %4204 = vadd.xlane.f32.xlu0 %v4203_v10 }
0x1c18   :  { %v4200_v27 = vsel %vm52_vm0, %v4196_v45, 0.0 }
0x1c19   :  { %4201 = vadd.xlane.f32.xlu1 %v4200_v27 }
0x1c2b   :  { %v4184_v28 = vpop.xlane.xlu0 %4183 }
0x1c2c   :  { %v4190_v46 = vmul.f32 0.03125, %v4184_v28 }
0x1c2e   :  { %v6248_v50 = vsub.f32 %v4174_v36, %v4190_v46 }
0x1c2f   :  { %v4187_v53 = vpop.xlane.xlu0 %4186 }
0x1c30   :  { %v4191_v58 = vmul.f32 0.03125, %v4187_v53  ;;  %v4198_v59 = vmul.f32 %v6248_v50, %v6248_v50 }
0x1c32   :  { %v6252_v60 = vsub.f32 %v4175_v30, %v4191_v58  ;;  %v4206_v54 = vsel %vm52_vm0, %v4198_v59, 0.0 }
0x1c33   :  { %4207 = vadd.xlane.f32.xlu1 %v4206_v54 }
0x1c34   :  { %v4199_v6 = vmul.f32 %v6252_v60, %v6252_v60 }
0x1c36   :  { %v4209_v12 = vsel %vm52_vm0, %v4199_v6, 0.0 }
0x1c37   :  { %4210 = vadd.xlane.f32.xlu0 %v4209_v12 }
0x1ca0   :  { %v4205_v5 = vpop.xlane.xlu0 %4204 }
0x1ca1   :  { %v4213_v21 = vmul.f32 0.03125, %v4205_v5 }
0x1ca2   :  { %v4202_v38 = vpop.xlane.xlu1 %4201 }
0x1ca3   :  { %v4217_v32 = vadd.f32 1e-05, %v4213_v21  ;;  %v4212_v34 = vmul.f32 0.03125, %v4202_v38 }
0x1ca5   :  { %5400 = vrsqrt.f32 %v4217_v32  ;;  %v4216_v13 = vadd.f32 1e-05, %v4212_v34 }
0x1ca7   :  { %5402 = vrsqrt.f32 %v4216_v13 }
0x1cb2   :  { %v5401_v41 = vpop.eup %5400 }
0x1cb3   :  { %v4225_v43 = vmul.f32 %v5401_v41, %v4193_v22  ;;  %v4614_v22 = vld [vmem:[%s6346_s3 + $0x80] sm:$0xff]  ;;  %s5455_s3 = smov [#allocation2]  }
0x1cb4   :  { %v5403_v44 = vpop.eup %5402  ;;  %5231 = vmatprep.subr.mxu0 %v4614_v22  ;;  %s4531_s2 = sshll.u32 %s5455_s3, 4  ;;  %s4532_s2 = int_to_ptr.vmem [resolvable:$true] %s4531_s2 }
0x1cb5   :  { %v4224_v47 = vmul.f32 %v5403_v44, %v4192_v9  ;;  %v4233_v48 = vmul.f32 %v4231_v40, %v4225_v43  ;;  %5232 = vmatpush3.msra.mxu0 %v4614_v22  ;;  %s5418_s0 = scalar_lea.vmem %s4532_s2, 512  ;;  %p5423_p1 = scmp.lt.s32.totalorder %s4532_s2, %s4532_s2 }
0x1cb6   :  { %p5419_p0 = scmp.ne.s32.totalorder %s4532_s2, %s5418_s0  ;;  %p5424_p2 = scmp.lt.s32.totalorder %s5418_s0, %s5418_s0 }
0x1cb7   :  { %v4232_v2 = vmul.f32 %v4231_v40, %v4224_v47  ;;  %v4241_v55 = vadd.f32 %v4239_v57, %v4233_v48 }
0x1cb8   :  { %p5425_p3 = por %p5424_p2, %p5423_p1 }
0x1cb9   :  { %v4240_v33 = vadd.f32 %v4239_v57, %v4232_v2 }
0x1cba   :  { %p5426_p4 = pnand %p5425_p3, %p5419_p0 }
0x1cbb   :  { %5211 = vmatprep.mubr.msk.f32.mxu1 %vm52_vm0, %v4240_v33 }
0x1cbc   :  { %5212 = vmatmul.mubr.msk.f32.vlgmr.msra.gmra.mxu1 %vm52_vm0, %v4241_v55  ;;  %v4208_v35 = vpop.xlane.xlu1 %4207 }
0x1cbd   :  { %v4214_v24 = vmul.f32 0.03125, %v4208_v35 }
0x1cbf   :  { %v4218_v8 = vadd.f32 1e-05, %v4214_v24 }
0x1cc0   :  { %v4211_v26 = vpop.xlane.xlu0 %4210 }
0x1cc1   :  { %5404 = vrsqrt.f32 %v4218_v8  ;;  %v4215_v39 = vmul.f32 0.03125, %v4211_v26 }
0x1cc3   :  { %v4219_v37 = vadd.f32 1e-05, %v4215_v39 }
0x1cc5   :  { %5406 = vrsqrt.f32 %v4219_v37 }
0x1cce   :  { %v5405_v16 = vpop.eup %5404 }
0x1ccf   :  { %v4226_v18 = vmul.f32 %v5405_v16, %v6248_v50 }
0x1cd1   :  { %v4234_v31 = vmul.f32 %v4231_v40, %v4226_v18 }
0x1cd2   :  { %v5407_v19 = vpop.eup %5406 }
0x1cd3   :  { %v4242_v36 = vadd.f32 %v4239_v57, %v4234_v31  ;;  %v4227_v30 = vmul.f32 %v5407_v19, %v6252_v60 }
0x1cd5   :  { %5214 = vmatprep.mubr.msk.f32.mxu1 %vm52_vm0, %v4242_v36  ;;  %v4235_v25 = vmul.f32 %v4231_v40, %v4227_v30 }
0x1cd7   :  { %v4243_v4 = vadd.f32 %v4239_v57, %v4235_v25 }
0x1cd9   :  { %5215 = vmatmul.mubr.msk.f32.gmra.mxu1 %vm52_vm0, %v4243_v4 }
0x1d7c   :  { %v5213_v9 = vpop.f32.mrf.mxu1 }
0x1d7d   :  { %v4332_v17 = vadd.f32 %v5213_v9, %v4247_v1 }
0x1d7e   :  { %v4326_v10 = vpop.f32.mrf.mxu1 }
0x1d7f   :  { %v4327_v45 = vadd.f32 %v4326_v10, %v4247_v1  ;;  %v4346_v28 = vmax.f32 %v4332_v17, 0.0 }
0x1d81   :  { %v4345_v27 = vmax.f32 %v4327_v45, 0.0 }
0x1d83   :  { %5233 = vmatprep.mubr.msk.f32.mxu0 %vm2108_vm4, %v4345_v27 }
0x1d84   :  { %5234 = vmatmul.mubr.msk.f32.vlgmr.msra.gmra.mxu0 %vm2108_vm4, %v4346_v28 }
0x1d99   :  { %v5216_v46 = vpop.f32.mrf.mxu1 }
0x1d9a   :  { %v4342_v50 = vadd.f32 %v5216_v46, %v4247_v1 }
0x1d9b   :  { %v4336_v53 = vpop.f32.mrf.mxu1 }
0x1d9c   :  { %v4337_v58 = vadd.f32 %v4336_v53, %v4247_v1  ;;  %v4348_v60 = vmax.f32 %v4342_v50, 0.0 }
0x1d9e   :  { %v4347_v59 = vmax.f32 %v4337_v58, 0.0 }
0x1da0   :  { %5236 = vmatprep.mubr.msk.f32.mxu0 %vm2108_vm4, %v4347_v59 }
0x1da1   :  { %5237 = vmatmul.mubr.msk.f32.gmra.mxu0 %vm2108_vm4, %v4348_v60 }
0x1e44   :  { %v5235_v54 = vpop.f32.mrf.mxu0 }
0x1e45   :  { %v4437_v61 = vadd.f32 %v5235_v54, %v4352_v52 }
0x1e46   :  { %v4431_v63 = vpop.f32.mrf.mxu0 }
0x1e47   :  { %v4451_v6 = vadd.f32 %v4437_v61, %v4241_v55  ;;  %v4432_v7 = vadd.f32 %v4431_v63, %v4352_v52 }
0x1e49   :  { %v4450_v12 = vadd.f32 %v4432_v7, %v4240_v33  ;;  %v4457_v14 = vsel %vm52_vm0, %v4451_v6, 0.0 }
0x1e4a   :  { %4458 = vadd.xlane.f32.xlu0 %v4457_v14 }
0x1e4b   :  { %v4454_v29 = vsel %vm52_vm0, %v4450_v12, 0.0 }
0x1e4c   :  { %4455 = vadd.xlane.f32.xlu1 %v4454_v29 }
0x1e61   :  { %v5238_v51 = vpop.f32.mrf.mxu0 }
0x1e62   :  { %v4447_v23 = vadd.f32 %v5238_v51, %v4352_v52 }
0x1e63   :  { %v4441_v49 = vpop.f32.mrf.mxu0 }
0x1e64   :  { %v4453_v5 = vadd.f32 %v4447_v23, %v4243_v4  ;;  %v4442_v21 = vadd.f32 %v4441_v49, %v4352_v52 }
0x1e66   :  { %v4452_v38 = vadd.f32 %v4442_v21, %v4242_v36  ;;  %v4463_v62 = vsel %vm52_vm0, %v4453_v5, 0.0 }
0x1e67   :  { %4464 = vadd.xlane.f32.xlu0 %v4463_v62 }
0x1e68   :  { %v4460_v32 = vsel %vm52_vm0, %v4452_v38, 0.0 }
0x1e69   :  { %4461 = vadd.xlane.f32.xlu1 %v4460_v32 }
0x1ed3   :  { %v4459_v34 = vpop.xlane.xlu0 %4458 }
0x1ed4   :  { %v4467_v13 = vmul.f32 0.03125, %v4459_v34 }
0x1ed5   :  { %v4456_v41 = vpop.xlane.xlu1 %4455 }
0x1ed6   :  { %v4471_v40 = vsub.f32 %v4451_v6, %v4467_v13  ;;  %v4466_v43 = vmul.f32 0.03125, %v4456_v41 }
0x1ed8   :  { %v4470_v44 = vsub.f32 %v4450_v12, %v4466_v43  ;;  %v4475_v47 = vmul.f32 %v4471_v40, %v4471_v40 }
0x1eda   :  { %v4481_v57 = vsel %vm52_vm0, %v4475_v47, 0.0  ;;  %v4474_v48 = vmul.f32 %v4470_v44, %v4470_v44 }
0x1edb   :  { %4482 = vadd.xlane.f32.xlu0 %v4481_v57 }
0x1edc   :  { %v4478_v2 = vsel %vm52_vm0, %v4474_v48, 0.0 }
0x1edd   :  { %4479 = vadd.xlane.f32.xlu1 %v4478_v2 }
0x1ef0   :  { %v4465_v33 = vpop.xlane.xlu0 %4464 }
0x1ef1   :  { %v4469_v55 = vmul.f32 0.03125, %v4465_v33 }
0x1ef2   :  { %v4462_v35 = vpop.xlane.xlu1 %4461 }
0x1ef3   :  { %v4473_v24 = vsub.f32 %v4453_v5, %v4469_v55  ;;  %v4468_v8 = vmul.f32 0.03125, %v4462_v35 }
0x1ef5   :  { %v4472_v26 = vsub.f32 %v4452_v38, %v4468_v8  ;;  %v4477_v39 = vmul.f32 %v4473_v24, %v4473_v24 }
0x1ef7   :  { %v4487_v37 = vsel %vm52_vm0, %v4477_v39, 0.0  ;;  %v4476_v16 = vmul.f32 %v4472_v26, %v4472_v26 }
0x1ef8   :  { %4488 = vadd.xlane.f32.xlu0 %v4487_v37 }
0x1ef9   :  { %v4484_v18 = vsel %vm52_vm0, %v4476_v16, 0.0 }
0x1efa   :  { %4485 = vadd.xlane.f32.xlu1 %v4484_v18 }
0x1f64   :  { %v4483_v31 = vpop.xlane.xlu0 %4482 }
0x1f65   :  { %v4491_v19 = vmul.f32 0.03125, %v4483_v31 }
0x1f66   :  { %v4480_v36 = vpop.xlane.xlu1 %4479 }
0x1f67   :  { %v4495_v30 = vadd.f32 1e-05, %v4491_v19  ;;  %v4490_v25 = vmul.f32 0.03125, %v4480_v36 }
0x1f69   :  { %5408 = vrsqrt.f32 %v4495_v30  ;;  %v4494_v4 = vadd.f32 1e-05, %v4490_v25 }
0x1f6b   :  { %5410 = vrsqrt.f32 %v4494_v4 }
0x1f76   :  { %v5409_v0 = vpop.eup %5408 }
0x1f77   :  { %v4503_v22 = vmul.f32 %v5409_v0, %v4471_v40 }
0x1f78   :  { %v5411_v1 = vpop.eup %5410 }
0x1f79   :  { %v4511_v9 = vmul.f32 %v4509_v3, %v4503_v22  ;;  %v4502_v17 = vmul.f32 %v5411_v1, %v4470_v44 }
0x1f7b   :  { %v4510_v10 = vmul.f32 %v4509_v3, %v4502_v17  ;;  %v4519_v45 = vadd.f32 %v4517_v20, %v4511_v9 }
0x1f7d   :  { %v4518_v27 = vadd.f32 %v4517_v20, %v4510_v10  ;;  %4523 = vst.msk [vmem:[#allocation2 + $0x8] sm:$0xff] %vm52_vm0, %v4519_v45 }
0x1f7f   :  { %4522 = vst.msk [vmem:[#allocation2] sm:$0xff] %vm52_vm0, %v4518_v27 }
0x1f81   :  { %v4489_v28 = vpop.xlane.xlu0 %4488 }
0x1f82   :  { %v4493_v46 = vmul.f32 0.03125, %v4489_v28 }
0x1f83   :  { %v4486_v50 = vpop.xlane.xlu1 %4485 }
0x1f84   :  { %v4497_v11 = vadd.f32 1e-05, %v4493_v46  ;;  %v4492_v53 = vmul.f32 0.03125, %v4486_v50 }
0x1f86   :  { %5412 = vrsqrt.f32 %v4497_v11  ;;  %v4496_v15 = vadd.f32 1e-05, %v4492_v53 }
0x1f88   :  { %5414 = vrsqrt.f32 %v4496_v15 }
0x1f93   :  { %v5413_v56 = vpop.eup %5412 }
0x1f94   :  { %v4505_v42 = vmul.f32 %v5413_v56, %v4473_v24 }
0x1f95   :  { %v5415_v58 = vpop.eup %5414 }
0x1f96   :  { %v4513_v59 = vmul.f32 %v4509_v3, %v4505_v42  ;;  %v4504_v60 = vmul.f32 %v5415_v58, %v4472_v26 }
0x1f98   :  { %v4512_v52 = vmul.f32 %v4509_v3, %v4504_v60  ;;  %v4521_v54 = vadd.f32 %v4517_v20, %v4513_v59 }
0x1f9a   :  { %v4520_v61 = vadd.f32 %v4517_v20, %v4512_v52  ;;  %4525 = vst.msk [vmem:[#allocation2 + $0x18] sm:$0xff] %vm52_vm0, %v4521_v54 }
0x1f9c   :  { %4524 = vst.msk [vmem:[#allocation2 + $0x10] sm:$0xff] %vm52_vm0, %v4520_v61 }
0x1f9d   :  { %5429 = shalt.err (!%p5426_p4)
}
0x1f9e   :  { %s5456_s13 = smov 128  }
0x1f9f   :  { %4537 = dma.vmem_to_hbm [thread:$0]  %s4532_s2, 512, %s6348_s5, [#allocation3], %s5456_s13, %s5456_s13, %s5452_s25  }
0x1fa0   :  { %5438 = dma.done.wait [#allocation3], 512  }
0x1fa1   :  { %5439 = vsyncadd [#allocation3], 4294966784 }
0x1fa2   :  { %4541 = vsyncpa [#allocation3], 1 }

</bundles_post_ra>
